<compile_context>
chip_gen: v7x
topology: tpu7x:2x2x1
jax: 0.10.0
libtpu: 0.0.40
codegen_flags: <defaults>
</compile_context>

<pallas_src>
import functools

import jax
import jax.numpy as jnp
from jax.experimental import pallas as pl
from jax.experimental.pallas import tpu as pltpu


# ---------------------------------------------------------------------------
# Fused LENET1 kernel
# ---------------------------------------------------------------------------
def _lenet1_kernel(xpad_ref, w1_ref, b1_ref, p1_ref, w2_ref, b2_ref, p2_ref,
                   wfc_ref, bfc_ref, o_ref,
                   xs1_ref, a1_ref, h1_ref, xs2_ref, a2_ref, blk_ref, f_ref,
                   *, n):
    ncol1 = n * 28 * 28          # flattened (sample, i, j) columns on the 28x28 grid
    ncol2 = n * 12 * 12          # flattened (sample, i, j) columns on the 12x12 grid

    # ---- conv1 im2col: 25 shifted full-column copies (VMEM->VMEM only) -----
    for ki in range(5):
        for kj in range(5):
            t = ki * 5 + kj
            off = ki * 28 + kj
            xs1_ref[t:t + 1, :] = xpad_ref[0:1, off:off + ncol1]

    # ---- conv1 GEMM (4,25)@(25, N*784) + bias + tanh, all on-chip ----------
    a1_ref[...] = jnp.tanh(
        jnp.dot(w1_ref[...], xs1_ref[...], preferred_element_type=jnp.float32)
        + b1_ref[...])

    # ---- pool1: per-sample matmul with a constant pool/selection matrix ----
    # (also drops the invalid border columns of the "full" conv output)
    h1_ref[...] = jnp.zeros_like(h1_ref)          # zero the shift-padding region
    for s in range(n):
        h1_ref[:, s * 144:(s + 1) * 144] = jnp.dot(
            a1_ref[:, s * 784:(s + 1) * 784], p1_ref[...],
            preferred_element_type=jnp.float32)

    # ---- conv2 im2col: 100 shifted row copies, rows ordered (ci, ki, kj) ---
    for ci in range(4):
        for ki in range(5):
            for kj in range(5):
                r = ci * 25 + ki * 5 + kj
                off = ki * 12 + kj
                xs2_ref[r:r + 1, :] = h1_ref[ci:ci + 1, off:off + ncol2]

    # ---- conv2 GEMM (12,100)@(100, N*144) + bias + tanh --------------------
    a2_ref[...] = jnp.tanh(
        jnp.dot(w2_ref[...], xs2_ref[...], preferred_element_type=jnp.float32)
        + b2_ref[...])

    # ---- pool2 + channel-major flatten into the FC input matrix ------------
    for s in range(n):
        blk_ref[...] = jnp.dot(a2_ref[:, s * 144:(s + 1) * 144], p2_ref[...],
                               preferred_element_type=jnp.float32)   # (12, 16)
        for c in range(12):
            # f[s, c*16 + (i*4+j)] = h2[s, c, i, j]  (torch.flatten order)
            f_ref[s:s + 1, c * 16:(c + 1) * 16] = blk_ref[c:c + 1, :]

    # ---- classifier: (N,192)@(192,num_classes) + bias; only HBM store ------
    o_ref[...] = (jnp.dot(f_ref[...], wfc_ref[...],
                          preferred_element_type=jnp.float32)
                  + bfc_ref[...]).astype(o_ref.dtype)


def _full_spec(shape):
    nd = len(shape)
    return pl.BlockSpec(tuple(shape), lambda *_: (0,) * nd)


def _pool_matrix(in_h, in_w, out_h, out_w):
    """(in_h*in_w, out_h*out_w) matrix: 0.25 where (I//2, J//2) == (io, jo).

    Rows index flattened input positions I*in_w + J; columns index flattened
    pooled positions io*out_w + jo.  Rows with I >= 2*out_h or J >= 2*out_w are
    all-zero, so the matmul simultaneously selects the valid conv region, does
    the 2x2 average pool, and re-flattens onto the pooled grid.
    """
    ii = jnp.arange(in_h).reshape(in_h, 1, 1, 1)
    jj = jnp.arange(in_w).reshape(1, in_w, 1, 1)
    oi = jnp.arange(out_h).reshape(1, 1, out_h, 1)
    oj = jnp.arange(out_w).reshape(1, 1, 1, out_w)
    hit = ((ii // 2) == oi) & ((jj // 2) == oj)
    return (0.25 * hit).reshape(in_h * in_w, out_h * out_w).astype(jnp.float32)


def lenet1_forward(x, params):
    """x: (N, 1, 28, 28) f32 -> logits (N, num_classes); one fused Pallas call."""
    w1, b1, w2, b2, wfc, bfc = params
    n = x.shape[0]
    num_classes = wfc.shape[0]
    ncol1, ncol2 = n * 784, n * 144

    # Host-side layout plumbing is now limited to trivial reshapes/pads of the
    # inputs; the pool matrices are shape-only constants (folded under jit).
    xpad = jnp.pad(x.reshape(1, ncol1), ((0, 0), (0, 128)))   # zero shift-padding
    p1 = _pool_matrix(28, 28, 12, 12)                          # (784, 144)
    p2 = _pool_matrix(12, 12, 4, 4)                            # (144, 16)

    inputs = (
        xpad,                                   # (1, N*784 + 128)
        w1.reshape(4, 25),                      # conv1 weight, rows (ki,kj)
        b1.reshape(4, 1),
        p1,
        w2.reshape(12, 100),                    # conv2 weight, rows (ci,ki,kj)
        b2.reshape(12, 1),
        p2,
        wfc.T,                                  # (192, num_classes)
        bfc.reshape(1, num_classes),
    )

    kernel = functools.partial(_lenet1_kernel, n=n)
    return pl.pallas_call(
        kernel,
        out_shape=jax.ShapeDtypeStruct((n, num_classes), jnp.float32),
        grid=(1,),
        in_specs=[_full_spec(a.shape) for a in inputs],
        out_specs=_full_spec((n, num_classes)),
        scratch_shapes=[
            pltpu.VMEM((25, ncol1), jnp.float32),        # conv1 patch matrix
            pltpu.VMEM((4, ncol1), jnp.float32),         # conv1 activations (full grid)
            pltpu.VMEM((4, ncol2 + 128), jnp.float32),   # pooled h1 (+ shift padding)
            pltpu.VMEM((100, ncol2), jnp.float32),       # conv2 patch matrix
            pltpu.VMEM((12, ncol2), jnp.float32),        # conv2 activations (full grid)
            pltpu.VMEM((12, 16), jnp.float32),           # per-sample pooled block
            pltpu.VMEM((n, 192), jnp.float32),           # flattened FC input
        ],
        compiler_params=pltpu.CompilerParams(
            dimension_semantics=("arbitrary",)),
    )(*inputs)


# ---------------------------------------------------------------------------
# Pure-JAX reference (same semantics as the PyTorch module)
# ---------------------------------------------------------------------------
def lenet1_ref(x, params):
    w1, b1, w2, b2, wfc, bfc = params
    hp = jax.lax.Precision.HIGHEST
    dn = ("NCHW", "OIHW", "NCHW")
    y = jax.lax.conv_general_dilated(x, w1, (1, 1), "VALID",
                                     dimension_numbers=dn, precision=hp)
    y = jnp.tanh(y + b1[None, :, None, None])
    y = y.reshape(y.shape[0], y.shape[1], 12, 2, 12, 2).mean(axis=(3, 5))
    y = jax.lax.conv_general_dilated(y, w2, (1, 1), "VALID",
                                     dimension_numbers=dn, precision=hp)
    y = jnp.tanh(y + b2[None, :, None, None])
    y = y.reshape(y.shape[0], y.shape[1], 4, 2, 4, 2).mean(axis=(3, 5))
    flat = y.reshape(y.shape[0], -1)
    return jnp.dot(flat, wfc.T, precision=hp) + bfc[None, :]


if __name__ == "__main__":
    key = jax.random.PRNGKey(0)
    kx, k1, k2, k3, k4, k5, k6 = jax.random.split(key, 7)

    batch, num_classes = 2, 10
    x = jax.random.normal(kx, (batch, 1, 28, 28), dtype=jnp.float32)
    params = (
        0.2 * jax.random.normal(k1, (4, 1, 5, 5), dtype=jnp.float32),    # conv1 w
        0.1 * jax.random.normal(k2, (4,), dtype=jnp.float32),            # conv1 b
        0.1 * jax.random.normal(k3, (12, 4, 5, 5), dtype=jnp.float32),   # conv2 w
        0.1 * jax.random.normal(k4, (12,), dtype=jnp.float32),           # conv2 b
        0.05 * jax.random.normal(k5, (num_classes, 12 * 4 * 4), dtype=jnp.float32),  # fc w
        0.1 * jax.random.normal(k6, (num_classes,), dtype=jnp.float32),               # fc b
    )

    fwd = jax.jit(lenet1_forward)
    logits = jax.block_until_ready(fwd(x, params))

    ref = lenet1_ref(x, params)
    assert logits.shape == (batch, num_classes) and logits.dtype == jnp.float32
    # The reference uses Precision.HIGHEST while all in-kernel dots (convs,
    # pool matmuls, FC) use the default f32 MXU path; end-to-end drift stays
    # comfortably inside this bound.
    max_err = float(jnp.max(jnp.abs(logits - ref)))
    assert jnp.allclose(logits, ref, atol=3e-2, rtol=3e-2), max_err

    print("KERNEL_OK")
</pallas_src>

<mosaic_0001>
module attributes {stable_mosaic.version = 11 : i64} {
  func.func @_lenet1_kernel(%arg0: i32, %arg1: memref<1x1696xf32, #tpu.memory_space<vmem>>, %arg2: memref<4x25xf32, #tpu.memory_space<vmem>>, %arg3: memref<4x1xf32, #tpu.memory_space<vmem>>, %arg4: memref<784x144xf32, #tpu.memory_space<vmem>>, %arg5: memref<12x100xf32, #tpu.memory_space<vmem>>, %arg6: memref<12x1xf32, #tpu.memory_space<vmem>>, %arg7: memref<144x16xf32, #tpu.memory_space<vmem>>, %arg8: memref<192x10xf32, #tpu.memory_space<vmem>>, %arg9: memref<1x10xf32, #tpu.memory_space<vmem>>, %arg10: memref<2x10xf32, #tpu.memory_space<vmem>>, %arg11: memref<25x1568xf32, #tpu.memory_space<vmem>>, %arg12: memref<4x1568xf32, #tpu.memory_space<vmem>>, %arg13: memref<4x416xf32, #tpu.memory_space<vmem>>, %arg14: memref<100x288xf32, #tpu.memory_space<vmem>>, %arg15: memref<12x288xf32, #tpu.memory_space<vmem>>, %arg16: memref<12x16xf32, #tpu.memory_space<vmem>>, %arg17: memref<2x192xf32, #tpu.memory_space<vmem>>) attributes {dimension_semantics = [#tpu.dimension_semantics<arbitrary>], iteration_bounds = array<i64: 1>, scalar_prefetch = 0 : i64, scratch_operands = 7 : i64, tpu.core_type = #tpu.core_type<tc>, window_params = [{pipeline_mode = #tpu.pipeline_mode<synchronous>, transform_indices = @transform_0, window_bounds = array<i64: 1, 1696>}, {pipeline_mode = #tpu.pipeline_mode<synchronous>, transform_indices = @transform_1, window_bounds = array<i64: 4, 25>}, {pipeline_mode = #tpu.pipeline_mode<synchronous>, transform_indices = @transform_2, window_bounds = array<i64: 4, 1>}, {pipeline_mode = #tpu.pipeline_mode<synchronous>, transform_indices = @transform_3, window_bounds = array<i64: 784, 144>}, {pipeline_mode = #tpu.pipeline_mode<synchronous>, transform_indices = @transform_4, window_bounds = array<i64: 12, 100>}, {pipeline_mode = #tpu.pipeline_mode<synchronous>, transform_indices = @transform_5, window_bounds = array<i64: 12, 1>}, {pipeline_mode = #tpu.pipeline_mode<synchronous>, transform_indices = @transform_6, window_bounds = array<i64: 144, 16>}, {pipeline_mode = #tpu.pipeline_mode<synchronous>, transform_indices = @transform_7, window_bounds = array<i64: 192, 10>}, {pipeline_mode = #tpu.pipeline_mode<synchronous>, transform_indices = @transform_8, window_bounds = array<i64: 1, 10>}, {pipeline_mode = #tpu.pipeline_mode<synchronous>, transform_indices = @transform_9, window_bounds = array<i64: 2, 10>}]} {
    %c0 = arith.constant 0 : index
    %c0_0 = arith.constant 0 : index
    %0 = vector.load %arg1[%c0, %c0_0] : memref<1x1696xf32, #tpu.memory_space<vmem>>, vector<1x1568xf32>
    %c0_1 = arith.constant 0 : index
    %c0_2 = arith.constant 0 : index
    %1 = vector.load %arg11[%c0_1, %c0_2] : memref<25x1568xf32, #tpu.memory_space<vmem>>, vector<1x1568xf32>
    tpu.vector_store %arg11[%c0_1, %c0_2], %0 {strides = array<i32>} : memref<25x1568xf32, #tpu.memory_space<vmem>>, vector<1x1568xf32>,
    %c0_3 = arith.constant 0 : index
    %c1 = arith.constant 1 : index
    %2 = vector.load %arg1[%c0_3, %c1] : memref<1x1696xf32, #tpu.memory_space<vmem>>, vector<1x1568xf32>
    %c1_4 = arith.constant 1 : index
    %c0_5 = arith.constant 0 : index
    %3 = vector.load %arg11[%c1_4, %c0_5] : memref<25x1568xf32, #tpu.memory_space<vmem>>, vector<1x1568xf32>
    tpu.vector_store %arg11[%c1_4, %c0_5], %2 {strides = array<i32>} : memref<25x1568xf32, #tpu.memory_space<vmem>>, vector<1x1568xf32>,
    %c0_6 = arith.constant 0 : index
    %c2 = arith.constant 2 : index
    %4 = vector.load %arg1[%c0_6, %c2] : memref<1x1696xf32, #tpu.memory_space<vmem>>, vector<1x1568xf32>
    %c2_7 = arith.constant 2 : index
    %c0_8 = arith.constant 0 : index
    %5 = vector.load %arg11[%c2_7, %c0_8] : memref<25x1568xf32, #tpu.memory_space<vmem>>, vector<1x1568xf32>
    tpu.vector_store %arg11[%c2_7, %c0_8], %4 {strides = array<i32>} : memref<25x1568xf32, #tpu.memory_space<vmem>>, vector<1x1568xf32>,
    %c0_9 = arith.constant 0 : index
    %c3 = arith.constant 3 : index
    %6 = vector.load %arg1[%c0_9, %c3] : memref<1x1696xf32, #tpu.memory_space<vmem>>, vector<1x1568xf32>
    %c3_10 = arith.constant 3 : index
    %c0_11 = arith.constant 0 : index
    %7 = vector.load %arg11[%c3_10, %c0_11] : memref<25x1568xf32, #tpu.memory_space<vmem>>, vector<1x1568xf32>
    tpu.vector_store %arg11[%c3_10, %c0_11], %6 {strides = array<i32>} : memref<25x1568xf32, #tpu.memory_space<vmem>>, vector<1x1568xf32>,
    %c0_12 = arith.constant 0 : index
    %c4 = arith.constant 4 : index
    %8 = vector.load %arg1[%c0_12, %c4] : memref<1x1696xf32, #tpu.memory_space<vmem>>, vector<1x1568xf32>
    %c4_13 = arith.constant 4 : index
    %c0_14 = arith.constant 0 : index
    %9 = vector.load %arg11[%c4_13, %c0_14] : memref<25x1568xf32, #tpu.memory_space<vmem>>, vector<1x1568xf32>
    tpu.vector_store %arg11[%c4_13, %c0_14], %8 {strides = array<i32>} : memref<25x1568xf32, #tpu.memory_space<vmem>>, vector<1x1568xf32>,
    %c0_15 = arith.constant 0 : index
    %c28 = arith.constant 28 : index
    %10 = vector.load %arg1[%c0_15, %c28] : memref<1x1696xf32, #tpu.memory_space<vmem>>, vector<1x1568xf32>
    %c5 = arith.constant 5 : index
    %c0_16 = arith.constant 0 : index
    %11 = vector.load %arg11[%c5, %c0_16] : memref<25x1568xf32, #tpu.memory_space<vmem>>, vector<1x1568xf32>
    tpu.vector_store %arg11[%c5, %c0_16], %10 {strides = array<i32>} : memref<25x1568xf32, #tpu.memory_space<vmem>>, vector<1x1568xf32>,
    %c0_17 = arith.constant 0 : index
    %c29 = arith.constant 29 : index
    %12 = vector.load %arg1[%c0_17, %c29] : memref<1x1696xf32, #tpu.memory_space<vmem>>, vector<1x1568xf32>
    %c6 = arith.constant 6 : index
    %c0_18 = arith.constant 0 : index
    %13 = vector.load %arg11[%c6, %c0_18] : memref<25x1568xf32, #tpu.memory_space<vmem>>, vector<1x1568xf32>
    tpu.vector_store %arg11[%c6, %c0_18], %12 {strides = array<i32>} : memref<25x1568xf32, #tpu.memory_space<vmem>>, vector<1x1568xf32>,
    %c0_19 = arith.constant 0 : index
    %c30 = arith.constant 30 : index
    %14 = vector.load %arg1[%c0_19, %c30] : memref<1x1696xf32, #tpu.memory_space<vmem>>, vector<1x1568xf32>
    %c7 = arith.constant 7 : index
    %c0_20 = arith.constant 0 : index
    %15 = vector.load %arg11[%c7, %c0_20] : memref<25x1568xf32, #tpu.memory_space<vmem>>, vector<1x1568xf32>
    tpu.vector_store %arg11[%c7, %c0_20], %14 {strides = array<i32>} : memref<25x1568xf32, #tpu.memory_space<vmem>>, vector<1x1568xf32>,
    %c0_21 = arith.constant 0 : index
    %c31 = arith.constant 31 : index
    %16 = vector.load %arg1[%c0_21, %c31] : memref<1x1696xf32, #tpu.memory_space<vmem>>, vector<1x1568xf32>
    %c8 = arith.constant 8 : index
    %c0_22 = arith.constant 0 : index
    %17 = vector.load %arg11[%c8, %c0_22] : memref<25x1568xf32, #tpu.memory_space<vmem>>, vector<1x1568xf32>
    tpu.vector_store %arg11[%c8, %c0_22], %16 {strides = array<i32>} : memref<25x1568xf32, #tpu.memory_space<vmem>>, vector<1x1568xf32>,
    %c0_23 = arith.constant 0 : index
    %c32 = arith.constant 32 : index
    %18 = vector.load %arg1[%c0_23, %c32] : memref<1x1696xf32, #tpu.memory_space<vmem>>, vector<1x1568xf32>
    %c9 = arith.constant 9 : index
    %c0_24 = arith.constant 0 : index
    %19 = vector.load %arg11[%c9, %c0_24] : memref<25x1568xf32, #tpu.memory_space<vmem>>, vector<1x1568xf32>
    tpu.vector_store %arg11[%c9, %c0_24], %18 {strides = array<i32>} : memref<25x1568xf32, #tpu.memory_space<vmem>>, vector<1x1568xf32>,
    %c0_25 = arith.constant 0 : index
    %c56 = arith.constant 56 : index
    %20 = vector.load %arg1[%c0_25, %c56] : memref<1x1696xf32, #tpu.memory_space<vmem>>, vector<1x1568xf32>
    %c10 = arith.constant 10 : index
    %c0_26 = arith.constant 0 : index
    %21 = vector.load %arg11[%c10, %c0_26] : memref<25x1568xf32, #tpu.memory_space<vmem>>, vector<1x1568xf32>
    tpu.vector_store %arg11[%c10, %c0_26], %20 {strides = array<i32>} : memref<25x1568xf32, #tpu.memory_space<vmem>>, vector<1x1568xf32>,
    %c0_27 = arith.constant 0 : index
    %c57 = arith.constant 57 : index
    %22 = vector.load %arg1[%c0_27, %c57] : memref<1x1696xf32, #tpu.memory_space<vmem>>, vector<1x1568xf32>
    %c11 = arith.constant 11 : index
    %c0_28 = arith.constant 0 : index
    %23 = vector.load %arg11[%c11, %c0_28] : memref<25x1568xf32, #tpu.memory_space<vmem>>, vector<1x1568xf32>
    tpu.vector_store %arg11[%c11, %c0_28], %22 {strides = array<i32>} : memref<25x1568xf32, #tpu.memory_space<vmem>>, vector<1x1568xf32>,
    %c0_29 = arith.constant 0 : index
    %c58 = arith.constant 58 : index
    %24 = vector.load %arg1[%c0_29, %c58] : memref<1x1696xf32, #tpu.memory_space<vmem>>, vector<1x1568xf32>
    %c12 = arith.constant 12 : index
    %c0_30 = arith.constant 0 : index
    %25 = vector.load %arg11[%c12, %c0_30] : memref<25x1568xf32, #tpu.memory_space<vmem>>, vector<1x1568xf32>
    tpu.vector_store %arg11[%c12, %c0_30], %24 {strides = array<i32>} : memref<25x1568xf32, #tpu.memory_space<vmem>>, vector<1x1568xf32>,
    %c0_31 = arith.constant 0 : index
    %c59 = arith.constant 59 : index
    %26 = vector.load %arg1[%c0_31, %c59] : memref<1x1696xf32, #tpu.memory_space<vmem>>, vector<1x1568xf32>
    %c13 = arith.constant 13 : index
    %c0_32 = arith.constant 0 : index
    %27 = vector.load %arg11[%c13, %c0_32] : memref<25x1568xf32, #tpu.memory_space<vmem>>, vector<1x1568xf32>
    tpu.vector_store %arg11[%c13, %c0_32], %26 {strides = array<i32>} : memref<25x1568xf32, #tpu.memory_space<vmem>>, vector<1x1568xf32>,
    %c0_33 = arith.constant 0 : index
    %c60 = arith.constant 60 : index
    %28 = vector.load %arg1[%c0_33, %c60] : memref<1x1696xf32, #tpu.memory_space<vmem>>, vector<1x1568xf32>
    %c14 = arith.constant 14 : index
    %c0_34 = arith.constant 0 : index
    %29 = vector.load %arg11[%c14, %c0_34] : memref<25x1568xf32, #tpu.memory_space<vmem>>, vector<1x1568xf32>
    tpu.vector_store %arg11[%c14, %c0_34], %28 {strides = array<i32>} : memref<25x1568xf32, #tpu.memory_space<vmem>>, vector<1x1568xf32>,
    %c0_35 = arith.constant 0 : index
    %c84 = arith.constant 84 : index
    %30 = vector.load %arg1[%c0_35, %c84] : memref<1x1696xf32, #tpu.memory_space<vmem>>, vector<1x1568xf32>
    %c15 = arith.constant 15 : index
    %c0_36 = arith.constant 0 : index
    %31 = vector.load %arg11[%c15, %c0_36] : memref<25x1568xf32, #tpu.memory_space<vmem>>, vector<1x1568xf32>
    tpu.vector_store %arg11[%c15, %c0_36], %30 {strides = array<i32>} : memref<25x1568xf32, #tpu.memory_space<vmem>>, vector<1x1568xf32>,
    %c0_37 = arith.constant 0 : index
    %c85 = arith.constant 85 : index
    %32 = vector.load %arg1[%c0_37, %c85] : memref<1x1696xf32, #tpu.memory_space<vmem>>, vector<1x1568xf32>
    %c16 = arith.constant 16 : index
    %c0_38 = arith.constant 0 : index
    %33 = vector.load %arg11[%c16, %c0_38] : memref<25x1568xf32, #tpu.memory_space<vmem>>, vector<1x1568xf32>
    tpu.vector_store %arg11[%c16, %c0_38], %32 {strides = array<i32>} : memref<25x1568xf32, #tpu.memory_space<vmem>>, vector<1x1568xf32>,
    %c0_39 = arith.constant 0 : index
    %c86 = arith.constant 86 : index
    %34 = vector.load %arg1[%c0_39, %c86] : memref<1x1696xf32, #tpu.memory_space<vmem>>, vector<1x1568xf32>
    %c17 = arith.constant 17 : index
    %c0_40 = arith.constant 0 : index
    %35 = vector.load %arg11[%c17, %c0_40] : memref<25x1568xf32, #tpu.memory_space<vmem>>, vector<1x1568xf32>
    tpu.vector_store %arg11[%c17, %c0_40], %34 {strides = array<i32>} : memref<25x1568xf32, #tpu.memory_space<vmem>>, vector<1x1568xf32>,
    %c0_41 = arith.constant 0 : index
    %c87 = arith.constant 87 : index
    %36 = vector.load %arg1[%c0_41, %c87] : memref<1x1696xf32, #tpu.memory_space<vmem>>, vector<1x1568xf32>
    %c18 = arith.constant 18 : index
    %c0_42 = arith.constant 0 : index
    %37 = vector.load %arg11[%c18, %c0_42] : memref<25x1568xf32, #tpu.memory_space<vmem>>, vector<1x1568xf32>
    tpu.vector_store %arg11[%c18, %c0_42], %36 {strides = array<i32>} : memref<25x1568xf32, #tpu.memory_space<vmem>>, vector<1x1568xf32>,
    %c0_43 = arith.constant 0 : index
    %c88 = arith.constant 88 : index
    %38 = vector.load %arg1[%c0_43, %c88] : memref<1x1696xf32, #tpu.memory_space<vmem>>, vector<1x1568xf32>
    %c19 = arith.constant 19 : index
    %c0_44 = arith.constant 0 : index
    %39 = vector.load %arg11[%c19, %c0_44] : memref<25x1568xf32, #tpu.memory_space<vmem>>, vector<1x1568xf32>
    tpu.vector_store %arg11[%c19, %c0_44], %38 {strides = array<i32>} : memref<25x1568xf32, #tpu.memory_space<vmem>>, vector<1x1568xf32>,
    %c0_45 = arith.constant 0 : index
    %c112 = arith.constant 112 : index
    %40 = vector.load %arg1[%c0_45, %c112] : memref<1x1696xf32, #tpu.memory_space<vmem>>, vector<1x1568xf32>
    %c20 = arith.constant 20 : index
    %c0_46 = arith.constant 0 : index
    %41 = vector.load %arg11[%c20, %c0_46] : memref<25x1568xf32, #tpu.memory_space<vmem>>, vector<1x1568xf32>
    tpu.vector_store %arg11[%c20, %c0_46], %40 {strides = array<i32>} : memref<25x1568xf32, #tpu.memory_space<vmem>>, vector<1x1568xf32>,
    %c0_47 = arith.constant 0 : index
    %c113 = arith.constant 113 : index
    %42 = vector.load %arg1[%c0_47, %c113] : memref<1x1696xf32, #tpu.memory_space<vmem>>, vector<1x1568xf32>
    %c21 = arith.constant 21 : index
    %c0_48 = arith.constant 0 : index
    %43 = vector.load %arg11[%c21, %c0_48] : memref<25x1568xf32, #tpu.memory_space<vmem>>, vector<1x1568xf32>
    tpu.vector_store %arg11[%c21, %c0_48], %42 {strides = array<i32>} : memref<25x1568xf32, #tpu.memory_space<vmem>>, vector<1x1568xf32>,
    %c0_49 = arith.constant 0 : index
    %c114 = arith.constant 114 : index
    %44 = vector.load %arg1[%c0_49, %c114] : memref<1x1696xf32, #tpu.memory_space<vmem>>, vector<1x1568xf32>
    %c22 = arith.constant 22 : index
    %c0_50 = arith.constant 0 : index
    %45 = vector.load %arg11[%c22, %c0_50] : memref<25x1568xf32, #tpu.memory_space<vmem>>, vector<1x1568xf32>
    tpu.vector_store %arg11[%c22, %c0_50], %44 {strides = array<i32>} : memref<25x1568xf32, #tpu.memory_space<vmem>>, vector<1x1568xf32>,
    %c0_51 = arith.constant 0 : index
    %c115 = arith.constant 115 : index
    %46 = vector.load %arg1[%c0_51, %c115] : memref<1x1696xf32, #tpu.memory_space<vmem>>, vector<1x1568xf32>
    %c23 = arith.constant 23 : index
    %c0_52 = arith.constant 0 : index
    %47 = vector.load %arg11[%c23, %c0_52] : memref<25x1568xf32, #tpu.memory_space<vmem>>, vector<1x1568xf32>
    tpu.vector_store %arg11[%c23, %c0_52], %46 {strides = array<i32>} : memref<25x1568xf32, #tpu.memory_space<vmem>>, vector<1x1568xf32>,
    %c0_53 = arith.constant 0 : index
    %c116 = arith.constant 116 : index
    %48 = vector.load %arg1[%c0_53, %c116] : memref<1x1696xf32, #tpu.memory_space<vmem>>, vector<1x1568xf32>
    %c24 = arith.constant 24 : index
    %c0_54 = arith.constant 0 : index
    %49 = vector.load %arg11[%c24, %c0_54] : memref<25x1568xf32, #tpu.memory_space<vmem>>, vector<1x1568xf32>
    tpu.vector_store %arg11[%c24, %c0_54], %48 {strides = array<i32>} : memref<25x1568xf32, #tpu.memory_space<vmem>>, vector<1x1568xf32>,
    %c0_55 = arith.constant 0 : index
    %c0_56 = arith.constant 0 : index
    %50 = vector.load %arg2[%c0_55, %c0_56] : memref<4x25xf32, #tpu.memory_space<vmem>>, vector<4x25xf32>
    %c0_57 = arith.constant 0 : index
    %c0_58 = arith.constant 0 : index
    %51 = vector.load %arg11[%c0_57, %c0_58] : memref<25x1568xf32, #tpu.memory_space<vmem>>, vector<25x1568xf32>
    %cst = arith.constant dense<0.000000e+00> : vector<4x1568xf32>
    %52 = tpu.matmul %50, %51, %cst {dimension_numbers = #tpu.dot_dimension_numbers<[1], [0], [0], [1], [0, 0, 1, 1], [], []>} : vector<4x25xf32>, vector<25x1568xf32>, vector<4x1568xf32> -> vector<4x1568xf32>
    %c0_59 = arith.constant 0 : index
    %c0_60 = arith.constant 0 : index
    %53 = vector.load %arg3[%c0_59, %c0_60] : memref<4x1xf32, #tpu.memory_space<vmem>>, vector<4x1xf32>
    %54 = vector.broadcast %53 : vector<4x1xf32> to vector<4x1568xf32>
    %55 = arith.addf %52, %54 : vector<4x1568xf32>
    %56 = math.tanh %55 : vector<4x1568xf32>
    %c0_61 = arith.constant 0 : index
    %c0_62 = arith.constant 0 : index
    %57 = vector.load %arg12[%c0_61, %c0_62] : memref<4x1568xf32, #tpu.memory_space<vmem>>, vector<4x1568xf32>
    tpu.vector_store %arg12[%c0_61, %c0_62], %56 {strides = array<i32>} : memref<4x1568xf32, #tpu.memory_space<vmem>>, vector<4x1568xf32>,
    %cst_63 = arith.constant 0.000000e+00 : f32
    %58 = vector.broadcast %cst_63 : f32 to vector<4x416xf32>
    %c0_64 = arith.constant 0 : index
    %c0_65 = arith.constant 0 : index
    %59 = vector.load %arg13[%c0_64, %c0_65] : memref<4x416xf32, #tpu.memory_space<vmem>>, vector<4x416xf32>
    tpu.vector_store %arg13[%c0_64, %c0_65], %58 {strides = array<i32>} : memref<4x416xf32, #tpu.memory_space<vmem>>, vector<4x416xf32>,
    %c0_66 = arith.constant 0 : index
    %c0_67 = arith.constant 0 : index
    %60 = vector.load %arg12[%c0_66, %c0_67] : memref<4x1568xf32, #tpu.memory_space<vmem>>, vector<4x784xf32>
    %c0_68 = arith.constant 0 : index
    %c0_69 = arith.constant 0 : index
    %61 = vector.load %arg4[%c0_68, %c0_69] : memref<784x144xf32, #tpu.memory_space<vmem>>, vector<784x144xf32>
    %cst_70 = arith.constant dense<0.000000e+00> : vector<4x144xf32>
    %62 = tpu.matmul %60, %61, %cst_70 {dimension_numbers = #tpu.dot_dimension_numbers<[1], [0], [0], [1], [0, 0, 1, 1], [], []>} : vector<4x784xf32>, vector<784x144xf32>, vector<4x144xf32> -> vector<4x144xf32>
    %c0_71 = arith.constant 0 : index
    %c0_72 = arith.constant 0 : index
    %63 = vector.load %arg13[%c0_71, %c0_72] : memref<4x416xf32, #tpu.memory_space<vmem>>, vector<4x144xf32>
    tpu.vector_store %arg13[%c0_71, %c0_72], %62 {strides = array<i32>} : memref<4x416xf32, #tpu.memory_space<vmem>>, vector<4x144xf32>,
    %c0_73 = arith.constant 0 : index
    %c784 = arith.constant 784 : index
    %64 = vector.load %arg12[%c0_73, %c784] : memref<4x1568xf32, #tpu.memory_space<vmem>>, vector<4x784xf32>
    %c0_74 = arith.constant 0 : index
    %c0_75 = arith.constant 0 : index
    %65 = vector.load %arg4[%c0_74, %c0_75] : memref<784x144xf32, #tpu.memory_space<vmem>>, vector<784x144xf32>
    %cst_76 = arith.constant dense<0.000000e+00> : vector<4x144xf32>
    %66 = tpu.matmul %64, %65, %cst_76 {dimension_numbers = #tpu.dot_dimension_numbers<[1], [0], [0], [1], [0, 0, 1, 1], [], []>} : vector<4x784xf32>, vector<784x144xf32>, vector<4x144xf32> -> vector<4x144xf32>
    %c0_77 = arith.constant 0 : index
    %c144 = arith.constant 144 : index
    %67 = vector.load %arg13[%c0_77, %c144] : memref<4x416xf32, #tpu.memory_space<vmem>>, vector<4x144xf32>
    tpu.vector_store %arg13[%c0_77, %c144], %66 {strides = array<i32>} : memref<4x416xf32, #tpu.memory_space<vmem>>, vector<4x144xf32>,
    %c0_78 = arith.constant 0 : index
    %c0_79 = arith.constant 0 : index
    %68 = vector.load %arg13[%c0_78, %c0_79] : memref<4x416xf32, #tpu.memory_space<vmem>>, vector<1x288xf32>
    %c0_80 = arith.constant 0 : index
    %c0_81 = arith.constant 0 : index
    %69 = vector.load %arg14[%c0_80, %c0_81] : memref<100x288xf32, #tpu.memory_space<vmem>>, vector<1x288xf32>
    tpu.vector_store %arg14[%c0_80, %c0_81], %68 {strides = array<i32>} : memref<100x288xf32, #tpu.memory_space<vmem>>, vector<1x288xf32>,
    %c0_82 = arith.constant 0 : index
    %c1_83 = arith.constant 1 : index
    %70 = vector.load %arg13[%c0_82, %c1_83] : memref<4x416xf32, #tpu.memory_space<vmem>>, vector<1x288xf32>
    %c1_84 = arith.constant 1 : index
    %c0_85 = arith.constant 0 : index
    %71 = vector.load %arg14[%c1_84, %c0_85] : memref<100x288xf32, #tpu.memory_space<vmem>>, vector<1x288xf32>
    tpu.vector_store %arg14[%c1_84, %c0_85], %70 {strides = array<i32>} : memref<100x288xf32, #tpu.memory_space<vmem>>, vector<1x288xf32>,
    %c0_86 = arith.constant 0 : index
    %c2_87 = arith.constant 2 : index
    %72 = vector.load %arg13[%c0_86, %c2_87] : memref<4x416xf32, #tpu.memory_space<vmem>>, vector<1x288xf32>
    %c2_88 = arith.constant 2 : index
    %c0_89 = arith.constant 0 : index
    %73 = vector.load %arg14[%c2_88, %c0_89] : memref<100x288xf32, #tpu.memory_space<vmem>>, vector<1x288xf32>
    tpu.vector_store %arg14[%c2_88, %c0_89], %72 {strides = array<i32>} : memref<100x288xf32, #tpu.memory_space<vmem>>, vector<1x288xf32>,
    %c0_90 = arith.constant 0 : index
    %c3_91 = arith.constant 3 : index
    %74 = vector.load %arg13[%c0_90, %c3_91] : memref<4x416xf32, #tpu.memory_space<vmem>>, vector<1x288xf32>
    %c3_92 = arith.constant 3 : index
    %c0_93 = arith.constant 0 : index
    %75 = vector.load %arg14[%c3_92, %c0_93] : memref<100x288xf32, #tpu.memory_space<vmem>>, vector<1x288xf32>
    tpu.vector_store %arg14[%c3_92, %c0_93], %74 {strides = array<i32>} : memref<100x288xf32, #tpu.memory_space<vmem>>, vector<1x288xf32>,
    %c0_94 = arith.constant 0 : index
    %c4_95 = arith.constant 4 : index
    %76 = vector.load %arg13[%c0_94, %c4_95] : memref<4x416xf32, #tpu.memory_space<vmem>>, vector<1x288xf32>
    %c4_96 = arith.constant 4 : index
    %c0_97 = arith.constant 0 : index
    %77 = vector.load %arg14[%c4_96, %c0_97] : memref<100x288xf32, #tpu.memory_space<vmem>>, vector<1x288xf32>
    tpu.vector_store %arg14[%c4_96, %c0_97], %76 {strides = array<i32>} : memref<100x288xf32, #tpu.memory_space<vmem>>, vector<1x288xf32>,
    %c0_98 = arith.constant 0 : index
    %c12_99 = arith.constant 12 : index
    %78 = vector.load %arg13[%c0_98, %c12_99] : memref<4x416xf32, #tpu.memory_space<vmem>>, vector<1x288xf32>
    %c5_100 = arith.constant 5 : index
    %c0_101 = arith.constant 0 : index
    %79 = vector.load %arg14[%c5_100, %c0_101] : memref<100x288xf32, #tpu.memory_space<vmem>>, vector<1x288xf32>
    tpu.vector_store %arg14[%c5_100, %c0_101], %78 {strides = array<i32>} : memref<100x288xf32, #tpu.memory_space<vmem>>, vector<1x288xf32>,
    %c0_102 = arith.constant 0 : index
    %c13_103 = arith.constant 13 : index
    %80 = vector.load %arg13[%c0_102, %c13_103] : memref<4x416xf32, #tpu.memory_space<vmem>>, vector<1x288xf32>
    %c6_104 = arith.constant 6 : index
    %c0_105 = arith.constant 0 : index
    %81 = vector.load %arg14[%c6_104, %c0_105] : memref<100x288xf32, #tpu.memory_space<vmem>>, vector<1x288xf32>
    tpu.vector_store %arg14[%c6_104, %c0_105], %80 {strides = array<i32>} : memref<100x288xf32, #tpu.memory_space<vmem>>, vector<1x288xf32>,
    %c0_106 = arith.constant 0 : index
    %c14_107 = arith.constant 14 : index
    %82 = vector.load %arg13[%c0_106, %c14_107] : memref<4x416xf32, #tpu.memory_space<vmem>>, vector<1x288xf32>
    %c7_108 = arith.constant 7 : index
    %c0_109 = arith.constant 0 : index
    %83 = vector.load %arg14[%c7_108, %c0_109] : memref<100x288xf32, #tpu.memory_space<vmem>>, vector<1x288xf32>
    tpu.vector_store %arg14[%c7_108, %c0_109], %82 {strides = array<i32>} : memref<100x288xf32, #tpu.memory_space<vmem>>, vector<1x288xf32>,
    %c0_110 = arith.constant 0 : index
    %c15_111 = arith.constant 15 : index
    %84 = vector.load %arg13[%c0_110, %c15_111] : memref<4x416xf32, #tpu.memory_space<vmem>>, vector<1x288xf32>
    %c8_112 = arith.constant 8 : index
    %c0_113 = arith.constant 0 : index
    %85 = vector.load %arg14[%c8_112, %c0_113] : memref<100x288xf32, #tpu.memory_space<vmem>>, vector<1x288xf32>
    tpu.vector_store %arg14[%c8_112, %c0_113], %84 {strides = array<i32>} : memref<100x288xf32, #tpu.memory_space<vmem>>, vector<1x288xf32>,
    %c0_114 = arith.constant 0 : index
    %c16_115 = arith.constant 16 : index
    %86 = vector.load %arg13[%c0_114, %c16_115] : memref<4x416xf32, #tpu.memory_space<vmem>>, vector<1x288xf32>
    %c9_116 = arith.constant 9 : index
    %c0_117 = arith.constant 0 : index
    %87 = vector.load %arg14[%c9_116, %c0_117] : memref<100x288xf32, #tpu.memory_space<vmem>>, vector<1x288xf32>
    tpu.vector_store %arg14[%c9_116, %c0_117], %86 {strides = array<i32>} : memref<100x288xf32, #tpu.memory_space<vmem>>, vector<1x288xf32>,
    %c0_118 = arith.constant 0 : index
    %c24_119 = arith.constant 24 : index
    %88 = vector.load %arg13[%c0_118, %c24_119] : memref<4x416xf32, #tpu.memory_space<vmem>>, vector<1x288xf32>
    %c10_120 = arith.constant 10 : index
    %c0_121 = arith.constant 0 : index
    %89 = vector.load %arg14[%c10_120, %c0_121] : memref<100x288xf32, #tpu.memory_space<vmem>>, vector<1x288xf32>
    tpu.vector_store %arg14[%c10_120, %c0_121], %88 {strides = array<i32>} : memref<100x288xf32, #tpu.memory_space<vmem>>, vector<1x288xf32>,
    %c0_122 = arith.constant 0 : index
    %c25 = arith.constant 25 : index
    %90 = vector.load %arg13[%c0_122, %c25] : memref<4x416xf32, #tpu.memory_space<vmem>>, vector<1x288xf32>
    %c11_123 = arith.constant 11 : index
    %c0_124 = arith.constant 0 : index
    %91 = vector.load %arg14[%c11_123, %c0_124] : memref<100x288xf32, #tpu.memory_space<vmem>>, vector<1x288xf32>
    tpu.vector_store %arg14[%c11_123, %c0_124], %90 {strides = array<i32>} : memref<100x288xf32, #tpu.memory_space<vmem>>, vector<1x288xf32>,
    %c0_125 = arith.constant 0 : index
    %c26 = arith.constant 26 : index
    %92 = vector.load %arg13[%c0_125, %c26] : memref<4x416xf32, #tpu.memory_space<vmem>>, vector<1x288xf32>
    %c12_126 = arith.constant 12 : index
    %c0_127 = arith.constant 0 : index
    %93 = vector.load %arg14[%c12_126, %c0_127] : memref<100x288xf32, #tpu.memory_space<vmem>>, vector<1x288xf32>
    tpu.vector_store %arg14[%c12_126, %c0_127], %92 {strides = array<i32>} : memref<100x288xf32, #tpu.memory_space<vmem>>, vector<1x288xf32>,
    %c0_128 = arith.constant 0 : index
    %c27 = arith.constant 27 : index
    %94 = vector.load %arg13[%c0_128, %c27] : memref<4x416xf32, #tpu.memory_space<vmem>>, vector<1x288xf32>
    %c13_129 = arith.constant 13 : index
    %c0_130 = arith.constant 0 : index
    %95 = vector.load %arg14[%c13_129, %c0_130] : memref<100x288xf32, #tpu.memory_space<vmem>>, vector<1x288xf32>
    tpu.vector_store %arg14[%c13_129, %c0_130], %94 {strides = array<i32>} : memref<100x288xf32, #tpu.memory_space<vmem>>, vector<1x288xf32>,
    %c0_131 = arith.constant 0 : index
    %c28_132 = arith.constant 28 : index
    %96 = vector.load %arg13[%c0_131, %c28_132] : memref<4x416xf32, #tpu.memory_space<vmem>>, vector<1x288xf32>
    %c14_133 = arith.constant 14 : index
    %c0_134 = arith.constant 0 : index
    %97 = vector.load %arg14[%c14_133, %c0_134] : memref<100x288xf32, #tpu.memory_space<vmem>>, vector<1x288xf32>
    tpu.vector_store %arg14[%c14_133, %c0_134], %96 {strides = array<i32>} : memref<100x288xf32, #tpu.memory_space<vmem>>, vector<1x288xf32>,
    %c0_135 = arith.constant 0 : index
    %c36 = arith.constant 36 : index
    %98 = vector.load %arg13[%c0_135, %c36] : memref<4x416xf32, #tpu.memory_space<vmem>>, vector<1x288xf32>
    %c15_136 = arith.constant 15 : index
    %c0_137 = arith.constant 0 : index
    %99 = vector.load %arg14[%c15_136, %c0_137] : memref<100x288xf32, #tpu.memory_space<vmem>>, vector<1x288xf32>
    tpu.vector_store %arg14[%c15_136, %c0_137], %98 {strides = array<i32>} : memref<100x288xf32, #tpu.memory_space<vmem>>, vector<1x288xf32>,
    %c0_138 = arith.constant 0 : index
    %c37 = arith.constant 37 : index
    %100 = vector.load %arg13[%c0_138, %c37] : memref<4x416xf32, #tpu.memory_space<vmem>>, vector<1x288xf32>
    %c16_139 = arith.constant 16 : index
    %c0_140 = arith.constant 0 : index
    %101 = vector.load %arg14[%c16_139, %c0_140] : memref<100x288xf32, #tpu.memory_space<vmem>>, vector<1x288xf32>
    tpu.vector_store %arg14[%c16_139, %c0_140], %100 {strides = array<i32>} : memref<100x288xf32, #tpu.memory_space<vmem>>, vector<1x288xf32>,
    %c0_141 = arith.constant 0 : index
    %c38 = arith.constant 38 : index
    %102 = vector.load %arg13[%c0_141, %c38] : memref<4x416xf32, #tpu.memory_space<vmem>>, vector<1x288xf32>
    %c17_142 = arith.constant 17 : index
    %c0_143 = arith.constant 0 : index
    %103 = vector.load %arg14[%c17_142, %c0_143] : memref<100x288xf32, #tpu.memory_space<vmem>>, vector<1x288xf32>
    tpu.vector_store %arg14[%c17_142, %c0_143], %102 {strides = array<i32>} : memref<100x288xf32, #tpu.memory_space<vmem>>, vector<1x288xf32>,
    %c0_144 = arith.constant 0 : index
    %c39 = arith.constant 39 : index
    %104 = vector.load %arg13[%c0_144, %c39] : memref<4x416xf32, #tpu.memory_space<vmem>>, vector<1x288xf32>
    %c18_145 = arith.constant 18 : index
    %c0_146 = arith.constant 0 : index
    %105 = vector.load %arg14[%c18_145, %c0_146] : memref<100x288xf32, #tpu.memory_space<vmem>>, vector<1x288xf32>
    tpu.vector_store %arg14[%c18_145, %c0_146], %104 {strides = array<i32>} : memref<100x288xf32, #tpu.memory_space<vmem>>, vector<1x288xf32>,
    %c0_147 = arith.constant 0 : index
    %c40 = arith.constant 40 : index
    %106 = vector.load %arg13[%c0_147, %c40] : memref<4x416xf32, #tpu.memory_space<vmem>>, vector<1x288xf32>
    %c19_148 = arith.constant 19 : index
    %c0_149 = arith.constant 0 : index
    %107 = vector.load %arg14[%c19_148, %c0_149] : memref<100x288xf32, #tpu.memory_space<vmem>>, vector<1x288xf32>
    tpu.vector_store %arg14[%c19_148, %c0_149], %106 {strides = array<i32>} : memref<100x288xf32, #tpu.memory_space<vmem>>, vector<1x288xf32>,
    %c0_150 = arith.constant 0 : index
    %c48 = arith.constant 48 : index
    %108 = vector.load %arg13[%c0_150, %c48] : memref<4x416xf32, #tpu.memory_space<vmem>>, vector<1x288xf32>
    %c20_151 = arith.constant 20 : index
    %c0_152 = arith.constant 0 : index
    %109 = vector.load %arg14[%c20_151, %c0_152] : memref<100x288xf32, #tpu.memory_space<vmem>>, vector<1x288xf32>
    tpu.vector_store %arg14[%c20_151, %c0_152], %108 {strides = array<i32>} : memref<100x288xf32, #tpu.memory_space<vmem>>, vector<1x288xf32>,
    %c0_153 = arith.constant 0 : index
    %c49 = arith.constant 49 : index
    %110 = vector.load %arg13[%c0_153, %c49] : memref<4x416xf32, #tpu.memory_space<vmem>>, vector<1x288xf32>
    %c21_154 = arith.constant 21 : index
    %c0_155 = arith.constant 0 : index
    %111 = vector.load %arg14[%c21_154, %c0_155] : memref<100x288xf32, #tpu.memory_space<vmem>>, vector<1x288xf32>
    tpu.vector_store %arg14[%c21_154, %c0_155], %110 {strides = array<i32>} : memref<100x288xf32, #tpu.memory_space<vmem>>, vector<1x288xf32>,
    %c0_156 = arith.constant 0 : index
    %c50 = arith.constant 50 : index
    %112 = vector.load %arg13[%c0_156, %c50] : memref<4x416xf32, #tpu.memory_space<vmem>>, vector<1x288xf32>
    %c22_157 = arith.constant 22 : index
    %c0_158 = arith.constant 0 : index
    %113 = vector.load %arg14[%c22_157, %c0_158] : memref<100x288xf32, #tpu.memory_space<vmem>>, vector<1x288xf32>
    tpu.vector_store %arg14[%c22_157, %c0_158], %112 {strides = array<i32>} : memref<100x288xf32, #tpu.memory_space<vmem>>, vector<1x288xf32>,
    %c0_159 = arith.constant 0 : index
    %c51 = arith.constant 51 : index
    %114 = vector.load %arg13[%c0_159, %c51] : memref<4x416xf32, #tpu.memory_space<vmem>>, vector<1x288xf32>
    %c23_160 = arith.constant 23 : index
    %c0_161 = arith.constant 0 : index
    %115 = vector.load %arg14[%c23_160, %c0_161] : memref<100x288xf32, #tpu.memory_space<vmem>>, vector<1x288xf32>
    tpu.vector_store %arg14[%c23_160, %c0_161], %114 {strides = array<i32>} : memref<100x288xf32, #tpu.memory_space<vmem>>, vector<1x288xf32>,
    %c0_162 = arith.constant 0 : index
    %c52 = arith.constant 52 : index
    %116 = vector.load %arg13[%c0_162, %c52] : memref<4x416xf32, #tpu.memory_space<vmem>>, vector<1x288xf32>
    %c24_163 = arith.constant 24 : index
    %c0_164 = arith.constant 0 : index
    %117 = vector.load %arg14[%c24_163, %c0_164] : memref<100x288xf32, #tpu.memory_space<vmem>>, vector<1x288xf32>
    tpu.vector_store %arg14[%c24_163, %c0_164], %116 {strides = array<i32>} : memref<100x288xf32, #tpu.memory_space<vmem>>, vector<1x288xf32>,
    %c1_165 = arith.constant 1 : index
    %c0_166 = arith.constant 0 : index
    %118 = vector.load %arg13[%c1_165, %c0_166] : memref<4x416xf32, #tpu.memory_space<vmem>>, vector<1x288xf32>
    %c25_167 = arith.constant 25 : index
    %c0_168 = arith.constant 0 : index
    %119 = vector.load %arg14[%c25_167, %c0_168] : memref<100x288xf32, #tpu.memory_space<vmem>>, vector<1x288xf32>
    tpu.vector_store %arg14[%c25_167, %c0_168], %118 {strides = array<i32>} : memref<100x288xf32, #tpu.memory_space<vmem>>, vector<1x288xf32>,
    %c1_169 = arith.constant 1 : index
    %c1_170 = arith.constant 1 : index
    %120 = vector.load %arg13[%c1_169, %c1_170] : memref<4x416xf32, #tpu.memory_space<vmem>>, vector<1x288xf32>
    %c26_171 = arith.constant 26 : index
    %c0_172 = arith.constant 0 : index
    %121 = vector.load %arg14[%c26_171, %c0_172] : memref<100x288xf32, #tpu.memory_space<vmem>>, vector<1x288xf32>
    tpu.vector_store %arg14[%c26_171, %c0_172], %120 {strides = array<i32>} : memref<100x288xf32, #tpu.memory_space<vmem>>, vector<1x288xf32>,
    %c1_173 = arith.constant 1 : index
    %c2_174 = arith.constant 2 : index
    %122 = vector.load %arg13[%c1_173, %c2_174] : memref<4x416xf32, #tpu.memory_space<vmem>>, vector<1x288xf32>
    %c27_175 = arith.constant 27 : index
    %c0_176 = arith.constant 0 : index
    %123 = vector.load %arg14[%c27_175, %c0_176] : memref<100x288xf32, #tpu.memory_space<vmem>>, vector<1x288xf32>
    tpu.vector_store %arg14[%c27_175, %c0_176], %122 {strides = array<i32>} : memref<100x288xf32, #tpu.memory_space<vmem>>, vector<1x288xf32>,
    %c1_177 = arith.constant 1 : index
    %c3_178 = arith.constant 3 : index
    %124 = vector.load %arg13[%c1_177, %c3_178] : memref<4x416xf32, #tpu.memory_space<vmem>>, vector<1x288xf32>
    %c28_179 = arith.constant 28 : index
    %c0_180 = arith.constant 0 : index
    %125 = vector.load %arg14[%c28_179, %c0_180] : memref<100x288xf32, #tpu.memory_space<vmem>>, vector<1x288xf32>
    tpu.vector_store %arg14[%c28_179, %c0_180], %124 {strides = array<i32>} : memref<100x288xf32, #tpu.memory_space<vmem>>, vector<1x288xf32>,
    %c1_181 = arith.constant 1 : index
    %c4_182 = arith.constant 4 : index
    %126 = vector.load %arg13[%c1_181, %c4_182] : memref<4x416xf32, #tpu.memory_space<vmem>>, vector<1x288xf32>
    %c29_183 = arith.constant 29 : index
    %c0_184 = arith.constant 0 : index
    %127 = vector.load %arg14[%c29_183, %c0_184] : memref<100x288xf32, #tpu.memory_space<vmem>>, vector<1x288xf32>
    tpu.vector_store %arg14[%c29_183, %c0_184], %126 {strides = array<i32>} : memref<100x288xf32, #tpu.memory_space<vmem>>, vector<1x288xf32>,
    %c1_185 = arith.constant 1 : index
    %c12_186 = arith.constant 12 : index
    %128 = vector.load %arg13[%c1_185, %c12_186] : memref<4x416xf32, #tpu.memory_space<vmem>>, vector<1x288xf32>
    %c30_187 = arith.constant 30 : index
    %c0_188 = arith.constant 0 : index
    %129 = vector.load %arg14[%c30_187, %c0_188] : memref<100x288xf32, #tpu.memory_space<vmem>>, vector<1x288xf32>
    tpu.vector_store %arg14[%c30_187, %c0_188], %128 {strides = array<i32>} : memref<100x288xf32, #tpu.memory_space<vmem>>, vector<1x288xf32>,
    %c1_189 = arith.constant 1 : index
    %c13_190 = arith.constant 13 : index
    %130 = vector.load %arg13[%c1_189, %c13_190] : memref<4x416xf32, #tpu.memory_space<vmem>>, vector<1x288xf32>
    %c31_191 = arith.constant 31 : index
    %c0_192 = arith.constant 0 : index
    %131 = vector.load %arg14[%c31_191, %c0_192] : memref<100x288xf32, #tpu.memory_space<vmem>>, vector<1x288xf32>
    tpu.vector_store %arg14[%c31_191, %c0_192], %130 {strides = array<i32>} : memref<100x288xf32, #tpu.memory_space<vmem>>, vector<1x288xf32>,
    %c1_193 = arith.constant 1 : index
    %c14_194 = arith.constant 14 : index
    %132 = vector.load %arg13[%c1_193, %c14_194] : memref<4x416xf32, #tpu.memory_space<vmem>>, vector<1x288xf32>
    %c32_195 = arith.constant 32 : index
    %c0_196 = arith.constant 0 : index
    %133 = vector.load %arg14[%c32_195, %c0_196] : memref<100x288xf32, #tpu.memory_space<vmem>>, vector<1x288xf32>
    tpu.vector_store %arg14[%c32_195, %c0_196], %132 {strides = array<i32>} : memref<100x288xf32, #tpu.memory_space<vmem>>, vector<1x288xf32>,
    %c1_197 = arith.constant 1 : index
    %c15_198 = arith.constant 15 : index
    %134 = vector.load %arg13[%c1_197, %c15_198] : memref<4x416xf32, #tpu.memory_space<vmem>>, vector<1x288xf32>
    %c33 = arith.constant 33 : index
    %c0_199 = arith.constant 0 : index
    %135 = vector.load %arg14[%c33, %c0_199] : memref<100x288xf32, #tpu.memory_space<vmem>>, vector<1x288xf32>
    tpu.vector_store %arg14[%c33, %c0_199], %134 {strides = array<i32>} : memref<100x288xf32, #tpu.memory_space<vmem>>, vector<1x288xf32>,
    %c1_200 = arith.constant 1 : index
    %c16_201 = arith.constant 16 : index
    %136 = vector.load %arg13[%c1_200, %c16_201] : memref<4x416xf32, #tpu.memory_space<vmem>>, vector<1x288xf32>
    %c34 = arith.constant 34 : index
    %c0_202 = arith.constant 0 : index
    %137 = vector.load %arg14[%c34, %c0_202] : memref<100x288xf32, #tpu.memory_space<vmem>>, vector<1x288xf32>
    tpu.vector_store %arg14[%c34, %c0_202], %136 {strides = array<i32>} : memref<100x288xf32, #tpu.memory_space<vmem>>, vector<1x288xf32>,
    %c1_203 = arith.constant 1 : index
    %c24_204 = arith.constant 24 : index
    %138 = vector.load %arg13[%c1_203, %c24_204] : memref<4x416xf32, #tpu.memory_space<vmem>>, vector<1x288xf32>
    %c35 = arith.constant 35 : index
    %c0_205 = arith.constant 0 : index
    %139 = vector.load %arg14[%c35, %c0_205] : memref<100x288xf32, #tpu.memory_space<vmem>>, vector<1x288xf32>
    tpu.vector_store %arg14[%c35, %c0_205], %138 {strides = array<i32>} : memref<100x288xf32, #tpu.memory_space<vmem>>, vector<1x288xf32>,
    %c1_206 = arith.constant 1 : index
    %c25_207 = arith.constant 25 : index
    %140 = vector.load %arg13[%c1_206, %c25_207] : memref<4x416xf32, #tpu.memory_space<vmem>>, vector<1x288xf32>
    %c36_208 = arith.constant 36 : index
    %c0_209 = arith.constant 0 : index
    %141 = vector.load %arg14[%c36_208, %c0_209] : memref<100x288xf32, #tpu.memory_space<vmem>>, vector<1x288xf32>
    tpu.vector_store %arg14[%c36_208, %c0_209], %140 {strides = array<i32>} : memref<100x288xf32, #tpu.memory_space<vmem>>, vector<1x288xf32>,
    %c1_210 = arith.constant 1 : index
    %c26_211 = arith.constant 26 : index
    %142 = vector.load %arg13[%c1_210, %c26_211] : memref<4x416xf32, #tpu.memory_space<vmem>>, vector<1x288xf32>
    %c37_212 = arith.constant 37 : index
    %c0_213 = arith.constant 0 : index
    %143 = vector.load %arg14[%c37_212, %c0_213] : memref<100x288xf32, #tpu.memory_space<vmem>>, vector<1x288xf32>
    tpu.vector_store %arg14[%c37_212, %c0_213], %142 {strides = array<i32>} : memref<100x288xf32, #tpu.memory_space<vmem>>, vector<1x288xf32>,
    %c1_214 = arith.constant 1 : index
    %c27_215 = arith.constant 27 : index
    %144 = vector.load %arg13[%c1_214, %c27_215] : memref<4x416xf32, #tpu.memory_space<vmem>>, vector<1x288xf32>
    %c38_216 = arith.constant 38 : index
    %c0_217 = arith.constant 0 : index
    %145 = vector.load %arg14[%c38_216, %c0_217] : memref<100x288xf32, #tpu.memory_space<vmem>>, vector<1x288xf32>
    tpu.vector_store %arg14[%c38_216, %c0_217], %144 {strides = array<i32>} : memref<100x288xf32, #tpu.memory_space<vmem>>, vector<1x288xf32>,
    %c1_218 = arith.constant 1 : index
    %c28_219 = arith.constant 28 : index
    %146 = vector.load %arg13[%c1_218, %c28_219] : memref<4x416xf32, #tpu.memory_space<vmem>>, vector<1x288xf32>
    %c39_220 = arith.constant 39 : index
    %c0_221 = arith.constant 0 : index
    %147 = vector.load %arg14[%c39_220, %c0_221] : memref<100x288xf32, #tpu.memory_space<vmem>>, vector<1x288xf32>
    tpu.vector_store %arg14[%c39_220, %c0_221], %146 {strides = array<i32>} : memref<100x288xf32, #tpu.memory_space<vmem>>, vector<1x288xf32>,
    %c1_222 = arith.constant 1 : index
    %c36_223 = arith.constant 36 : index
    %148 = vector.load %arg13[%c1_222, %c36_223] : memref<4x416xf32, #tpu.memory_space<vmem>>, vector<1x288xf32>
    %c40_224 = arith.constant 40 : index
    %c0_225 = arith.constant 0 : index
    %149 = vector.load %arg14[%c40_224, %c0_225] : memref<100x288xf32, #tpu.memory_space<vmem>>, vector<1x288xf32>
    tpu.vector_store %arg14[%c40_224, %c0_225], %148 {strides = array<i32>} : memref<100x288xf32, #tpu.memory_space<vmem>>, vector<1x288xf32>,
    %c1_226 = arith.constant 1 : index
    %c37_227 = arith.constant 37 : index
    %150 = vector.load %arg13[%c1_226, %c37_227] : memref<4x416xf32, #tpu.memory_space<vmem>>, vector<1x288xf32>
    %c41 = arith.constant 41 : index
    %c0_228 = arith.constant 0 : index
    %151 = vector.load %arg14[%c41, %c0_228] : memref<100x288xf32, #tpu.memory_space<vmem>>, vector<1x288xf32>
    tpu.vector_store %arg14[%c41, %c0_228], %150 {strides = array<i32>} : memref<100x288xf32, #tpu.memory_space<vmem>>, vector<1x288xf32>,
    %c1_229 = arith.constant 1 : index
    %c38_230 = arith.constant 38 : index
    %152 = vector.load %arg13[%c1_229, %c38_230] : memref<4x416xf32, #tpu.memory_space<vmem>>, vector<1x288xf32>
    %c42 = arith.constant 42 : index
    %c0_231 = arith.constant 0 : index
    %153 = vector.load %arg14[%c42, %c0_231] : memref<100x288xf32, #tpu.memory_space<vmem>>, vector<1x288xf32>
    tpu.vector_store %arg14[%c42, %c0_231], %152 {strides = array<i32>} : memref<100x288xf32, #tpu.memory_space<vmem>>, vector<1x288xf32>,
    %c1_232 = arith.constant 1 : index
    %c39_233 = arith.constant 39 : index
    %154 = vector.load %arg13[%c1_232, %c39_233] : memref<4x416xf32, #tpu.memory_space<vmem>>, vector<1x288xf32>
    %c43 = arith.constant 43 : index
    %c0_234 = arith.constant 0 : index
    %155 = vector.load %arg14[%c43, %c0_234] : memref<100x288xf32, #tpu.memory_space<vmem>>, vector<1x288xf32>
    tpu.vector_store %arg14[%c43, %c0_234], %154 {strides = array<i32>} : memref<100x288xf32, #tpu.memory_space<vmem>>, vector<1x288xf32>,
    %c1_235 = arith.constant 1 : index
    %c40_236 = arith.constant 40 : index
    %156 = vector.load %arg13[%c1_235, %c40_236] : memref<4x416xf32, #tpu.memory_space<vmem>>, vector<1x288xf32>
    %c44 = arith.constant 44 : index
    %c0_237 = arith.constant 0 : index
    %157 = vector.load %arg14[%c44, %c0_237] : memref<100x288xf32, #tpu.memory_space<vmem>>, vector<1x288xf32>
    tpu.vector_store %arg14[%c44, %c0_237], %156 {strides = array<i32>} : memref<100x288xf32, #tpu.memory_space<vmem>>, vector<1x288xf32>,
    %c1_238 = arith.constant 1 : index
    %c48_239 = arith.constant 48 : index
    %158 = vector.load %arg13[%c1_238, %c48_239] : memref<4x416xf32, #tpu.memory_space<vmem>>, vector<1x288xf32>
    %c45 = arith.constant 45 : index
    %c0_240 = arith.constant 0 : index
    %159 = vector.load %arg14[%c45, %c0_240] : memref<100x288xf32, #tpu.memory_space<vmem>>, vector<1x288xf32>
    tpu.vector_store %arg14[%c45, %c0_240], %158 {strides = array<i32>} : memref<100x288xf32, #tpu.memory_space<vmem>>, vector<1x288xf32>,
    %c1_241 = arith.constant 1 : index
    %c49_242 = arith.constant 49 : index
    %160 = vector.load %arg13[%c1_241, %c49_242] : memref<4x416xf32, #tpu.memory_space<vmem>>, vector<1x288xf32>
    %c46 = arith.constant 46 : index
    %c0_243 = arith.constant 0 : index
    %161 = vector.load %arg14[%c46, %c0_243] : memref<100x288xf32, #tpu.memory_space<vmem>>, vector<1x288xf32>
    tpu.vector_store %arg14[%c46, %c0_243], %160 {strides = array<i32>} : memref<100x288xf32, #tpu.memory_space<vmem>>, vector<1x288xf32>,
    %c1_244 = arith.constant 1 : index
    %c50_245 = arith.constant 50 : index
    %162 = vector.load %arg13[%c1_244, %c50_245] : memref<4x416xf32, #tpu.memory_space<vmem>>, vector<1x288xf32>
    %c47 = arith.constant 47 : index
    %c0_246 = arith.constant 0 : index
    %163 = vector.load %arg14[%c47, %c0_246] : memref<100x288xf32, #tpu.memory_space<vmem>>, vector<1x288xf32>
    tpu.vector_store %arg14[%c47, %c0_246], %162 {strides = array<i32>} : memref<100x288xf32, #tpu.memory_space<vmem>>, vector<1x288xf32>,
    %c1_247 = arith.constant 1 : index
    %c51_248 = arith.constant 51 : index
    %164 = vector.load %arg13[%c1_247, %c51_248] : memref<4x416xf32, #tpu.memory_space<vmem>>, vector<1x288xf32>
    %c48_249 = arith.constant 48 : index
    %c0_250 = arith.constant 0 : index
    %165 = vector.load %arg14[%c48_249, %c0_250] : memref<100x288xf32, #tpu.memory_space<vmem>>, vector<1x288xf32>
    tpu.vector_store %arg14[%c48_249, %c0_250], %164 {strides = array<i32>} : memref<100x288xf32, #tpu.memory_space<vmem>>, vector<1x288xf32>,
    %c1_251 = arith.constant 1 : index
    %c52_252 = arith.constant 52 : index
    %166 = vector.load %arg13[%c1_251, %c52_252] : memref<4x416xf32, #tpu.memory_space<vmem>>, vector<1x288xf32>
    %c49_253 = arith.constant 49 : index
    %c0_254 = arith.constant 0 : index
    %167 = vector.load %arg14[%c49_253, %c0_254] : memref<100x288xf32, #tpu.memory_space<vmem>>, vector<1x288xf32>
    tpu.vector_store %arg14[%c49_253, %c0_254], %166 {strides = array<i32>} : memref<100x288xf32, #tpu.memory_space<vmem>>, vector<1x288xf32>,
    %c2_255 = arith.constant 2 : index
    %c0_256 = arith.constant 0 : index
    %168 = vector.load %arg13[%c2_255, %c0_256] : memref<4x416xf32, #tpu.memory_space<vmem>>, vector<1x288xf32>
    %c50_257 = arith.constant 50 : index
    %c0_258 = arith.constant 0 : index
    %169 = vector.load %arg14[%c50_257, %c0_258] : memref<100x288xf32, #tpu.memory_space<vmem>>, vector<1x288xf32>
    tpu.vector_store %arg14[%c50_257, %c0_258], %168 {strides = array<i32>} : memref<100x288xf32, #tpu.memory_space<vmem>>, vector<1x288xf32>,
    %c2_259 = arith.constant 2 : index
    %c1_260 = arith.constant 1 : index
    %170 = vector.load %arg13[%c2_259, %c1_260] : memref<4x416xf32, #tpu.memory_space<vmem>>, vector<1x288xf32>
    %c51_261 = arith.constant 51 : index
    %c0_262 = arith.constant 0 : index
    %171 = vector.load %arg14[%c51_261, %c0_262] : memref<100x288xf32, #tpu.memory_space<vmem>>, vector<1x288xf32>
    tpu.vector_store %arg14[%c51_261, %c0_262], %170 {strides = array<i32>} : memref<100x288xf32, #tpu.memory_space<vmem>>, vector<1x288xf32>,
    %c2_263 = arith.constant 2 : index
    %c2_264 = arith.constant 2 : index
    %172 = vector.load %arg13[%c2_263, %c2_264] : memref<4x416xf32, #tpu.memory_space<vmem>>, vector<1x288xf32>
    %c52_265 = arith.constant 52 : index
    %c0_266 = arith.constant 0 : index
    %173 = vector.load %arg14[%c52_265, %c0_266] : memref<100x288xf32, #tpu.memory_space<vmem>>, vector<1x288xf32>
    tpu.vector_store %arg14[%c52_265, %c0_266], %172 {strides = array<i32>} : memref<100x288xf32, #tpu.memory_space<vmem>>, vector<1x288xf32>,
    %c2_267 = arith.constant 2 : index
    %c3_268 = arith.constant 3 : index
    %174 = vector.load %arg13[%c2_267, %c3_268] : memref<4x416xf32, #tpu.memory_space<vmem>>, vector<1x288xf32>
    %c53 = arith.constant 53 : index
    %c0_269 = arith.constant 0 : index
    %175 = vector.load %arg14[%c53, %c0_269] : memref<100x288xf32, #tpu.memory_space<vmem>>, vector<1x288xf32>
    tpu.vector_store %arg14[%c53, %c0_269], %174 {strides = array<i32>} : memref<100x288xf32, #tpu.memory_space<vmem>>, vector<1x288xf32>,
    %c2_270 = arith.constant 2 : index
    %c4_271 = arith.constant 4 : index
    %176 = vector.load %arg13[%c2_270, %c4_271] : memref<4x416xf32, #tpu.memory_space<vmem>>, vector<1x288xf32>
    %c54 = arith.constant 54 : index
    %c0_272 = arith.constant 0 : index
    %177 = vector.load %arg14[%c54, %c0_272] : memref<100x288xf32, #tpu.memory_space<vmem>>, vector<1x288xf32>
    tpu.vector_store %arg14[%c54, %c0_272], %176 {strides = array<i32>} : memref<100x288xf32, #tpu.memory_space<vmem>>, vector<1x288xf32>,
    %c2_273 = arith.constant 2 : index
    %c12_274 = arith.constant 12 : index
    %178 = vector.load %arg13[%c2_273, %c12_274] : memref<4x416xf32, #tpu.memory_space<vmem>>, vector<1x288xf32>
    %c55 = arith.constant 55 : index
    %c0_275 = arith.constant 0 : index
    %179 = vector.load %arg14[%c55, %c0_275] : memref<100x288xf32, #tpu.memory_space<vmem>>, vector<1x288xf32>
    tpu.vector_store %arg14[%c55, %c0_275], %178 {strides = array<i32>} : memref<100x288xf32, #tpu.memory_space<vmem>>, vector<1x288xf32>,
    %c2_276 = arith.constant 2 : index
    %c13_277 = arith.constant 13 : index
    %180 = vector.load %arg13[%c2_276, %c13_277] : memref<4x416xf32, #tpu.memory_space<vmem>>, vector<1x288xf32>
    %c56_278 = arith.constant 56 : index
    %c0_279 = arith.constant 0 : index
    %181 = vector.load %arg14[%c56_278, %c0_279] : memref<100x288xf32, #tpu.memory_space<vmem>>, vector<1x288xf32>
    tpu.vector_store %arg14[%c56_278, %c0_279], %180 {strides = array<i32>} : memref<100x288xf32, #tpu.memory_space<vmem>>, vector<1x288xf32>,
    %c2_280 = arith.constant 2 : index
    %c14_281 = arith.constant 14 : index
    %182 = vector.load %arg13[%c2_280, %c14_281] : memref<4x416xf32, #tpu.memory_space<vmem>>, vector<1x288xf32>
    %c57_282 = arith.constant 57 : index
    %c0_283 = arith.constant 0 : index
    %183 = vector.load %arg14[%c57_282, %c0_283] : memref<100x288xf32, #tpu.memory_space<vmem>>, vector<1x288xf32>
    tpu.vector_store %arg14[%c57_282, %c0_283], %182 {strides = array<i32>} : memref<100x288xf32, #tpu.memory_space<vmem>>, vector<1x288xf32>,
    %c2_284 = arith.constant 2 : index
    %c15_285 = arith.constant 15 : index
    %184 = vector.load %arg13[%c2_284, %c15_285] : memref<4x416xf32, #tpu.memory_space<vmem>>, vector<1x288xf32>
    %c58_286 = arith.constant 58 : index
    %c0_287 = arith.constant 0 : index
    %185 = vector.load %arg14[%c58_286, %c0_287] : memref<100x288xf32, #tpu.memory_space<vmem>>, vector<1x288xf32>
    tpu.vector_store %arg14[%c58_286, %c0_287], %184 {strides = array<i32>} : memref<100x288xf32, #tpu.memory_space<vmem>>, vector<1x288xf32>,
    %c2_288 = arith.constant 2 : index
    %c16_289 = arith.constant 16 : index
    %186 = vector.load %arg13[%c2_288, %c16_289] : memref<4x416xf32, #tpu.memory_space<vmem>>, vector<1x288xf32>
    %c59_290 = arith.constant 59 : index
    %c0_291 = arith.constant 0 : index
    %187 = vector.load %arg14[%c59_290, %c0_291] : memref<100x288xf32, #tpu.memory_space<vmem>>, vector<1x288xf32>
    tpu.vector_store %arg14[%c59_290, %c0_291], %186 {strides = array<i32>} : memref<100x288xf32, #tpu.memory_space<vmem>>, vector<1x288xf32>,
    %c2_292 = arith.constant 2 : index
    %c24_293 = arith.constant 24 : index
    %188 = vector.load %arg13[%c2_292, %c24_293] : memref<4x416xf32, #tpu.memory_space<vmem>>, vector<1x288xf32>
    %c60_294 = arith.constant 60 : index
    %c0_295 = arith.constant 0 : index
    %189 = vector.load %arg14[%c60_294, %c0_295] : memref<100x288xf32, #tpu.memory_space<vmem>>, vector<1x288xf32>
    tpu.vector_store %arg14[%c60_294, %c0_295], %188 {strides = array<i32>} : memref<100x288xf32, #tpu.memory_space<vmem>>, vector<1x288xf32>,
    %c2_296 = arith.constant 2 : index
    %c25_297 = arith.constant 25 : index
    %190 = vector.load %arg13[%c2_296, %c25_297] : memref<4x416xf32, #tpu.memory_space<vmem>>, vector<1x288xf32>
    %c61 = arith.constant 61 : index
    %c0_298 = arith.constant 0 : index
    %191 = vector.load %arg14[%c61, %c0_298] : memref<100x288xf32, #tpu.memory_space<vmem>>, vector<1x288xf32>
    tpu.vector_store %arg14[%c61, %c0_298], %190 {strides = array<i32>} : memref<100x288xf32, #tpu.memory_space<vmem>>, vector<1x288xf32>,
    %c2_299 = arith.constant 2 : index
    %c26_300 = arith.constant 26 : index
    %192 = vector.load %arg13[%c2_299, %c26_300] : memref<4x416xf32, #tpu.memory_space<vmem>>, vector<1x288xf32>
    %c62 = arith.constant 62 : index
    %c0_301 = arith.constant 0 : index
    %193 = vector.load %arg14[%c62, %c0_301] : memref<100x288xf32, #tpu.memory_space<vmem>>, vector<1x288xf32>
    tpu.vector_store %arg14[%c62, %c0_301], %192 {strides = array<i32>} : memref<100x288xf32, #tpu.memory_space<vmem>>, vector<1x288xf32>,
    %c2_302 = arith.constant 2 : index
    %c27_303 = arith.constant 27 : index
    %194 = vector.load %arg13[%c2_302, %c27_303] : memref<4x416xf32, #tpu.memory_space<vmem>>, vector<1x288xf32>
    %c63 = arith.constant 63 : index
    %c0_304 = arith.constant 0 : index
    %195 = vector.load %arg14[%c63, %c0_304] : memref<100x288xf32, #tpu.memory_space<vmem>>, vector<1x288xf32>
    tpu.vector_store %arg14[%c63, %c0_304], %194 {strides = array<i32>} : memref<100x288xf32, #tpu.memory_space<vmem>>, vector<1x288xf32>,
    %c2_305 = arith.constant 2 : index
    %c28_306 = arith.constant 28 : index
    %196 = vector.load %arg13[%c2_305, %c28_306] : memref<4x416xf32, #tpu.memory_space<vmem>>, vector<1x288xf32>
    %c64 = arith.constant 64 : index
    %c0_307 = arith.constant 0 : index
    %197 = vector.load %arg14[%c64, %c0_307] : memref<100x288xf32, #tpu.memory_space<vmem>>, vector<1x288xf32>
    tpu.vector_store %arg14[%c64, %c0_307], %196 {strides = array<i32>} : memref<100x288xf32, #tpu.memory_space<vmem>>, vector<1x288xf32>,
    %c2_308 = arith.constant 2 : index
    %c36_309 = arith.constant 36 : index
    %198 = vector.load %arg13[%c2_308, %c36_309] : memref<4x416xf32, #tpu.memory_space<vmem>>, vector<1x288xf32>
    %c65 = arith.constant 65 : index
    %c0_310 = arith.constant 0 : index
    %199 = vector.load %arg14[%c65, %c0_310] : memref<100x288xf32, #tpu.memory_space<vmem>>, vector<1x288xf32>
    tpu.vector_store %arg14[%c65, %c0_310], %198 {strides = array<i32>} : memref<100x288xf32, #tpu.memory_space<vmem>>, vector<1x288xf32>,
    %c2_311 = arith.constant 2 : index
    %c37_312 = arith.constant 37 : index
    %200 = vector.load %arg13[%c2_311, %c37_312] : memref<4x416xf32, #tpu.memory_space<vmem>>, vector<1x288xf32>
    %c66 = arith.constant 66 : index
    %c0_313 = arith.constant 0 : index
    %201 = vector.load %arg14[%c66, %c0_313] : memref<100x288xf32, #tpu.memory_space<vmem>>, vector<1x288xf32>
    tpu.vector_store %arg14[%c66, %c0_313], %200 {strides = array<i32>} : memref<100x288xf32, #tpu.memory_space<vmem>>, vector<1x288xf32>,
    %c2_314 = arith.constant 2 : index
    %c38_315 = arith.constant 38 : index
    %202 = vector.load %arg13[%c2_314, %c38_315] : memref<4x416xf32, #tpu.memory_space<vmem>>, vector<1x288xf32>
    %c67 = arith.constant 67 : index
    %c0_316 = arith.constant 0 : index
    %203 = vector.load %arg14[%c67, %c0_316] : memref<100x288xf32, #tpu.memory_space<vmem>>, vector<1x288xf32>
    tpu.vector_store %arg14[%c67, %c0_316], %202 {strides = array<i32>} : memref<100x288xf32, #tpu.memory_space<vmem>>, vector<1x288xf32>,
    %c2_317 = arith.constant 2 : index
    %c39_318 = arith.constant 39 : index
    %204 = vector.load %arg13[%c2_317, %c39_318] : memref<4x416xf32, #tpu.memory_space<vmem>>, vector<1x288xf32>
    %c68 = arith.constant 68 : index
    %c0_319 = arith.constant 0 : index
    %205 = vector.load %arg14[%c68, %c0_319] : memref<100x288xf32, #tpu.memory_space<vmem>>, vector<1x288xf32>
    tpu.vector_store %arg14[%c68, %c0_319], %204 {strides = array<i32>} : memref<100x288xf32, #tpu.memory_space<vmem>>, vector<1x288xf32>,
    %c2_320 = arith.constant 2 : index
    %c40_321 = arith.constant 40 : index
    %206 = vector.load %arg13[%c2_320, %c40_321] : memref<4x416xf32, #tpu.memory_space<vmem>>, vector<1x288xf32>
    %c69 = arith.constant 69 : index
    %c0_322 = arith.constant 0 : index
    %207 = vector.load %arg14[%c69, %c0_322] : memref<100x288xf32, #tpu.memory_space<vmem>>, vector<1x288xf32>
    tpu.vector_store %arg14[%c69, %c0_322], %206 {strides = array<i32>} : memref<100x288xf32, #tpu.memory_space<vmem>>, vector<1x288xf32>,
    %c2_323 = arith.constant 2 : index
    %c48_324 = arith.constant 48 : index
    %208 = vector.load %arg13[%c2_323, %c48_324] : memref<4x416xf32, #tpu.memory_space<vmem>>, vector<1x288xf32>
    %c70 = arith.constant 70 : index
    %c0_325 = arith.constant 0 : index
    %209 = vector.load %arg14[%c70, %c0_325] : memref<100x288xf32, #tpu.memory_space<vmem>>, vector<1x288xf32>
    tpu.vector_store %arg14[%c70, %c0_325], %208 {strides = array<i32>} : memref<100x288xf32, #tpu.memory_space<vmem>>, vector<1x288xf32>,
    %c2_326 = arith.constant 2 : index
    %c49_327 = arith.constant 49 : index
    %210 = vector.load %arg13[%c2_326, %c49_327] : memref<4x416xf32, #tpu.memory_space<vmem>>, vector<1x288xf32>
    %c71 = arith.constant 71 : index
    %c0_328 = arith.constant 0 : index
    %211 = vector.load %arg14[%c71, %c0_328] : memref<100x288xf32, #tpu.memory_space<vmem>>, vector<1x288xf32>
    tpu.vector_store %arg14[%c71, %c0_328], %210 {strides = array<i32>} : memref<100x288xf32, #tpu.memory_space<vmem>>, vector<1x288xf32>,
    %c2_329 = arith.constant 2 : index
    %c50_330 = arith.constant 50 : index
    %212 = vector.load %arg13[%c2_329, %c50_330] : memref<4x416xf32, #tpu.memory_space<vmem>>, vector<1x288xf32>
    %c72 = arith.constant 72 : index
    %c0_331 = arith.constant 0 : index
    %213 = vector.load %arg14[%c72, %c0_331] : memref<100x288xf32, #tpu.memory_space<vmem>>, vector<1x288xf32>
    tpu.vector_store %arg14[%c72, %c0_331], %212 {strides = array<i32>} : memref<100x288xf32, #tpu.memory_space<vmem>>, vector<1x288xf32>,
    %c2_332 = arith.constant 2 : index
    %c51_333 = arith.constant 51 : index
    %214 = vector.load %arg13[%c2_332, %c51_333] : memref<4x416xf32, #tpu.memory_space<vmem>>, vector<1x288xf32>
    %c73 = arith.constant 73 : index
    %c0_334 = arith.constant 0 : index
    %215 = vector.load %arg14[%c73, %c0_334] : memref<100x288xf32, #tpu.memory_space<vmem>>, vector<1x288xf32>
    tpu.vector_store %arg14[%c73, %c0_334], %214 {strides = array<i32>} : memref<100x288xf32, #tpu.memory_space<vmem>>, vector<1x288xf32>,
    %c2_335 = arith.constant 2 : index
    %c52_336 = arith.constant 52 : index
    %216 = vector.load %arg13[%c2_335, %c52_336] : memref<4x416xf32, #tpu.memory_space<vmem>>, vector<1x288xf32>
    %c74 = arith.constant 74 : index
    %c0_337 = arith.constant 0 : index
    %217 = vector.load %arg14[%c74, %c0_337] : memref<100x288xf32, #tpu.memory_space<vmem>>, vector<1x288xf32>
    tpu.vector_store %arg14[%c74, %c0_337], %216 {strides = array<i32>} : memref<100x288xf32, #tpu.memory_space<vmem>>, vector<1x288xf32>,
    %c3_338 = arith.constant 3 : index
    %c0_339 = arith.constant 0 : index
    %218 = vector.load %arg13[%c3_338, %c0_339] : memref<4x416xf32, #tpu.memory_space<vmem>>, vector<1x288xf32>
    %c75 = arith.constant 75 : index
    %c0_340 = arith.constant 0 : index
    %219 = vector.load %arg14[%c75, %c0_340] : memref<100x288xf32, #tpu.memory_space<vmem>>, vector<1x288xf32>
    tpu.vector_store %arg14[%c75, %c0_340], %218 {strides = array<i32>} : memref<100x288xf32, #tpu.memory_space<vmem>>, vector<1x288xf32>,
    %c3_341 = arith.constant 3 : index
    %c1_342 = arith.constant 1 : index
    %220 = vector.load %arg13[%c3_341, %c1_342] : memref<4x416xf32, #tpu.memory_space<vmem>>, vector<1x288xf32>
    %c76 = arith.constant 76 : index
    %c0_343 = arith.constant 0 : index
    %221 = vector.load %arg14[%c76, %c0_343] : memref<100x288xf32, #tpu.memory_space<vmem>>, vector<1x288xf32>
    tpu.vector_store %arg14[%c76, %c0_343], %220 {strides = array<i32>} : memref<100x288xf32, #tpu.memory_space<vmem>>, vector<1x288xf32>,
    %c3_344 = arith.constant 3 : index
    %c2_345 = arith.constant 2 : index
    %222 = vector.load %arg13[%c3_344, %c2_345] : memref<4x416xf32, #tpu.memory_space<vmem>>, vector<1x288xf32>
    %c77 = arith.constant 77 : index
    %c0_346 = arith.constant 0 : index
    %223 = vector.load %arg14[%c77, %c0_346] : memref<100x288xf32, #tpu.memory_space<vmem>>, vector<1x288xf32>
    tpu.vector_store %arg14[%c77, %c0_346], %222 {strides = array<i32>} : memref<100x288xf32, #tpu.memory_space<vmem>>, vector<1x288xf32>,
    %c3_347 = arith.constant 3 : index
    %c3_348 = arith.constant 3 : index
    %224 = vector.load %arg13[%c3_347, %c3_348] : memref<4x416xf32, #tpu.memory_space<vmem>>, vector<1x288xf32>
    %c78 = arith.constant 78 : index
    %c0_349 = arith.constant 0 : index
    %225 = vector.load %arg14[%c78, %c0_349] : memref<100x288xf32, #tpu.memory_space<vmem>>, vector<1x288xf32>
    tpu.vector_store %arg14[%c78, %c0_349], %224 {strides = array<i32>} : memref<100x288xf32, #tpu.memory_space<vmem>>, vector<1x288xf32>,
    %c3_350 = arith.constant 3 : index
    %c4_351 = arith.constant 4 : index
    %226 = vector.load %arg13[%c3_350, %c4_351] : memref<4x416xf32, #tpu.memory_space<vmem>>, vector<1x288xf32>
    %c79 = arith.constant 79 : index
    %c0_352 = arith.constant 0 : index
    %227 = vector.load %arg14[%c79, %c0_352] : memref<100x288xf32, #tpu.memory_space<vmem>>, vector<1x288xf32>
    tpu.vector_store %arg14[%c79, %c0_352], %226 {strides = array<i32>} : memref<100x288xf32, #tpu.memory_space<vmem>>, vector<1x288xf32>,
    %c3_353 = arith.constant 3 : index
    %c12_354 = arith.constant 12 : index
    %228 = vector.load %arg13[%c3_353, %c12_354] : memref<4x416xf32, #tpu.memory_space<vmem>>, vector<1x288xf32>
    %c80 = arith.constant 80 : index
    %c0_355 = arith.constant 0 : index
    %229 = vector.load %arg14[%c80, %c0_355] : memref<100x288xf32, #tpu.memory_space<vmem>>, vector<1x288xf32>
    tpu.vector_store %arg14[%c80, %c0_355], %228 {strides = array<i32>} : memref<100x288xf32, #tpu.memory_space<vmem>>, vector<1x288xf32>,
    %c3_356 = arith.constant 3 : index
    %c13_357 = arith.constant 13 : index
    %230 = vector.load %arg13[%c3_356, %c13_357] : memref<4x416xf32, #tpu.memory_space<vmem>>, vector<1x288xf32>
    %c81 = arith.constant 81 : index
    %c0_358 = arith.constant 0 : index
    %231 = vector.load %arg14[%c81, %c0_358] : memref<100x288xf32, #tpu.memory_space<vmem>>, vector<1x288xf32>
    tpu.vector_store %arg14[%c81, %c0_358], %230 {strides = array<i32>} : memref<100x288xf32, #tpu.memory_space<vmem>>, vector<1x288xf32>,
    %c3_359 = arith.constant 3 : index
    %c14_360 = arith.constant 14 : index
    %232 = vector.load %arg13[%c3_359, %c14_360] : memref<4x416xf32, #tpu.memory_space<vmem>>, vector<1x288xf32>
    %c82 = arith.constant 82 : index
    %c0_361 = arith.constant 0 : index
    %233 = vector.load %arg14[%c82, %c0_361] : memref<100x288xf32, #tpu.memory_space<vmem>>, vector<1x288xf32>
    tpu.vector_store %arg14[%c82, %c0_361], %232 {strides = array<i32>} : memref<100x288xf32, #tpu.memory_space<vmem>>, vector<1x288xf32>,
    %c3_362 = arith.constant 3 : index
    %c15_363 = arith.constant 15 : index
    %234 = vector.load %arg13[%c3_362, %c15_363] : memref<4x416xf32, #tpu.memory_space<vmem>>, vector<1x288xf32>
    %c83 = arith.constant 83 : index
    %c0_364 = arith.constant 0 : index
    %235 = vector.load %arg14[%c83, %c0_364] : memref<100x288xf32, #tpu.memory_space<vmem>>, vector<1x288xf32>
    tpu.vector_store %arg14[%c83, %c0_364], %234 {strides = array<i32>} : memref<100x288xf32, #tpu.memory_space<vmem>>, vector<1x288xf32>,
    %c3_365 = arith.constant 3 : index
    %c16_366 = arith.constant 16 : index
    %236 = vector.load %arg13[%c3_365, %c16_366] : memref<4x416xf32, #tpu.memory_space<vmem>>, vector<1x288xf32>
    %c84_367 = arith.constant 84 : index
    %c0_368 = arith.constant 0 : index
    %237 = vector.load %arg14[%c84_367, %c0_368] : memref<100x288xf32, #tpu.memory_space<vmem>>, vector<1x288xf32>
    tpu.vector_store %arg14[%c84_367, %c0_368], %236 {strides = array<i32>} : memref<100x288xf32, #tpu.memory_space<vmem>>, vector<1x288xf32>,
    %c3_369 = arith.constant 3 : index
    %c24_370 = arith.constant 24 : index
    %238 = vector.load %arg13[%c3_369, %c24_370] : memref<4x416xf32, #tpu.memory_space<vmem>>, vector<1x288xf32>
    %c85_371 = arith.constant 85 : index
    %c0_372 = arith.constant 0 : index
    %239 = vector.load %arg14[%c85_371, %c0_372] : memref<100x288xf32, #tpu.memory_space<vmem>>, vector<1x288xf32>
    tpu.vector_store %arg14[%c85_371, %c0_372], %238 {strides = array<i32>} : memref<100x288xf32, #tpu.memory_space<vmem>>, vector<1x288xf32>,
    %c3_373 = arith.constant 3 : index
    %c25_374 = arith.constant 25 : index
    %240 = vector.load %arg13[%c3_373, %c25_374] : memref<4x416xf32, #tpu.memory_space<vmem>>, vector<1x288xf32>
    %c86_375 = arith.constant 86 : index
    %c0_376 = arith.constant 0 : index
    %241 = vector.load %arg14[%c86_375, %c0_376] : memref<100x288xf32, #tpu.memory_space<vmem>>, vector<1x288xf32>
    tpu.vector_store %arg14[%c86_375, %c0_376], %240 {strides = array<i32>} : memref<100x288xf32, #tpu.memory_space<vmem>>, vector<1x288xf32>,
    %c3_377 = arith.constant 3 : index
    %c26_378 = arith.constant 26 : index
    %242 = vector.load %arg13[%c3_377, %c26_378] : memref<4x416xf32, #tpu.memory_space<vmem>>, vector<1x288xf32>
    %c87_379 = arith.constant 87 : index
    %c0_380 = arith.constant 0 : index
    %243 = vector.load %arg14[%c87_379, %c0_380] : memref<100x288xf32, #tpu.memory_space<vmem>>, vector<1x288xf32>
    tpu.vector_store %arg14[%c87_379, %c0_380], %242 {strides = array<i32>} : memref<100x288xf32, #tpu.memory_space<vmem>>, vector<1x288xf32>,
    %c3_381 = arith.constant 3 : index
    %c27_382 = arith.constant 27 : index
    %244 = vector.load %arg13[%c3_381, %c27_382] : memref<4x416xf32, #tpu.memory_space<vmem>>, vector<1x288xf32>
    %c88_383 = arith.constant 88 : index
    %c0_384 = arith.constant 0 : index
    %245 = vector.load %arg14[%c88_383, %c0_384] : memref<100x288xf32, #tpu.memory_space<vmem>>, vector<1x288xf32>
    tpu.vector_store %arg14[%c88_383, %c0_384], %244 {strides = array<i32>} : memref<100x288xf32, #tpu.memory_space<vmem>>, vector<1x288xf32>,
    %c3_385 = arith.constant 3 : index
    %c28_386 = arith.constant 28 : index
    %246 = vector.load %arg13[%c3_385, %c28_386] : memref<4x416xf32, #tpu.memory_space<vmem>>, vector<1x288xf32>
    %c89 = arith.constant 89 : index
    %c0_387 = arith.constant 0 : index
    %247 = vector.load %arg14[%c89, %c0_387] : memref<100x288xf32, #tpu.memory_space<vmem>>, vector<1x288xf32>
    tpu.vector_store %arg14[%c89, %c0_387], %246 {strides = array<i32>} : memref<100x288xf32, #tpu.memory_space<vmem>>, vector<1x288xf32>,
    %c3_388 = arith.constant 3 : index
    %c36_389 = arith.constant 36 : index
    %248 = vector.load %arg13[%c3_388, %c36_389] : memref<4x416xf32, #tpu.memory_space<vmem>>, vector<1x288xf32>
    %c90 = arith.constant 90 : index
    %c0_390 = arith.constant 0 : index
    %249 = vector.load %arg14[%c90, %c0_390] : memref<100x288xf32, #tpu.memory_space<vmem>>, vector<1x288xf32>
    tpu.vector_store %arg14[%c90, %c0_390], %248 {strides = array<i32>} : memref<100x288xf32, #tpu.memory_space<vmem>>, vector<1x288xf32>,
    %c3_391 = arith.constant 3 : index
    %c37_392 = arith.constant 37 : index
    %250 = vector.load %arg13[%c3_391, %c37_392] : memref<4x416xf32, #tpu.memory_space<vmem>>, vector<1x288xf32>
    %c91 = arith.constant 91 : index
    %c0_393 = arith.constant 0 : index
    %251 = vector.load %arg14[%c91, %c0_393] : memref<100x288xf32, #tpu.memory_space<vmem>>, vector<1x288xf32>
    tpu.vector_store %arg14[%c91, %c0_393], %250 {strides = array<i32>} : memref<100x288xf32, #tpu.memory_space<vmem>>, vector<1x288xf32>,
    %c3_394 = arith.constant 3 : index
    %c38_395 = arith.constant 38 : index
    %252 = vector.load %arg13[%c3_394, %c38_395] : memref<4x416xf32, #tpu.memory_space<vmem>>, vector<1x288xf32>
    %c92 = arith.constant 92 : index
    %c0_396 = arith.constant 0 : index
    %253 = vector.load %arg14[%c92, %c0_396] : memref<100x288xf32, #tpu.memory_space<vmem>>, vector<1x288xf32>
    tpu.vector_store %arg14[%c92, %c0_396], %252 {strides = array<i32>} : memref<100x288xf32, #tpu.memory_space<vmem>>, vector<1x288xf32>,
    %c3_397 = arith.constant 3 : index
    %c39_398 = arith.constant 39 : index
    %254 = vector.load %arg13[%c3_397, %c39_398] : memref<4x416xf32, #tpu.memory_space<vmem>>, vector<1x288xf32>
    %c93 = arith.constant 93 : index
    %c0_399 = arith.constant 0 : index
    %255 = vector.load %arg14[%c93, %c0_399] : memref<100x288xf32, #tpu.memory_space<vmem>>, vector<1x288xf32>
    tpu.vector_store %arg14[%c93, %c0_399], %254 {strides = array<i32>} : memref<100x288xf32, #tpu.memory_space<vmem>>, vector<1x288xf32>,
    %c3_400 = arith.constant 3 : index
    %c40_401 = arith.constant 40 : index
    %256 = vector.load %arg13[%c3_400, %c40_401] : memref<4x416xf32, #tpu.memory_space<vmem>>, vector<1x288xf32>
    %c94 = arith.constant 94 : index
    %c0_402 = arith.constant 0 : index
    %257 = vector.load %arg14[%c94, %c0_402] : memref<100x288xf32, #tpu.memory_space<vmem>>, vector<1x288xf32>
    tpu.vector_store %arg14[%c94, %c0_402], %256 {strides = array<i32>} : memref<100x288xf32, #tpu.memory_space<vmem>>, vector<1x288xf32>,
    %c3_403 = arith.constant 3 : index
    %c48_404 = arith.constant 48 : index
    %258 = vector.load %arg13[%c3_403, %c48_404] : memref<4x416xf32, #tpu.memory_space<vmem>>, vector<1x288xf32>
    %c95 = arith.constant 95 : index
    %c0_405 = arith.constant 0 : index
    %259 = vector.load %arg14[%c95, %c0_405] : memref<100x288xf32, #tpu.memory_space<vmem>>, vector<1x288xf32>
    tpu.vector_store %arg14[%c95, %c0_405], %258 {strides = array<i32>} : memref<100x288xf32, #tpu.memory_space<vmem>>, vector<1x288xf32>,
    %c3_406 = arith.constant 3 : index
    %c49_407 = arith.constant 49 : index
    %260 = vector.load %arg13[%c3_406, %c49_407] : memref<4x416xf32, #tpu.memory_space<vmem>>, vector<1x288xf32>
    %c96 = arith.constant 96 : index
    %c0_408 = arith.constant 0 : index
    %261 = vector.load %arg14[%c96, %c0_408] : memref<100x288xf32, #tpu.memory_space<vmem>>, vector<1x288xf32>
    tpu.vector_store %arg14[%c96, %c0_408], %260 {strides = array<i32>} : memref<100x288xf32, #tpu.memory_space<vmem>>, vector<1x288xf32>,
    %c3_409 = arith.constant 3 : index
    %c50_410 = arith.constant 50 : index
    %262 = vector.load %arg13[%c3_409, %c50_410] : memref<4x416xf32, #tpu.memory_space<vmem>>, vector<1x288xf32>
    %c97 = arith.constant 97 : index
    %c0_411 = arith.constant 0 : index
    %263 = vector.load %arg14[%c97, %c0_411] : memref<100x288xf32, #tpu.memory_space<vmem>>, vector<1x288xf32>
    tpu.vector_store %arg14[%c97, %c0_411], %262 {strides = array<i32>} : memref<100x288xf32, #tpu.memory_space<vmem>>, vector<1x288xf32>,
    %c3_412 = arith.constant 3 : index
    %c51_413 = arith.constant 51 : index
    %264 = vector.load %arg13[%c3_412, %c51_413] : memref<4x416xf32, #tpu.memory_space<vmem>>, vector<1x288xf32>
    %c98 = arith.constant 98 : index
    %c0_414 = arith.constant 0 : index
    %265 = vector.load %arg14[%c98, %c0_414] : memref<100x288xf32, #tpu.memory_space<vmem>>, vector<1x288xf32>
    tpu.vector_store %arg14[%c98, %c0_414], %264 {strides = array<i32>} : memref<100x288xf32, #tpu.memory_space<vmem>>, vector<1x288xf32>,
    %c3_415 = arith.constant 3 : index
    %c52_416 = arith.constant 52 : index
    %266 = vector.load %arg13[%c3_415, %c52_416] : memref<4x416xf32, #tpu.memory_space<vmem>>, vector<1x288xf32>
    %c99 = arith.constant 99 : index
    %c0_417 = arith.constant 0 : index
    %267 = vector.load %arg14[%c99, %c0_417] : memref<100x288xf32, #tpu.memory_space<vmem>>, vector<1x288xf32>
    tpu.vector_store %arg14[%c99, %c0_417], %266 {strides = array<i32>} : memref<100x288xf32, #tpu.memory_space<vmem>>, vector<1x288xf32>,
    %c0_418 = arith.constant 0 : index
    %c0_419 = arith.constant 0 : index
    %268 = vector.load %arg5[%c0_418, %c0_419] : memref<12x100xf32, #tpu.memory_space<vmem>>, vector<12x100xf32>
    %c0_420 = arith.constant 0 : index
    %c0_421 = arith.constant 0 : index
    %269 = vector.load %arg14[%c0_420, %c0_421] : memref<100x288xf32, #tpu.memory_space<vmem>>, vector<100x288xf32>
    %cst_422 = arith.constant dense<0.000000e+00> : vector<12x288xf32>
    %270 = tpu.matmul %268, %269, %cst_422 {dimension_numbers = #tpu.dot_dimension_numbers<[1], [0], [0], [1], [0, 0, 1, 1], [], []>} : vector<12x100xf32>, vector<100x288xf32>, vector<12x288xf32> -> vector<12x288xf32>
    %c0_423 = arith.constant 0 : index
    %c0_424 = arith.constant 0 : index
    %271 = vector.load %arg6[%c0_423, %c0_424] : memref<12x1xf32, #tpu.memory_space<vmem>>, vector<12x1xf32>
    %272 = vector.broadcast %271 : vector<12x1xf32> to vector<12x288xf32>
    %273 = arith.addf %270, %272 : vector<12x288xf32>
    %274 = math.tanh %273 : vector<12x288xf32>
    %c0_425 = arith.constant 0 : index
    %c0_426 = arith.constant 0 : index
    %275 = vector.load %arg15[%c0_425, %c0_426] : memref<12x288xf32, #tpu.memory_space<vmem>>, vector<12x288xf32>
    tpu.vector_store %arg15[%c0_425, %c0_426], %274 {strides = array<i32>} : memref<12x288xf32, #tpu.memory_space<vmem>>, vector<12x288xf32>,
    %c0_427 = arith.constant 0 : index
    %c0_428 = arith.constant 0 : index
    %276 = vector.load %arg15[%c0_427, %c0_428] : memref<12x288xf32, #tpu.memory_space<vmem>>, vector<12x144xf32>
    %c0_429 = arith.constant 0 : index
    %c0_430 = arith.constant 0 : index
    %277 = vector.load %arg7[%c0_429, %c0_430] : memref<144x16xf32, #tpu.memory_space<vmem>>, vector<144x16xf32>
    %cst_431 = arith.constant dense<0.000000e+00> : vector<12x16xf32>
    %278 = tpu.matmul %276, %277, %cst_431 {dimension_numbers = #tpu.dot_dimension_numbers<[1], [0], [0], [1], [0, 0, 1, 1], [], []>} : vector<12x144xf32>, vector<144x16xf32>, vector<12x16xf32> -> vector<12x16xf32>
    %c0_432 = arith.constant 0 : index
    %c0_433 = arith.constant 0 : index
    %279 = vector.load %arg16[%c0_432, %c0_433] : memref<12x16xf32, #tpu.memory_space<vmem>>, vector<12x16xf32>
    tpu.vector_store %arg16[%c0_432, %c0_433], %278 {strides = array<i32>} : memref<12x16xf32, #tpu.memory_space<vmem>>, vector<12x16xf32>,
    %c0_434 = arith.constant 0 : index
    %c0_435 = arith.constant 0 : index
    %280 = vector.load %arg16[%c0_434, %c0_435] : memref<12x16xf32, #tpu.memory_space<vmem>>, vector<1x16xf32>
    %c0_436 = arith.constant 0 : index
    %c0_437 = arith.constant 0 : index
    %281 = vector.load %arg17[%c0_436, %c0_437] : memref<2x192xf32, #tpu.memory_space<vmem>>, vector<1x16xf32>
    tpu.vector_store %arg17[%c0_436, %c0_437], %280 {strides = array<i32>} : memref<2x192xf32, #tpu.memory_space<vmem>>, vector<1x16xf32>,
    %c1_438 = arith.constant 1 : index
    %c0_439 = arith.constant 0 : index
    %282 = vector.load %arg16[%c1_438, %c0_439] : memref<12x16xf32, #tpu.memory_space<vmem>>, vector<1x16xf32>
    %c0_440 = arith.constant 0 : index
    %c16_441 = arith.constant 16 : index
    %283 = vector.load %arg17[%c0_440, %c16_441] : memref<2x192xf32, #tpu.memory_space<vmem>>, vector<1x16xf32>
    tpu.vector_store %arg17[%c0_440, %c16_441], %282 {strides = array<i32>} : memref<2x192xf32, #tpu.memory_space<vmem>>, vector<1x16xf32>,
    %c2_442 = arith.constant 2 : index
    %c0_443 = arith.constant 0 : index
    %284 = vector.load %arg16[%c2_442, %c0_443] : memref<12x16xf32, #tpu.memory_space<vmem>>, vector<1x16xf32>
    %c0_444 = arith.constant 0 : index
    %c32_445 = arith.constant 32 : index
    %285 = vector.load %arg17[%c0_444, %c32_445] : memref<2x192xf32, #tpu.memory_space<vmem>>, vector<1x16xf32>
    tpu.vector_store %arg17[%c0_444, %c32_445], %284 {strides = array<i32>} : memref<2x192xf32, #tpu.memory_space<vmem>>, vector<1x16xf32>,
    %c3_446 = arith.constant 3 : index
    %c0_447 = arith.constant 0 : index
    %286 = vector.load %arg16[%c3_446, %c0_447] : memref<12x16xf32, #tpu.memory_space<vmem>>, vector<1x16xf32>
    %c0_448 = arith.constant 0 : index
    %c48_449 = arith.constant 48 : index
    %287 = vector.load %arg17[%c0_448, %c48_449] : memref<2x192xf32, #tpu.memory_space<vmem>>, vector<1x16xf32>
    tpu.vector_store %arg17[%c0_448, %c48_449], %286 {strides = array<i32>} : memref<2x192xf32, #tpu.memory_space<vmem>>, vector<1x16xf32>,
    %c4_450 = arith.constant 4 : index
    %c0_451 = arith.constant 0 : index
    %288 = vector.load %arg16[%c4_450, %c0_451] : memref<12x16xf32, #tpu.memory_space<vmem>>, vector<1x16xf32>
    %c0_452 = arith.constant 0 : index
    %c64_453 = arith.constant 64 : index
    %289 = vector.load %arg17[%c0_452, %c64_453] : memref<2x192xf32, #tpu.memory_space<vmem>>, vector<1x16xf32>
    tpu.vector_store %arg17[%c0_452, %c64_453], %288 {strides = array<i32>} : memref<2x192xf32, #tpu.memory_space<vmem>>, vector<1x16xf32>,
    %c5_454 = arith.constant 5 : index
    %c0_455 = arith.constant 0 : index
    %290 = vector.load %arg16[%c5_454, %c0_455] : memref<12x16xf32, #tpu.memory_space<vmem>>, vector<1x16xf32>
    %c0_456 = arith.constant 0 : index
    %c80_457 = arith.constant 80 : index
    %291 = vector.load %arg17[%c0_456, %c80_457] : memref<2x192xf32, #tpu.memory_space<vmem>>, vector<1x16xf32>
    tpu.vector_store %arg17[%c0_456, %c80_457], %290 {strides = array<i32>} : memref<2x192xf32, #tpu.memory_space<vmem>>, vector<1x16xf32>,
    %c6_458 = arith.constant 6 : index
    %c0_459 = arith.constant 0 : index
    %292 = vector.load %arg16[%c6_458, %c0_459] : memref<12x16xf32, #tpu.memory_space<vmem>>, vector<1x16xf32>
    %c0_460 = arith.constant 0 : index
    %c96_461 = arith.constant 96 : index
    %293 = vector.load %arg17[%c0_460, %c96_461] : memref<2x192xf32, #tpu.memory_space<vmem>>, vector<1x16xf32>
    tpu.vector_store %arg17[%c0_460, %c96_461], %292 {strides = array<i32>} : memref<2x192xf32, #tpu.memory_space<vmem>>, vector<1x16xf32>,
    %c7_462 = arith.constant 7 : index
    %c0_463 = arith.constant 0 : index
    %294 = vector.load %arg16[%c7_462, %c0_463] : memref<12x16xf32, #tpu.memory_space<vmem>>, vector<1x16xf32>
    %c0_464 = arith.constant 0 : index
    %c112_465 = arith.constant 112 : index
    %295 = vector.load %arg17[%c0_464, %c112_465] : memref<2x192xf32, #tpu.memory_space<vmem>>, vector<1x16xf32>
    tpu.vector_store %arg17[%c0_464, %c112_465], %294 {strides = array<i32>} : memref<2x192xf32, #tpu.memory_space<vmem>>, vector<1x16xf32>,
    %c8_466 = arith.constant 8 : index
    %c0_467 = arith.constant 0 : index
    %296 = vector.load %arg16[%c8_466, %c0_467] : memref<12x16xf32, #tpu.memory_space<vmem>>, vector<1x16xf32>
    %c0_468 = arith.constant 0 : index
    %c128 = arith.constant 128 : index
    %297 = vector.load %arg17[%c0_468, %c128] : memref<2x192xf32, #tpu.memory_space<vmem>>, vector<1x16xf32>
    tpu.vector_store %arg17[%c0_468, %c128], %296 {strides = array<i32>} : memref<2x192xf32, #tpu.memory_space<vmem>>, vector<1x16xf32>,
    %c9_469 = arith.constant 9 : index
    %c0_470 = arith.constant 0 : index
    %298 = vector.load %arg16[%c9_469, %c0_470] : memref<12x16xf32, #tpu.memory_space<vmem>>, vector<1x16xf32>
    %c0_471 = arith.constant 0 : index
    %c144_472 = arith.constant 144 : index
    %299 = vector.load %arg17[%c0_471, %c144_472] : memref<2x192xf32, #tpu.memory_space<vmem>>, vector<1x16xf32>
    tpu.vector_store %arg17[%c0_471, %c144_472], %298 {strides = array<i32>} : memref<2x192xf32, #tpu.memory_space<vmem>>, vector<1x16xf32>,
    %c10_473 = arith.constant 10 : index
    %c0_474 = arith.constant 0 : index
    %300 = vector.load %arg16[%c10_473, %c0_474] : memref<12x16xf32, #tpu.memory_space<vmem>>, vector<1x16xf32>
    %c0_475 = arith.constant 0 : index
    %c160 = arith.constant 160 : index
    %301 = vector.load %arg17[%c0_475, %c160] : memref<2x192xf32, #tpu.memory_space<vmem>>, vector<1x16xf32>
    tpu.vector_store %arg17[%c0_475, %c160], %300 {strides = array<i32>} : memref<2x192xf32, #tpu.memory_space<vmem>>, vector<1x16xf32>,
    %c11_476 = arith.constant 11 : index
    %c0_477 = arith.constant 0 : index
    %302 = vector.load %arg16[%c11_476, %c0_477] : memref<12x16xf32, #tpu.memory_space<vmem>>, vector<1x16xf32>
    %c0_478 = arith.constant 0 : index
    %c176 = arith.constant 176 : index
    %303 = vector.load %arg17[%c0_478, %c176] : memref<2x192xf32, #tpu.memory_space<vmem>>, vector<1x16xf32>
    tpu.vector_store %arg17[%c0_478, %c176], %302 {strides = array<i32>} : memref<2x192xf32, #tpu.memory_space<vmem>>, vector<1x16xf32>,
    %c0_479 = arith.constant 0 : index
    %c144_480 = arith.constant 144 : index
    %304 = vector.load %arg15[%c0_479, %c144_480] : memref<12x288xf32, #tpu.memory_space<vmem>>, vector<12x144xf32>
    %c0_481 = arith.constant 0 : index
    %c0_482 = arith.constant 0 : index
    %305 = vector.load %arg7[%c0_481, %c0_482] : memref<144x16xf32, #tpu.memory_space<vmem>>, vector<144x16xf32>
    %cst_483 = arith.constant dense<0.000000e+00> : vector<12x16xf32>
    %306 = tpu.matmul %304, %305, %cst_483 {dimension_numbers = #tpu.dot_dimension_numbers<[1], [0], [0], [1], [0, 0, 1, 1], [], []>} : vector<12x144xf32>, vector<144x16xf32>, vector<12x16xf32> -> vector<12x16xf32>
    %c0_484 = arith.constant 0 : index
    %c0_485 = arith.constant 0 : index
    %307 = vector.load %arg16[%c0_484, %c0_485] : memref<12x16xf32, #tpu.memory_space<vmem>>, vector<12x16xf32>
    tpu.vector_store %arg16[%c0_484, %c0_485], %306 {strides = array<i32>} : memref<12x16xf32, #tpu.memory_space<vmem>>, vector<12x16xf32>,
    %c0_486 = arith.constant 0 : index
    %c0_487 = arith.constant 0 : index
    %308 = vector.load %arg16[%c0_486, %c0_487] : memref<12x16xf32, #tpu.memory_space<vmem>>, vector<1x16xf32>
    %c1_488 = arith.constant 1 : index
    %c0_489 = arith.constant 0 : index
    %309 = vector.load %arg17[%c1_488, %c0_489] : memref<2x192xf32, #tpu.memory_space<vmem>>, vector<1x16xf32>
    tpu.vector_store %arg17[%c1_488, %c0_489], %308 {strides = array<i32>} : memref<2x192xf32, #tpu.memory_space<vmem>>, vector<1x16xf32>,
    %c1_490 = arith.constant 1 : index
    %c0_491 = arith.constant 0 : index
    %310 = vector.load %arg16[%c1_490, %c0_491] : memref<12x16xf32, #tpu.memory_space<vmem>>, vector<1x16xf32>
    %c1_492 = arith.constant 1 : index
    %c16_493 = arith.constant 16 : index
    %311 = vector.load %arg17[%c1_492, %c16_493] : memref<2x192xf32, #tpu.memory_space<vmem>>, vector<1x16xf32>
    tpu.vector_store %arg17[%c1_492, %c16_493], %310 {strides = array<i32>} : memref<2x192xf32, #tpu.memory_space<vmem>>, vector<1x16xf32>,
    %c2_494 = arith.constant 2 : index
    %c0_495 = arith.constant 0 : index
    %312 = vector.load %arg16[%c2_494, %c0_495] : memref<12x16xf32, #tpu.memory_space<vmem>>, vector<1x16xf32>
    %c1_496 = arith.constant 1 : index
    %c32_497 = arith.constant 32 : index
    %313 = vector.load %arg17[%c1_496, %c32_497] : memref<2x192xf32, #tpu.memory_space<vmem>>, vector<1x16xf32>
    tpu.vector_store %arg17[%c1_496, %c32_497], %312 {strides = array<i32>} : memref<2x192xf32, #tpu.memory_space<vmem>>, vector<1x16xf32>,
    %c3_498 = arith.constant 3 : index
    %c0_499 = arith.constant 0 : index
    %314 = vector.load %arg16[%c3_498, %c0_499] : memref<12x16xf32, #tpu.memory_space<vmem>>, vector<1x16xf32>
    %c1_500 = arith.constant 1 : index
    %c48_501 = arith.constant 48 : index
    %315 = vector.load %arg17[%c1_500, %c48_501] : memref<2x192xf32, #tpu.memory_space<vmem>>, vector<1x16xf32>
    tpu.vector_store %arg17[%c1_500, %c48_501], %314 {strides = array<i32>} : memref<2x192xf32, #tpu.memory_space<vmem>>, vector<1x16xf32>,
    %c4_502 = arith.constant 4 : index
    %c0_503 = arith.constant 0 : index
    %316 = vector.load %arg16[%c4_502, %c0_503] : memref<12x16xf32, #tpu.memory_space<vmem>>, vector<1x16xf32>
    %c1_504 = arith.constant 1 : index
    %c64_505 = arith.constant 64 : index
    %317 = vector.load %arg17[%c1_504, %c64_505] : memref<2x192xf32, #tpu.memory_space<vmem>>, vector<1x16xf32>
    tpu.vector_store %arg17[%c1_504, %c64_505], %316 {strides = array<i32>} : memref<2x192xf32, #tpu.memory_space<vmem>>, vector<1x16xf32>,
    %c5_506 = arith.constant 5 : index
    %c0_507 = arith.constant 0 : index
    %318 = vector.load %arg16[%c5_506, %c0_507] : memref<12x16xf32, #tpu.memory_space<vmem>>, vector<1x16xf32>
    %c1_508 = arith.constant 1 : index
    %c80_509 = arith.constant 80 : index
    %319 = vector.load %arg17[%c1_508, %c80_509] : memref<2x192xf32, #tpu.memory_space<vmem>>, vector<1x16xf32>
    tpu.vector_store %arg17[%c1_508, %c80_509], %318 {strides = array<i32>} : memref<2x192xf32, #tpu.memory_space<vmem>>, vector<1x16xf32>,
    %c6_510 = arith.constant 6 : index
    %c0_511 = arith.constant 0 : index
    %320 = vector.load %arg16[%c6_510, %c0_511] : memref<12x16xf32, #tpu.memory_space<vmem>>, vector<1x16xf32>
    %c1_512 = arith.constant 1 : index
    %c96_513 = arith.constant 96 : index
    %321 = vector.load %arg17[%c1_512, %c96_513] : memref<2x192xf32, #tpu.memory_space<vmem>>, vector<1x16xf32>
    tpu.vector_store %arg17[%c1_512, %c96_513], %320 {strides = array<i32>} : memref<2x192xf32, #tpu.memory_space<vmem>>, vector<1x16xf32>,
    %c7_514 = arith.constant 7 : index
    %c0_515 = arith.constant 0 : index
    %322 = vector.load %arg16[%c7_514, %c0_515] : memref<12x16xf32, #tpu.memory_space<vmem>>, vector<1x16xf32>
    %c1_516 = arith.constant 1 : index
    %c112_517 = arith.constant 112 : index
    %323 = vector.load %arg17[%c1_516, %c112_517] : memref<2x192xf32, #tpu.memory_space<vmem>>, vector<1x16xf32>
    tpu.vector_store %arg17[%c1_516, %c112_517], %322 {strides = array<i32>} : memref<2x192xf32, #tpu.memory_space<vmem>>, vector<1x16xf32>,
    %c8_518 = arith.constant 8 : index
    %c0_519 = arith.constant 0 : index
    %324 = vector.load %arg16[%c8_518, %c0_519] : memref<12x16xf32, #tpu.memory_space<vmem>>, vector<1x16xf32>
    %c1_520 = arith.constant 1 : index
    %c128_521 = arith.constant 128 : index
    %325 = vector.load %arg17[%c1_520, %c128_521] : memref<2x192xf32, #tpu.memory_space<vmem>>, vector<1x16xf32>
    tpu.vector_store %arg17[%c1_520, %c128_521], %324 {strides = array<i32>} : memref<2x192xf32, #tpu.memory_space<vmem>>, vector<1x16xf32>,
    %c9_522 = arith.constant 9 : index
    %c0_523 = arith.constant 0 : index
    %326 = vector.load %arg16[%c9_522, %c0_523] : memref<12x16xf32, #tpu.memory_space<vmem>>, vector<1x16xf32>
    %c1_524 = arith.constant 1 : index
    %c144_525 = arith.constant 144 : index
    %327 = vector.load %arg17[%c1_524, %c144_525] : memref<2x192xf32, #tpu.memory_space<vmem>>, vector<1x16xf32>
    tpu.vector_store %arg17[%c1_524, %c144_525], %326 {strides = array<i32>} : memref<2x192xf32, #tpu.memory_space<vmem>>, vector<1x16xf32>,
    %c10_526 = arith.constant 10 : index
    %c0_527 = arith.constant 0 : index
    %328 = vector.load %arg16[%c10_526, %c0_527] : memref<12x16xf32, #tpu.memory_space<vmem>>, vector<1x16xf32>
    %c1_528 = arith.constant 1 : index
    %c160_529 = arith.constant 160 : index
    %329 = vector.load %arg17[%c1_528, %c160_529] : memref<2x192xf32, #tpu.memory_space<vmem>>, vector<1x16xf32>
    tpu.vector_store %arg17[%c1_528, %c160_529], %328 {strides = array<i32>} : memref<2x192xf32, #tpu.memory_space<vmem>>, vector<1x16xf32>,
    %c11_530 = arith.constant 11 : index
    %c0_531 = arith.constant 0 : index
    %330 = vector.load %arg16[%c11_530, %c0_531] : memref<12x16xf32, #tpu.memory_space<vmem>>, vector<1x16xf32>
    %c1_532 = arith.constant 1 : index
    %c176_533 = arith.constant 176 : index
    %331 = vector.load %arg17[%c1_532, %c176_533] : memref<2x192xf32, #tpu.memory_space<vmem>>, vector<1x16xf32>
    tpu.vector_store %arg17[%c1_532, %c176_533], %330 {strides = array<i32>} : memref<2x192xf32, #tpu.memory_space<vmem>>, vector<1x16xf32>,
    %c0_534 = arith.constant 0 : index
    %c0_535 = arith.constant 0 : index
    %332 = vector.load %arg17[%c0_534, %c0_535] : memref<2x192xf32, #tpu.memory_space<vmem>>, vector<2x192xf32>
    %c0_536 = arith.constant 0 : index
    %c0_537 = arith.constant 0 : index
    %333 = vector.load %arg8[%c0_536, %c0_537] : memref<192x10xf32, #tpu.memory_space<vmem>>, vector<192x10xf32>
    %cst_538 = arith.constant dense<0.000000e+00> : vector<2x10xf32>
    %334 = tpu.matmul %332, %333, %cst_538 {dimension_numbers = #tpu.dot_dimension_numbers<[1], [0], [0], [1], [0, 0, 1, 1], [], []>} : vector<2x192xf32>, vector<192x10xf32>, vector<2x10xf32> -> vector<2x10xf32>
    %c0_539 = arith.constant 0 : index
    %c0_540 = arith.constant 0 : index
    %335 = vector.load %arg9[%c0_539, %c0_540] : memref<1x10xf32, #tpu.memory_space<vmem>>, vector<1x10xf32>
    %336 = vector.broadcast %335 : vector<1x10xf32> to vector<2x10xf32>
    %337 = arith.addf %334, %336 : vector<2x10xf32>
    %c0_541 = arith.constant 0 : index
    %c0_542 = arith.constant 0 : index
    %338 = vector.load %arg10[%c0_541, %c0_542] : memref<2x10xf32, #tpu.memory_space<vmem>>, vector<2x10xf32>
    tpu.vector_store %arg10[%c0_541, %c0_542], %337 {strides = array<i32>} : memref<2x10xf32, #tpu.memory_space<vmem>>, vector<2x10xf32>,
    return
  }
  func.func @transform_0(%arg0: i32) -> (i32, i32) {
    %c0_i32 = arith.constant 0 : i32
    %c0_i32_0 = arith.constant 0 : i32
    %c0_i32_1 = arith.constant 0 : i32
    return %c0_i32, %c0_i32_0 : i32, i32
  }
  func.func @transform_1(%arg0: i32) -> (i32, i32) {
    %c0_i32 = arith.constant 0 : i32
    %c0_i32_0 = arith.constant 0 : i32
    %c0_i32_1 = arith.constant 0 : i32
    return %c0_i32, %c0_i32_0 : i32, i32
  }
  func.func @transform_2(%arg0: i32) -> (i32, i32) {
    %c0_i32 = arith.constant 0 : i32
    %c0_i32_0 = arith.constant 0 : i32
    %c0_i32_1 = arith.constant 0 : i32
    return %c0_i32, %c0_i32_0 : i32, i32
  }
  func.func @transform_3(%arg0: i32) -> (i32, i32) {
    %c0_i32 = arith.constant 0 : i32
    %c0_i32_0 = arith.constant 0 : i32
    %c0_i32_1 = arith.constant 0 : i32
    return %c0_i32, %c0_i32_0 : i32, i32
  }
  func.func @transform_4(%arg0: i32) -> (i32, i32) {
    %c0_i32 = arith.constant 0 : i32
    %c0_i32_0 = arith.constant 0 : i32
    %c0_i32_1 = arith.constant 0 : i32
    return %c0_i32, %c0_i32_0 : i32, i32
  }
  func.func @transform_5(%arg0: i32) -> (i32, i32) {
    %c0_i32 = arith.constant 0 : i32
    %c0_i32_0 = arith.constant 0 : i32
    %c0_i32_1 = arith.constant 0 : i32
    return %c0_i32, %c0_i32_0 : i32, i32
  }
  func.func @transform_6(%arg0: i32) -> (i32, i32) {
    %c0_i32 = arith.constant 0 : i32
    %c0_i32_0 = arith.constant 0 : i32
    %c0_i32_1 = arith.constant 0 : i32
    return %c0_i32, %c0_i32_0 : i32, i32
  }
  func.func @transform_7(%arg0: i32) -> (i32, i32) {
    %c0_i32 = arith.constant 0 : i32
    %c0_i32_0 = arith.constant 0 : i32
    %c0_i32_1 = arith.constant 0 : i32
    return %c0_i32, %c0_i32_0 : i32, i32
  }
  func.func @transform_8(%arg0: i32) -> (i32, i32) {
    %c0_i32 = arith.constant 0 : i32
    %c0_i32_0 = arith.constant 0 : i32
    %c0_i32_1 = arith.constant 0 : i32
    return %c0_i32, %c0_i32_0 : i32, i32
  }
  func.func @transform_9(%arg0: i32) -> (i32, i32) {
    %c0_i32 = arith.constant 0 : i32
    %c0_i32_0 = arith.constant 0 : i32
    %c0_i32_1 = arith.constant 0 : i32
    return %c0_i32, %c0_i32_0 : i32, i32
  }
}

</mosaic_0001>

<bundles_post_ra>
// kernel: lenet1_forward.1
= control target key start
LH: loop header
LB: loop body
LE: loop exit
PB: predicated region body
PF: predicated region fallthrough
CT: control target
= control target key end

     0   :  { %s4977_s11 = smov 126   ;;  %s4978_s12 = smov 127   ;;  %v6991_v5 = vlaneseq  ;;  %s6981_s0 = inlined_call_operand.vmem [shape: f32[1,1696], index: 0, kind: input, shape index: {}]   ;;  %s6982_s1 = inlined_call_operand.vmem [shape: f32[4,25], index: 1, kind: input, shape index: {}]   ;;  %s6983_s2 = inlined_call_operand.vmem [shape: f32[4,1], index: 2, kind: input, shape index: {}]   ;;  %s6984_s3 = inlined_call_operand.vmem [shape: f32[784,144], index: 3, kind: input, shape index: {}]   ;;  %s6985_s4 = inlined_call_operand.vmem [shape: f32[12,100], index: 4, kind: input, shape index: {}]   ;;  %s6986_s5 = inlined_call_operand.vmem [shape: f32[12,1], index: 5, kind: input, shape index: {}]   ;;  %s6987_s6 = inlined_call_operand.vmem [shape: f32[144,16], index: 6, kind: input, shape index: {}]   ;;  %s6988_s7 = inlined_call_operand.vmem [shape: f32[192,10], index: 7, kind: input, shape index: {}]   ;;  %s6989_s8 = inlined_call_operand.vmem [shape: f32[1,10], index: 8, kind: input, shape index: {}]   ;;  %s6990_s9 = inlined_call_operand.hbm [shape: f32[2,10], index: 9, kind: output, shape index: {}]  }
   0x1   :  { %v5082_v0 = vld [vmem:[%s6981_s0] sm:$0xff]  ;;  %v68_v1 = vld [vmem:[%s6981_s0 + $0x8] sm:$0x1f]  ;;  %s4979_s19 = smov 125   ;;  %s4980_s22 = smov 124  }
   0x2   :  { %71 = vrot.lane.b32.xlu1 %v5082_v0, %s4977_s11  ;;  %48 = vrot.lane.b32.xlu0 %v5082_v0, %s4978_s12  ;;  %35 = vst [vmem:[#allocation2] ss:$8 sm:$0xf] %v5082_v0  ;;  %36 = vst [vmem:[#allocation2] ss:$8 sm:$0xf0] %v5082_v0 }
   0x3   :  { %v45_v2 = vld [vmem:[%s6981_s0 + $0x8] sm:$0x1f] }
   0x4   :  { %v90_v3 = vld [vmem:[%s6981_s0 + $0x8] sm:$0x1f] }
   0x5   :  { %v112_v4 = vld [vmem:[%s6981_s0 + $0x8] sm:$0x1f] }
   0x6   :  { %73 = vrot.lane.b32.xlu1 %v68_v1, %s4977_s11  ;;  %50 = vrot.lane.b32.xlu0 %v45_v2, %s4978_s12 }
   0xa   :  { %95 = vrot.lane.b32.xlu1 %v90_v3, %s4979_s19  ;;  %93 = vrot.lane.b32.xlu0 %v5082_v0, %s4979_s19 }
   0xe   :  { %117 = vrot.lane.b32.xlu1 %v112_v4, %s4980_s22  ;;  %115 = vrot.lane.b32.xlu0 %v5082_v0, %s4980_s22 }
   0xf   :  { %14 = vsyncpa [#allocation10], 0  ;;  %v134_v6 = vld [vmem:[%s6981_s0 + $0x8] sm:$0x1f]  ;;  %vm5114_vm0 = vcmp.lt.s32.totalorder %v6991_v5, 544  ;;  %s4981_s27 = smov 100  }
  0x10   :  { %v34_v8 = vld [vmem:[%s6981_s0 + $0x8] sm:$0x1f]  ;;  %s4982_s30 = smov 99   ;;  %s4983_s14 = smov 98   ;;  %v5001_v28 = vmov 0.0   ;;  %vm78_vm1 = vcmask 1031168  }
  0x11   :  { %42 = vst.msk [vmem:[#allocation2 + $0x40] ss:$8 sm:$0xf] %vm5114_vm0, %v34_v8  ;;  %43 = vst.msk [vmem:[#allocation2 + $0x40] ss:$8 sm:$0x10] %vm5114_vm0, %v34_v8  ;;  %740 = vmatprep.mubr.f32.mxu1 %v5001_v28  ;;  %882 = vmatprep.mubr.f32.mxu0 %v5001_v28 }
  0x12   :  { %139 = vrot.lane.b32.xlu1 %v134_v6, %s4981_s27  ;;  %137 = vrot.lane.b32.xlu0 %v5082_v0, %s4981_s27  ;;  %v156_v9 = vld [vmem:[%s6981_s0 + $0x8] sm:$0x1f]  ;;  %s4984_s17 = smov 97   ;;  %s7006_s21 = smov 96   ;;  %1217 = vst [vmem:[#allocation4] sm:$0xff] %v5001_v28  ;;  %vm54_vm2 = vcmask 1046528  }
  0x13   :  { %v178_v10 = vld [vmem:[%s6981_s0 + $0x8] sm:$0x1f]  ;;  %s4986_s25 = smov 72   ;;  %s4987_s29 = smov 71   ;;  %vm56_vm3 = vcmask 1039360   ;;  %vm100_vm4 = vcmask 1022976  }
  0x14   :  { %v200_v11 = vld [vmem:[%s6981_s0 + $0x8] sm:$0x1f]  ;;  %s4988_s13 = smov 70   ;;  %s4989_s16 = smov 69   ;;  %v626_v41 = vld [vmem:[%s6983_s2] sm:$0xf] }
  0x15   :  { %v222_v12 = vld [vmem:[%s6981_s0 + $0x8] sm:$0x1f]  ;;  %s4990_s20 = smov 68   ;;  %v5002_v48 = vmov 0   ;;  %vm122_vm5 = vcmask 1014784   ;;  %vm7013_vm6 = vcmask 818176  }
  0x16   :  { %161 = vrot.lane.b32.xlu1 %v156_v9, %s4982_s30  ;;  %159 = vrot.lane.b32.xlu0 %v5082_v0, %s4982_s30  ;;  %v244_v13 = vld [vmem:[%s6981_s0 + $0x8] sm:$0x1f]  ;;  %vm166_vm7 = vcmask 809984   ;;  %vm188_vm8 = vcmask 801792   ;;  %vm210_vm9 = vcmask 793600   ;;  %vm232_vm10 = vcmask 785408  }
  0x17   :  { %v266_v14 = vld [vmem:[%s6981_s0 + $0x8] sm:$0x1f]  ;;  %4896 = vset.pattern.permute.xlu0 %v5002_v48  ;;  %4907 = vset.pattern.permute.xlu1 %v5002_v48  ;;  %vm254_vm11 = vcmask 588800   ;;  %vm276_vm12 = vcmask 580608   ;;  %vm298_vm13 = vcmask 572416   ;;  %vm320_vm14 = vcmask 564224  }
  0x18   :  { %v288_v15 = vld [vmem:[%s6981_s0 + $0x8] sm:$0x1f]  ;;  %vm342_vm15 = vcmask 556032   ;;  %v1400_v5 = vld [vmem:[%s6984_s3 + $0x570] sm:$0xff]  ;;  %s5008_s2 = smov 116   ;;  %s5009_s24 = smov 113  }
  0x19   :  { %v310_v16 = vld [vmem:[%s6981_s0 + $0x8] sm:$0x1f]  ;;  %s5011_s26 = smov 104   ;;  %s5012_s28 = smov 102  }
  0x1a   :  { %183 = vrot.lane.b32.xlu1 %v178_v10, %s4983_s14  ;;  %181 = vrot.lane.b32.xlu0 %v5082_v0, %s4983_s14  ;;  %v332_v17 = vld [vmem:[%s6981_s0 + $0x8] sm:$0x1f]  ;;  %s5014_s30 = smov 101   ;;  %s5015_s10 = smov 91  }
  0x1b   :  { %v354_v18 = vld [vmem:[%s6981_s0 + $0x8] sm:$0x1f]  ;;  %s5017_s14 = smov 89   ;;  %s5018_s15 = smov 90  }
  0x1c   :  { %v376_v19 = vld [vmem:[%s6981_s0 + $0x8] sm:$0x1f]  ;;  %s5020_s18 = smov 88   ;;  %s5023_s23 = smov 76  }
  0x1d   :  { %v398_v20 = vld [vmem:[%s6981_s0 + $0x8] sm:$0x1f] }
  0x1e   :  { %205 = vrot.lane.b32.xlu1 %v200_v11, %s4984_s17  ;;  %203 = vrot.lane.b32.xlu0 %v5082_v0, %s4984_s17  ;;  %v420_v21 = vld [vmem:[%s6981_s0 + $0x8] sm:$0x1f]  ;;  %s5006_s17 = smov 112  }
  0x1f   :  { %v442_v22 = vld [vmem:[%s6981_s0 + $0x8] sm:$0x1f] }
  0x20   :  { %v464_v23 = vld [vmem:[%s6981_s0 + $0x8] sm:$0x3f] }
  0x21   :  { %v486_v24 = vld [vmem:[%s6981_s0 + $0x8] sm:$0x3f] }
  0x22   :  { %227 = vrot.lane.b32.xlu1 %v222_v12, %s7006_s21  ;;  %225 = vrot.lane.b32.xlu0 %v5082_v0, %s7006_s21  ;;  %v508_v25 = vld [vmem:[%s6981_s0 + $0x8] sm:$0x3f]  ;;  %s5024_s21 = smov 77  }
  0x23   :  { %v530_v26 = vld [vmem:[%s6981_s0 + $0x8] sm:$0x3f] }
  0x24   :  { %v552_v27 = vld [vmem:[%s6981_s0 + $0x8] sm:$0x3f]  ;;  %s5022_s0 = smov 79  }
  0x26   :  { %249 = vrot.lane.b32.xlu1 %v244_v13, %s4986_s25  ;;  %247 = vrot.lane.b32.xlu0 %v5082_v0, %s4986_s25  ;;  %s4991_s25 = smov 44  }
  0x2a   :  { %271 = vrot.lane.b32.xlu1 %v266_v14, %s4987_s29  ;;  %269 = vrot.lane.b32.xlu0 %v5082_v0, %s4987_s29  ;;  %s4992_s29 = smov 43  }
  0x2e   :  { %293 = vrot.lane.b32.xlu1 %v288_v15, %s4988_s13  ;;  %291 = vrot.lane.b32.xlu0 %v5082_v0, %s4988_s13  ;;  %s4993_s13 = smov 42  }
  0x32   :  { %315 = vrot.lane.b32.xlu1 %v310_v16, %s4989_s16  ;;  %313 = vrot.lane.b32.xlu0 %v5082_v0, %s4989_s16  ;;  %s4994_s16 = smov 41  }
  0x36   :  { %337 = vrot.lane.b32.xlu1 %v332_v17, %s4990_s20  ;;  %335 = vrot.lane.b32.xlu0 %v5082_v0, %s4990_s20  ;;  %s4995_s20 = smov 40  }
  0x3a   :  { %359 = vrot.lane.b32.xlu1 %v354_v18, %s4991_s25  ;;  %357 = vrot.lane.b32.xlu0 %v5082_v0, %s4991_s25  ;;  %s4996_s25 = smov 16  }
  0x3e   :  { %381 = vrot.lane.b32.xlu1 %v376_v19, %s4992_s29  ;;  %379 = vrot.lane.b32.xlu0 %v5082_v0, %s4992_s29  ;;  %s4997_s29 = smov 15  }
  0x42   :  { %403 = vrot.lane.b32.xlu1 %v398_v20, %s4993_s13  ;;  %401 = vrot.lane.b32.xlu0 %v5082_v0, %s4993_s13  ;;  %s4998_s13 = smov 14  }
  0x46   :  { %425 = vrot.lane.b32.xlu1 %v420_v21, %s4994_s16  ;;  %423 = vrot.lane.b32.xlu0 %v5082_v0, %s4994_s16  ;;  %s4999_s16 = smov 13  }
  0x4a   :  { %447 = vrot.lane.b32.xlu1 %v442_v22, %s4995_s20  ;;  %445 = vrot.lane.b32.xlu0 %v5082_v0, %s4995_s20  ;;  %s5000_s20 = smov 12  }
  0x4e   :  { %469 = vrot.lane.b32.xlu1 %v464_v23, %s4996_s25  ;;  %467 = vrot.lane.b32.xlu0 %v5082_v0, %s4996_s25 }
  0x52   :  { %491 = vrot.lane.b32.xlu1 %v486_v24, %s4997_s29  ;;  %489 = vrot.lane.b32.xlu0 %v5082_v0, %s4997_s29  ;;  %s5013_s29 = smov 103  }
  0x56   :  { %513 = vrot.lane.b32.xlu1 %v508_v25, %s4998_s13  ;;  %511 = vrot.lane.b32.xlu0 %v5082_v0, %s4998_s13  ;;  %s5016_s13 = smov 92  }
  0x5a   :  { %535 = vrot.lane.b32.xlu1 %v530_v26, %s4999_s16  ;;  %533 = vrot.lane.b32.xlu0 %v5082_v0, %s4999_s16  ;;  %s5019_s16 = smov 80  }
  0x5e   :  { %557 = vrot.lane.b32.xlu1 %v552_v27, %s5000_s20  ;;  %555 = vrot.lane.b32.xlu0 %v5082_v0, %s5000_s20  ;;  %s5021_s20 = smov 78  }
  0x62   :  { %629 = vperm.xlu0 %4896, %v626_v41  }
  0x74   :  { %v72_v29 = vpop.permute.xlu1 %71  ;;  %v49_v30 = vpop.permute.xlu0 %48 }
  0x75   :  { %v75_v33 = vrot.slane %v72_v29, 1  ;;  %v52_v34 = vrot.slane %v49_v30, 1 }
  0x78   :  { %v74_v31 = vpop.permute.xlu1 %73  ;;  %v51_v32 = vpop.permute.xlu0 %50 }
  0x79   :  { %v76_v35 = vrot.slane %v74_v31, 1  ;;  %v53_v36 = vrot.slane %v51_v32, 1 }
  0x7b   :  { %v77_v37 = vsel %vm54_vm2, %v75_v33, %v76_v35  ;;  %v80_v38 = vsel %vm78_vm1, %v74_v31, %v76_v35  ;;  %v55_v39 = vsel %vm54_vm2, %v52_v34, %v53_v36  ;;  %v58_v40 = vsel %vm56_vm3, %v51_v32, %v53_v36 }
  0x7c   :  { %v79_v42 = vsel %vm78_vm1, %v72_v29, %v77_v37  ;;  %87 = vst.msk [vmem:[#allocation2 + $0x42] ss:$8 sm:$0xf] %vm5114_vm0, %v80_v38  ;;  %88 = vst.msk [vmem:[#allocation2 + $0x42] ss:$8 sm:$0x10] %vm5114_vm0, %v80_v38  ;;  %v57_v43 = vsel %vm56_vm3, %v49_v30, %v55_v39  ;;  %v96_v44 = vpop.permute.xlu1 %95  ;;  %v94_v45 = vpop.permute.xlu0 %93 }
  0x7d   :  { %65 = vst.msk [vmem:[#allocation2 + $0x41] ss:$8 sm:$0xf] %vm5114_vm0, %v58_v40  ;;  %66 = vst.msk [vmem:[#allocation2 + $0x41] ss:$8 sm:$0x10] %vm5114_vm0, %v58_v40 }
  0x7e   :  { %84 = vst [vmem:[#allocation2 + $0x2] ss:$8 sm:$0xf] %v79_v42  ;;  %85 = vst [vmem:[#allocation2 + $0x2] ss:$8 sm:$0xf0] %v79_v42 }
  0x7f   :  { %62 = vst [vmem:[#allocation2 + $0x1] ss:$8 sm:$0xf] %v57_v43  ;;  %63 = vst [vmem:[#allocation2 + $0x1] ss:$8 sm:$0xf0] %v57_v43 }
  0x80   :  { %v98_v46 = vrot.slane %v96_v44, 1  ;;  %v97_v47 = vrot.slane %v94_v45, 1  ;;  %v118_v52 = vpop.permute.xlu1 %117  ;;  %v116_v53 = vpop.permute.xlu0 %115 }
  0x81   :  { %v120_v54 = vrot.slane %v118_v52, 1  ;;  %v119_v55 = vrot.slane %v116_v53, 1 }
  0x82   :  { %v102_v49 = vsel %vm100_vm4, %v96_v44, %v98_v46  ;;  %v99_v50 = vsel %vm54_vm2, %v97_v47, %v98_v46 }
  0x83   :  { %109 = vst.msk [vmem:[#allocation2 + $0x43] ss:$8 sm:$0xf] %vm5114_vm0, %v102_v49  ;;  %110 = vst.msk [vmem:[#allocation2 + $0x43] ss:$8 sm:$0x10] %vm5114_vm0, %v102_v49  ;;  %v101_v51 = vsel %vm100_vm4, %v94_v45, %v99_v50  ;;  %v124_v56 = vsel %vm122_vm5, %v118_v52, %v120_v54  ;;  %v121_v57 = vsel %vm54_vm2, %v119_v55, %v120_v54 }
  0x84   :  { %106 = vst [vmem:[#allocation2 + $0x3] ss:$8 sm:$0xf] %v101_v51  ;;  %107 = vst [vmem:[#allocation2 + $0x3] ss:$8 sm:$0xf0] %v101_v51  ;;  %v123_v58 = vsel %vm122_vm5, %v116_v53, %v121_v57  ;;  %v140_v59 = vpop.permute.xlu1 %139  ;;  %v138_v60 = vpop.permute.xlu0 %137 }
  0x85   :  { %131 = vst.msk [vmem:[#allocation2 + $0x44] ss:$8 sm:$0xf] %vm5114_vm0, %v124_v56  ;;  %132 = vst.msk [vmem:[#allocation2 + $0x44] ss:$8 sm:$0x10] %vm5114_vm0, %v124_v56 }
  0x86   :  { %128 = vst [vmem:[#allocation2 + $0x4] ss:$8 sm:$0xf] %v123_v58  ;;  %129 = vst [vmem:[#allocation2 + $0x4] ss:$8 sm:$0xf0] %v123_v58 }
  0x87   :  { %v142_v61 = vrot.slane %v140_v59, 1  ;;  %v141_v62 = vrot.slane %v138_v60, 1 }
  0x88   :  { %v162_v2 = vpop.permute.xlu1 %161  ;;  %v160_v3 = vpop.permute.xlu0 %159 }
  0x89   :  { %v146_v63 = vsel %vm7013_vm6, %v140_v59, %v142_v61  ;;  %v143_v0 = vsel %vm54_vm2, %v141_v62, %v142_v61  ;;  %v164_v4 = vrot.slane %v162_v2, 1  ;;  %v163_v6 = vrot.slane %v160_v3, 1 }
  0x8a   :  { %153 = vst.msk [vmem:[#allocation2 + $0x45] ss:$8 sm:$0xf] %vm5114_vm0, %v146_v63  ;;  %154 = vst.msk [vmem:[#allocation2 + $0x45] ss:$8 sm:$0x10] %vm5114_vm0, %v146_v63  ;;  %v145_v1 = vsel %vm7013_vm6, %v138_v60, %v143_v0 }
  0x8b   :  { %150 = vst [vmem:[#allocation2 + $0x5] ss:$8 sm:$0xf] %v145_v1  ;;  %151 = vst [vmem:[#allocation2 + $0x5] ss:$8 sm:$0xf0] %v145_v1  ;;  %v168_v8 = vsel %vm166_vm7, %v162_v2, %v164_v4  ;;  %v165_v9 = vsel %vm54_vm2, %v163_v6, %v164_v4 }
  0x8c   :  { %175 = vst.msk [vmem:[#allocation2 + $0x46] ss:$8 sm:$0xf] %vm5114_vm0, %v168_v8  ;;  %176 = vst.msk [vmem:[#allocation2 + $0x46] ss:$8 sm:$0x10] %vm5114_vm0, %v168_v8  ;;  %v167_v10 = vsel %vm166_vm7, %v160_v3, %v165_v9  ;;  %v184_v11 = vpop.permute.xlu1 %183  ;;  %v182_v12 = vpop.permute.xlu0 %181 }
  0x8d   :  { %172 = vst [vmem:[#allocation2 + $0x6] ss:$8 sm:$0xf] %v167_v10  ;;  %173 = vst [vmem:[#allocation2 + $0x6] ss:$8 sm:$0xf0] %v167_v10 }
  0x8e   :  { %v186_v13 = vrot.slane %v184_v11, 1  ;;  %v185_v14 = vrot.slane %v182_v12, 1  ;;  %vm364_vm7 = vcmask 359424  }
  0x90   :  { %v190_v15 = vsel %vm188_vm8, %v184_v11, %v186_v13  ;;  %v187_v16 = vsel %vm54_vm2, %v185_v14, %v186_v13  ;;  %v206_v18 = vpop.permute.xlu1 %205  ;;  %v204_v19 = vpop.permute.xlu0 %203 }
  0x91   :  { %197 = vst.msk [vmem:[#allocation2 + $0x47] ss:$8 sm:$0xf] %vm5114_vm0, %v190_v15  ;;  %198 = vst.msk [vmem:[#allocation2 + $0x47] ss:$8 sm:$0x10] %vm5114_vm0, %v190_v15  ;;  %v189_v17 = vsel %vm188_vm8, %v182_v12, %v187_v16 }
  0x92   :  { %194 = vst [vmem:[#allocation2 + $0x7] ss:$8 sm:$0xf] %v189_v17  ;;  %195 = vst [vmem:[#allocation2 + $0x7] ss:$8 sm:$0xf0] %v189_v17 }
  0x93   :  { %v208_v20 = vrot.slane %v206_v18, 1  ;;  %v207_v21 = vrot.slane %v204_v19, 1  ;;  %vm386_vm8 = vcmask 351232  }
  0x94   :  { %v228_v25 = vpop.permute.xlu1 %227  ;;  %v226_v26 = vpop.permute.xlu0 %225 }
  0x95   :  { %v212_v22 = vsel %vm210_vm9, %v206_v18, %v208_v20  ;;  %v209_v23 = vsel %vm54_vm2, %v207_v21, %v208_v20  ;;  %v230_v27 = vrot.slane %v228_v25, 1  ;;  %v229_v29 = vrot.slane %v226_v26, 1 }
  0x96   :  { %219 = vst.msk [vmem:[#allocation2 + $0xa8] ss:$8 sm:$0xf] %vm5114_vm0, %v212_v22  ;;  %220 = vst.msk [vmem:[#allocation2 + $0xa8] ss:$8 sm:$0x10] %vm5114_vm0, %v212_v22  ;;  %v211_v24 = vsel %vm210_vm9, %v204_v19, %v209_v23 }
  0x97   :  { %216 = vst [vmem:[#allocation2 + $0x68] ss:$8 sm:$0xf] %v211_v24  ;;  %217 = vst [vmem:[#allocation2 + $0x68] ss:$8 sm:$0xf0] %v211_v24  ;;  %v234_v30 = vsel %vm232_vm10, %v228_v25, %v230_v27  ;;  %v231_v31 = vsel %vm54_vm2, %v229_v29, %v230_v27 }
  0x98   :  { %241 = vst.msk [vmem:[#allocation2 + $0xa9] ss:$8 sm:$0xf] %vm5114_vm0, %v234_v30  ;;  %242 = vst.msk [vmem:[#allocation2 + $0xa9] ss:$8 sm:$0x10] %vm5114_vm0, %v234_v30  ;;  %v233_v32 = vsel %vm232_vm10, %v226_v26, %v231_v31  ;;  %v250_v33 = vpop.permute.xlu1 %249  ;;  %v248_v34 = vpop.permute.xlu0 %247 }
  0x99   :  { %238 = vst [vmem:[#allocation2 + $0x69] ss:$8 sm:$0xf] %v233_v32  ;;  %239 = vst [vmem:[#allocation2 + $0x69] ss:$8 sm:$0xf0] %v233_v32 }
  0x9a   :  { %v252_v35 = vrot.slane %v250_v33, 1  ;;  %v251_v36 = vrot.slane %v248_v34, 1  ;;  %vm408_vm9 = vcmask 343040   ;;  %v575_v26 = vld [vmem:[#allocation2 + $0x8] sm:$0xff]  ;;  %vm430_vm10 = vcmask 334848  }
  0x9b   :  { %v579_v27 = vld [vmem:[#allocation2 + $0x28] sm:$0xff] }
  0x9c   :  { %v256_v37 = vsel %vm254_vm11, %v250_v33, %v252_v35  ;;  %v253_v38 = vsel %vm54_vm2, %v251_v36, %v252_v35  ;;  %v272_v40 = vpop.permute.xlu1 %271  ;;  %v270_v41 = vpop.permute.xlu0 %269 }
  0x9d   :  { %263 = vst.msk [vmem:[#allocation2 + $0xaa] ss:$8 sm:$0xf] %vm5114_vm0, %v256_v37  ;;  %264 = vst.msk [vmem:[#allocation2 + $0xaa] ss:$8 sm:$0x10] %vm5114_vm0, %v256_v37  ;;  %v255_v39 = vsel %vm254_vm11, %v248_v34, %v253_v38 }
  0x9e   :  { %260 = vst [vmem:[#allocation2 + $0x6a] ss:$8 sm:$0xf] %v255_v39  ;;  %261 = vst [vmem:[#allocation2 + $0x6a] ss:$8 sm:$0xf0] %v255_v39 }
  0x9f   :  { %v274_v42 = vrot.slane %v272_v40, 1  ;;  %v273_v43 = vrot.slane %v270_v41, 1  ;;  %v574_v39 = vld [vmem:[#allocation2] sm:$0xff]  ;;  %vm452_vm11 = vcmask 326656  }
  0xa0   :  { %v294_v47 = vpop.permute.xlu1 %293  ;;  %v292_v48 = vpop.permute.xlu0 %291 }
  0xa1   :  { %v278_v44 = vsel %vm276_vm12, %v272_v40, %v274_v42  ;;  %v275_v45 = vsel %vm54_vm2, %v273_v43, %v274_v42  ;;  %v296_v49 = vrot.slane %v294_v47, 1  ;;  %v295_v50 = vrot.slane %v292_v48, 1  ;;  %v578_v40 = vld [vmem:[#allocation2 + $0x20] sm:$0xff] }
  0xa2   :  { %285 = vst.msk [vmem:[#allocation2 + $0xab] ss:$8 sm:$0xf] %vm5114_vm0, %v278_v44  ;;  %286 = vst.msk [vmem:[#allocation2 + $0xab] ss:$8 sm:$0x10] %vm5114_vm0, %v278_v44  ;;  %v277_v46 = vsel %vm276_vm12, %v270_v41, %v275_v45 }
  0xa3   :  { %282 = vst [vmem:[#allocation2 + $0x6b] ss:$8 sm:$0xf] %v277_v46  ;;  %283 = vst [vmem:[#allocation2 + $0x6b] ss:$8 sm:$0xf0] %v277_v46  ;;  %v300_v51 = vsel %vm298_vm13, %v294_v47, %v296_v49  ;;  %v297_v52 = vsel %vm54_vm2, %v295_v50, %v296_v49 }
  0xa4   :  { %307 = vst.msk [vmem:[#allocation2 + $0xac] ss:$8 sm:$0xf] %vm5114_vm0, %v300_v51  ;;  %308 = vst.msk [vmem:[#allocation2 + $0xac] ss:$8 sm:$0x10] %vm5114_vm0, %v300_v51  ;;  %v299_v53 = vsel %vm298_vm13, %v292_v48, %v297_v52  ;;  %v316_v54 = vpop.permute.xlu1 %315  ;;  %v314_v55 = vpop.permute.xlu0 %313 }
  0xa5   :  { %304 = vst [vmem:[#allocation2 + $0x6c] ss:$8 sm:$0xf] %v299_v53  ;;  %305 = vst [vmem:[#allocation2 + $0x6c] ss:$8 sm:$0xf0] %v299_v53 }
  0xa6   :  { %v318_v56 = vrot.slane %v316_v54, 1  ;;  %v317_v57 = vrot.slane %v314_v55, 1  ;;  %vm7009_vm12 = vcmask 130048   ;;  %vm496_vm13 = vcmask 121856  }
  0xa8   :  { %v322_v58 = vsel %vm320_vm14, %v316_v54, %v318_v56  ;;  %v319_v59 = vsel %vm54_vm2, %v317_v57, %v318_v56  ;;  %v338_v61 = vpop.permute.xlu1 %337  ;;  %v336_v62 = vpop.permute.xlu0 %335 }
  0xa9   :  { %329 = vst.msk [vmem:[#allocation2 + $0xad] ss:$8 sm:$0xf] %vm5114_vm0, %v322_v58  ;;  %330 = vst.msk [vmem:[#allocation2 + $0xad] ss:$8 sm:$0x10] %vm5114_vm0, %v322_v58  ;;  %v321_v60 = vsel %vm320_vm14, %v314_v55, %v319_v59 }
  0xaa   :  { %326 = vst [vmem:[#allocation2 + $0x6d] ss:$8 sm:$0xf] %v321_v60  ;;  %327 = vst [vmem:[#allocation2 + $0x6d] ss:$8 sm:$0xf0] %v321_v60 }
  0xab   :  { %v340_v63 = vrot.slane %v338_v61, 1  ;;  %v339_v0 = vrot.slane %v336_v62, 1  ;;  %vm518_vm14 = vcmask 113664  }
  0xac   :  { %v360_v4 = vpop.permute.xlu1 %359  ;;  %v358_v6 = vpop.permute.xlu0 %357 }
  0xad   :  { %v344_v1 = vsel %vm342_vm15, %v338_v61, %v340_v63  ;;  %v341_v2 = vsel %vm54_vm2, %v339_v0, %v340_v63  ;;  %v362_v8 = vrot.slane %v360_v4, 1  ;;  %v361_v9 = vrot.slane %v358_v6, 1 }
  0xae   :  { %351 = vst.msk [vmem:[#allocation2 + $0xae] ss:$8 sm:$0xf] %vm5114_vm0, %v344_v1  ;;  %352 = vst.msk [vmem:[#allocation2 + $0xae] ss:$8 sm:$0x10] %vm5114_vm0, %v344_v1  ;;  %v343_v3 = vsel %vm342_vm15, %v336_v62, %v341_v2 }
  0xaf   :  { %348 = vst [vmem:[#allocation2 + $0x6e] ss:$8 sm:$0xf] %v343_v3  ;;  %349 = vst [vmem:[#allocation2 + $0x6e] ss:$8 sm:$0xf0] %v343_v3  ;;  %v366_v10 = vsel %vm364_vm7, %v360_v4, %v362_v8  ;;  %v363_v11 = vsel %vm54_vm2, %v361_v9, %v362_v8 }
  0xb0   :  { %373 = vst.msk [vmem:[#allocation2 + $0xaf] ss:$8 sm:$0xf] %vm5114_vm0, %v366_v10  ;;  %374 = vst.msk [vmem:[#allocation2 + $0xaf] ss:$8 sm:$0x10] %vm5114_vm0, %v366_v10  ;;  %v365_v12 = vsel %vm364_vm7, %v358_v6, %v363_v11  ;;  %v382_v13 = vpop.permute.xlu1 %381  ;;  %v380_v14 = vpop.permute.xlu0 %379 }
  0xb1   :  { %370 = vst [vmem:[#allocation2 + $0x6f] ss:$8 sm:$0xf] %v365_v12  ;;  %371 = vst [vmem:[#allocation2 + $0x6f] ss:$8 sm:$0xf0] %v365_v12 }
  0xb2   :  { %v384_v15 = vrot.slane %v382_v13, 1  ;;  %v383_v16 = vrot.slane %v380_v14, 1  ;;  %vm540_vm15 = vcmask 105472   ;;  %vm562_vm7 = vcmask 97280  }
  0xb4   :  { %v388_v17 = vsel %vm386_vm8, %v382_v13, %v384_v15  ;;  %v385_v18 = vsel %vm54_vm2, %v383_v16, %v384_v15  ;;  %v404_v20 = vpop.permute.xlu1 %403  ;;  %v402_v21 = vpop.permute.xlu0 %401 }
  0xb5   :  { %395 = vst.msk [vmem:[#allocation2 + $0x110] ss:$8 sm:$0xf] %vm5114_vm0, %v388_v17  ;;  %396 = vst.msk [vmem:[#allocation2 + $0x110] ss:$8 sm:$0x10] %vm5114_vm0, %v388_v17  ;;  %v387_v19 = vsel %vm386_vm8, %v380_v14, %v385_v18 }
  0xb6   :  { %392 = vst [vmem:[#allocation2 + $0xd0] ss:$8 sm:$0xf] %v387_v19  ;;  %393 = vst [vmem:[#allocation2 + $0xd0] ss:$8 sm:$0xf0] %v387_v19 }
  0xb7   :  { %v406_v22 = vrot.slane %v404_v20, 1  ;;  %v405_v23 = vrot.slane %v402_v21, 1  ;;  %vm636_vm8 = vcmask 1040384  }
  0xb8   :  { %v426_v30 = vpop.permute.xlu1 %425  ;;  %v424_v31 = vpop.permute.xlu0 %423  ;;  %v588_v32 = vld [vmem:[#allocation2 + $0x70] sm:$0xff]  ;;  %v587_v34 = vld [vmem:[#allocation2 + $0x68] sm:$0xff] }
  0xb9   :  { %v410_v24 = vsel %vm408_vm9, %v404_v20, %v406_v22  ;;  %v407_v25 = vsel %vm54_vm2, %v405_v23, %v406_v22  ;;  %v592_v33 = vld [vmem:[#allocation2 + $0x90] sm:$0xff]  ;;  %v428_v35 = vrot.slane %v426_v30, 1  ;;  %v427_v36 = vrot.slane %v424_v31, 1  ;;  %v591_v41 = vld [vmem:[#allocation2 + $0x88] sm:$0xff] }
  0xba   :  { %417 = vst.msk [vmem:[#allocation2 + $0x111] ss:$8 sm:$0xf] %vm5114_vm0, %v410_v24  ;;  %418 = vst.msk [vmem:[#allocation2 + $0x111] ss:$8 sm:$0x10] %vm5114_vm0, %v410_v24  ;;  %v409_v29 = vsel %vm408_vm9, %v402_v21, %v407_v25  ;;  %v4235_v37 = vpack.c.bf16 %v588_v32, %v575_v26  ;;  %v4255_v38 = vpack.c.bf16 %v592_v33, %v579_v27 }
  0xbb   :  { %414 = vst [vmem:[#allocation2 + $0xd1] ss:$8 sm:$0xf] %v409_v29  ;;  %415 = vst [vmem:[#allocation2 + $0xd1] ss:$8 sm:$0xf0] %v409_v29  ;;  %v4237_v42 = vpack.c.bf16 %v587_v34, %v574_v39  ;;  %v4257_v43 = vpack.c.bf16 %v591_v41, %v578_v40  ;;  %v432_v44 = vsel %vm430_vm10, %v426_v30, %v428_v35 }
  0xbc   :  { %v429_v45 = vsel %vm54_vm2, %v427_v36, %v428_v35  ;;  %4236 = vmatprep.subr.bf16.mxu1 %v4235_v37  ;;  %4256 = vmatprep.subr.bf16.mxu0 %v4255_v38  ;;  %439 = vst.msk [vmem:[#allocation2 + $0x112] ss:$8 sm:$0xf] %vm5114_vm0, %v432_v44  ;;  %440 = vst.msk [vmem:[#allocation2 + $0x112] ss:$8 sm:$0x10] %vm5114_vm0, %v432_v44  ;;  %v448_v47 = vpop.permute.xlu1 %447  ;;  %v446_v48 = vpop.permute.xlu0 %445 }
  0xbd   :  { %v431_v46 = vsel %vm430_vm10, %v424_v31, %v429_v45  ;;  %4238 = vmatpush1.bf16.msra.mxu1 %v4237_v42  ;;  %4258 = vmatpush1.bf16.msra.mxu0 %v4257_v43  ;;  %v450_v49 = vrot.slane %v448_v47, 1  ;;  %v449_v50 = vrot.slane %v446_v48, 1  ;;  %vm5003_vm9 = vmmov 1   ;;  %v590_v29 = vld [vmem:[#allocation2 + $0x80] sm:$0xff]  ;;  %v596_v30 = vld [vmem:[#allocation2 + $0xb0] sm:$0xff]  ;;  %v577_v42 = vld [vmem:[#allocation2 + $0x18] sm:$0xff] }
  0xbe   :  { %436 = vst [vmem:[#allocation2 + $0xd2] ss:$8 sm:$0xf] %v431_v46  ;;  %437 = vst [vmem:[#allocation2 + $0xd2] ss:$8 sm:$0xf0] %v431_v46  ;;  %v4245_v44 = vpack.c.bf16 %v590_v29, %v577_v42 }
  0xbf   :  { %v454_v51 = vsel %vm452_vm11, %v448_v47, %v450_v49  ;;  %v451_v52 = vsel %vm54_vm2, %v449_v50, %v450_v49  ;;  %vm5348_vm10 = vmpackc.low %vm636_vm8, %vm5003_vm9  ;;  %v583_v43 = vld [vmem:[#allocation2 + $0x48] sm:$0xff]  ;;  %v5359_v46 = vld [vmem:[%s6982_s1] sm:$0xf]  ;;  %vm1219_vm8 = vcmask 261124   ;;  %s5010_s1 = smov 114  }
  0xc0   :  { %461 = vst.msk [vmem:[#allocation2 + $0x113] ss:$8 sm:$0xf] %vm5114_vm0, %v454_v51  ;;  %462 = vst.msk [vmem:[#allocation2 + $0x113] ss:$8 sm:$0x10] %vm5114_vm0, %v454_v51  ;;  %v453_v53 = vsel %vm452_vm11, %v446_v48, %v451_v52  ;;  %v470_v54 = vpop.permute.xlu1 %469  ;;  %v468_v55 = vpop.permute.xlu0 %467  ;;  %v4275_v45 = vpack.c.bf16 %v596_v30, %v583_v43 }
  0xc1   :  { %458 = vst [vmem:[#allocation2 + $0xd3] ss:$8 sm:$0xf] %v453_v53  ;;  %459 = vst [vmem:[#allocation2 + $0xd3] ss:$8 sm:$0xf0] %v453_v53 }
  0xc2   :  { %v472_v56 = vrot.slane %v470_v54, 1  ;;  %v471_v57 = vrot.slane %v468_v55, 1  ;;  %v589_v47 = vld [vmem:[#allocation2 + $0x78] sm:$0xff]  ;;  %v595_v48 = vld [vmem:[#allocation2 + $0xa8] sm:$0xff]  ;;  %v576_v51 = vld [vmem:[#allocation2 + $0x10] sm:$0xff]  ;;  %vm7008_vm11 = vcmask 257024  }
  0xc3   :  { %v582_v52 = vld [vmem:[#allocation2 + $0x40] sm:$0xff]  ;;  %v4247_v53 = vpack.c.bf16 %v589_v47, %v576_v51  ;;  %v597_v29 = vld [vmem:[#allocation2 + $0xb8] sm:$0xff]  ;;  %v1232_v43 = vld [vmem:[%s6984_s3 + $0x30] sm:$0xff] }
  0xc4   :  { %v476_v58 = vsel %vm7009_vm12, %v470_v54, %v472_v56  ;;  %v473_v59 = vsel %vm54_vm2, %v471_v57, %v472_v56  ;;  %v492_v61 = vpop.permute.xlu1 %491  ;;  %v490_v62 = vpop.permute.xlu0 %489  ;;  %v4277_v54 = vpack.c.bf16 %v595_v48, %v582_v52  ;;  %v1230_v42 = vld [vmem:[%s6984_s3 + $0x20] sm:$0xff]  ;;  %v1236_v51 = vld [vmem:[%s6984_s3 + $0x50] sm:$0xff]  ;;  %v1239_v52 = vld [vmem:[%s6984_s3 + $0x68] sm:$0xff] }
  0xc5   :  { %483 = vst.msk [vmem:[#allocation2 + $0x114] ss:$8 sm:$0xf] %vm5114_vm0, %v476_v58  ;;  %484 = vst.msk [vmem:[#allocation2 + $0x114] ss:$8 sm:$0x10] %vm5114_vm0, %v476_v58  ;;  %v475_v60 = vsel %vm7009_vm12, %v468_v55, %v473_v59  ;;  %v4308_v48 = vpack.c.bf16 %v1232_v43, %v1230_v42 }
  0xc6   :  { %480 = vst [vmem:[#allocation2 + $0xd4] ss:$8 sm:$0xf] %v475_v60  ;;  %481 = vst [vmem:[#allocation2 + $0xd4] ss:$8 sm:$0xf0] %v475_v60 }
  0xc7   :  { %v494_v63 = vrot.slane %v492_v61, 1  ;;  %v493_v0 = vrot.slane %v490_v62, 1  ;;  %v1270_v42 = vld [vmem:[%s6984_s3 + $0x160] sm:$0xff]  ;;  %v1272_v43 = vld [vmem:[%s6984_s3 + $0x170] sm:$0xff] }
  0xc8   :  { %v514_v4 = vpop.permute.xlu1 %513  ;;  %v512_v6 = vpop.permute.xlu0 %511 }
  0xc9   :  { %v498_v1 = vsel %vm496_vm13, %v492_v61, %v494_v63  ;;  %v495_v2 = vsel %vm54_vm2, %v493_v0, %v494_v63  ;;  %v516_v8 = vrot.slane %v514_v4, 1  ;;  %v515_v9 = vrot.slane %v512_v6, 1  ;;  %v594_v61 = vld [vmem:[#allocation2 + $0xa0] sm:$0xff] }
  0xca   :  { %505 = vst.msk [vmem:[#allocation2 + $0x115] ss:$8 sm:$0xf] %vm5114_vm0, %v498_v1  ;;  %506 = vst.msk [vmem:[#allocation2 + $0x115] ss:$8 sm:$0x10] %vm5114_vm0, %v498_v1  ;;  %v497_v3 = vsel %vm496_vm13, %v490_v62, %v495_v2 }
  0xcb   :  { %502 = vst [vmem:[#allocation2 + $0xd5] ss:$8 sm:$0xf] %v497_v3  ;;  %503 = vst [vmem:[#allocation2 + $0xd5] ss:$8 sm:$0xf0] %v497_v3  ;;  %v520_v10 = vsel %vm518_vm14, %v514_v4, %v516_v8  ;;  %v517_v11 = vsel %vm54_vm2, %v515_v9, %v516_v8 }
  0xcc   :  { %527 = vst.msk [vmem:[#allocation2 + $0x116] ss:$8 sm:$0xf] %vm5114_vm0, %v520_v10  ;;  %528 = vst.msk [vmem:[#allocation2 + $0x116] ss:$8 sm:$0x10] %vm5114_vm0, %v520_v10  ;;  %v519_v12 = vsel %vm518_vm14, %v512_v6, %v517_v11  ;;  %v536_v13 = vpop.permute.xlu1 %535  ;;  %v534_v14 = vpop.permute.xlu0 %533 }
  0xcd   :  { %524 = vst [vmem:[#allocation2 + $0xd6] ss:$8 sm:$0xf] %v519_v12  ;;  %525 = vst [vmem:[#allocation2 + $0xd6] ss:$8 sm:$0xf0] %v519_v12 }
  0xce   :  { %v538_v15 = vrot.slane %v536_v13, 1  ;;  %v537_v16 = vrot.slane %v534_v14, 1  ;;  %v581_v2 = vld [vmem:[#allocation2 + $0x38] sm:$0xff]  ;;  %v599_v6 = vld [vmem:[#allocation2 + $0xc8] sm:$0xff]  ;;  %v6992_v9 = vmov 0.0|0.0   ;;  %v580_v10 = vld [vmem:[#allocation2 + $0x30] sm:$0xff] }
  0xcf   :  { %v4265_v3 = vpack.c.bf16 %v594_v61, %v581_v2  ;;  %v593_v4 = vld [vmem:[#allocation2 + $0x98] sm:$0xff]  ;;  %v586_v11 = vld [vmem:[#allocation2 + $0x60] sm:$0xff]  ;;  %v1244_v61 = vld [vmem:[%s6984_s3 + $0x90] sm:$0xff]  ;;  %vm7020_vm13 = vcmask 916480   ;;  %vm7010_vm14 = vcmask 1043456  }
  0xd0   :  { %v542_v17 = vsel %vm540_vm15, %v536_v13, %v538_v15  ;;  %v539_v18 = vsel %vm54_vm2, %v537_v16, %v538_v15  ;;  %v558_v20 = vpop.permute.xlu1 %557  ;;  %v556_v21 = vpop.permute.xlu0 %555  ;;  %v4267_v12 = vpack.c.bf16 %v593_v4, %v580_v10  ;;  %v4296_v13 = vpack.c.bf16 %v599_v6, %v586_v11  ;;  %v1246_v2 = vld [vmem:[%s6984_s3 + $0xa0] sm:$0xff]  ;;  %v1251_v4 = vld [vmem:[%s6984_s3 + $0xc8] sm:$0xff]  ;;  %v1253_v6 = vld [vmem:[%s6984_s3 + $0xd8] sm:$0xff] }
  0xd1   :  { %549 = vst.msk [vmem:[#allocation2 + $0x117] ss:$8 sm:$0xf] %vm5114_vm0, %v542_v17  ;;  %550 = vst.msk [vmem:[#allocation2 + $0x117] ss:$8 sm:$0x10] %vm5114_vm0, %v542_v17  ;;  %v541_v19 = vsel %vm540_vm15, %v534_v14, %v539_v18  ;;  %v4326_v10 = vpack.c.bf16 %v1253_v6, %v1251_v4 }
  0xd2   :  { %546 = vst [vmem:[#allocation2 + $0xd7] ss:$8 sm:$0xf] %v541_v19  ;;  %547 = vst [vmem:[#allocation2 + $0xd7] ss:$8 sm:$0xf0] %v541_v19 }
  0xd3   :  { %v560_v22 = vrot.slane %v558_v20, 1  ;;  %v559_v23 = vrot.slane %v556_v21, 1  ;;  %v598_v18 = vld [vmem:[#allocation2 + $0xc0] sm:$0xff]  ;;  %v1227_v19 = vld [vmem:[%s6984_s3 + $0x8] sm:$0xff]  ;;  %v1293_v4 = vld [vmem:[%s6984_s3 + $0x218] sm:$0xff]  ;;  %vm1722_vm15 = vcmask 130052  }
  0xd4   :  { %v1250_v11 = vld [vmem:[%s6984_s3 + $0xc0] sm:$0xff]  ;;  %vm1220_vm9 = vmor %vm1219_vm8, %vm7010_vm14 }
  0xd5   :  { %v564_v24 = vsel %vm562_vm7, %v558_v20, %v560_v22  ;;  %v561_v25 = vsel %vm54_vm2, %v559_v23, %v560_v22  ;;  %v1229_v20 = vld [vmem:[%s6984_s3 + $0x18] sm:$0xff]  ;;  %vm5005_vm2 = vmmov 0  }
  0xd6   :  { %571 = vst.msk [vmem:[#allocation2 + $0x178] ss:$8 sm:$0xf] %vm5114_vm0, %v564_v24  ;;  %572 = vst.msk [vmem:[#allocation2 + $0x178] ss:$8 sm:$0x10] %vm5114_vm0, %v564_v24  ;;  %v563_v26 = vsel %vm562_vm7, %v556_v21, %v561_v25  ;;  %v4302_v30 = vpack.c.bf16 %v1229_v20, %v1227_v19 }
  0xd7   :  { %568 = vst [vmem:[#allocation2 + $0x138] ss:$8 sm:$0xf] %v563_v26  ;;  %569 = vst [vmem:[#allocation2 + $0x138] ss:$8 sm:$0xf0] %v563_v26 }
  0xd8   :  { %vm632_vm0 = vcmask 203776   ;;  %v609_v56 = vld [vmem:[#allocation2 + $0x118] sm:$0xff]  ;;  %v608_v63 = vld [vmem:[#allocation2 + $0x110] sm:$0xff]  ;;  %v1259_v19 = vld [vmem:[%s6984_s3 + $0x108] sm:$0xff] }
  0xd9   :  { %v601_v31 = vld [vmem:[#allocation2 + $0xd8] sm:$0xff]  ;;  %v600_v33 = vld [vmem:[#allocation2 + $0xd0] sm:$0xff]  ;;  %v603_v55 = vld [vmem:[#allocation2 + $0xe8] sm:$0xff] }
  0xda   :  { %v605_v32 = vld [vmem:[#allocation2 + $0xf8] sm:$0xff]  ;;  %v604_v39 = vld [vmem:[#allocation2 + $0xf0] sm:$0xff]  ;;  %v602_v62 = vld [vmem:[#allocation2 + $0xe0] sm:$0xff] }
  0xdb   :  { %v607_v14 = vld [vmem:[#allocation2 + $0x108] sm:$0xff]  ;;  %v606_v21 = vld [vmem:[#allocation2 + $0x100] sm:$0xff]  ;;  %v612_v22 = vld [vmem:[#allocation2 + $0x130] sm:$0xff] }
  0xdc   :  { %v585_v25 = vld [vmem:[#allocation2 + $0x58] sm:$0xff]  ;;  %vm1723_vm7 = vmor %vm1722_vm15, %vm7010_vm14  ;;  %vm2317_vm15 = vcmask 941056   ;;  %vm7015_vm14 = vcmask 744448  }
  0xdd   :  { %v622_v50 = vld [vmem:[#allocation2 + $0x180] sm:$0x1]  ;;  %v621_v60 = vld [vmem:[#allocation2 + $0x178] sm:$0x1]  ;;  %v4285_v26 = vpack.c.bf16 %v598_v18, %v585_v25  ;;  %v1256_v18 = vld [vmem:[%s6984_s3 + $0xf0] sm:$0xff] }
  0xde   :  { %v614_v34 = vld [vmem:[#allocation2 + $0x140] sm:$0x1]  ;;  %v613_v36 = vld [vmem:[#allocation2 + $0x138] sm:$0x1]  ;;  %v616_v49 = vld [vmem:[#allocation2 + $0x150] sm:$0x1]  ;;  %v4279_v58 = vpack.c.bf16 %v622_v50, %v609_v56  ;;  %v4282_v1 = vpack.c.bf16 %v621_v60, %v608_v63 }
  0xdf   :  { %v618_v35 = vld [vmem:[#allocation2 + $0x160] sm:$0x1]  ;;  %v4239_v37 = vpack.c.bf16 %v614_v34, %v601_v31  ;;  %v4242_v38 = vpack.c.bf16 %v613_v36, %v600_v33  ;;  %v617_v40 = vld [vmem:[#allocation2 + $0x158] sm:$0x1]  ;;  %v4249_v57 = vpack.c.bf16 %v616_v49, %v603_v55  ;;  %v615_v59 = vld [vmem:[#allocation2 + $0x148] sm:$0x1] }
  0xe0   :  { %v4259_v7 = vpack.c.bf16 %v618_v35, %v605_v32  ;;  %v4262_v41 = vpack.c.bf16 %v617_v40, %v604_v39  ;;  %v4252_v0 = vpack.c.bf16 %v615_v59, %v602_v62  ;;  %v620_v8 = vld [vmem:[#allocation2 + $0x170] sm:$0x1]  ;;  %v619_v16 = vld [vmem:[#allocation2 + $0x168] sm:$0x1]  ;;  %v625_v17 = vld [vmem:[#allocation2 + $0x198] sm:$0x1] }
  0xe1   :  { %4241 = vmatprep.subr.msk.bf16.mxu1 %vm5348_vm10, %v4239_v37  ;;  %v4269_v15 = vpack.c.bf16 %v620_v8, %v607_v14  ;;  %v4272_v23 = vpack.c.bf16 %v619_v16, %v606_v21  ;;  %v4299_v24 = vpack.c.bf16 %v625_v17, %v612_v22  ;;  %v624_v31 = vld [vmem:[#allocation2 + $0x190] sm:$0x1]  ;;  %v1226_v32 = vld [vmem:[%s6984_s3] sm:$0xff]  ;;  %v1231_v35 = vld [vmem:[%s6984_s3 + $0x28] sm:$0xff] }
  0xe2   :  { %4261 = vmatprep.subr.msk.bf16.mxu0 %vm5348_vm10, %v4259_v7  ;;  %4244 = vmatpush1.bf16.msk.msra.mxu1 %vm5348_vm10, %v4242_v38  ;;  %v1228_v33 = vld [vmem:[%s6984_s3 + $0x10] sm:$0xff]  ;;  %v1233_v36 = vld [vmem:[%s6984_s3 + $0x38] sm:$0xff]  ;;  %v611_v7 = vld [vmem:[#allocation2 + $0x128] sm:$0xff] }
  0xe3   :  { %4264 = vmatpush1.bf16.msk.msra.mxu0 %vm5348_vm10, %v4262_v41  ;;  %4246 = vmatprep.subr.bf16.mxu1 %v4245_v44  ;;  %v584_v34 = vld [vmem:[#allocation2 + $0x50] sm:$0xff]  ;;  %v4289_v38 = vpack.c.bf16 %v624_v31, %v611_v7  ;;  %v623_v39 = vld [vmem:[#allocation2 + $0x188] sm:$0x1]  ;;  %v4304_v40 = vpack.c.bf16 %v1228_v33, %v1226_v32  ;;  %v4306_v41 = vpack.c.bf16 %v1233_v36, %v1231_v35  ;;  %v610_v44 = vld [vmem:[#allocation2 + $0x120] sm:$0xff] }
  0xe4   :  { %4276 = vmatprep.subr.bf16.mxu0 %v4275_v45  ;;  %v4287_v37 = vpack.c.bf16 %v597_v29, %v584_v34  ;;  %v1235_v45 = vld [vmem:[%s6984_s3 + $0x48] sm:$0xff]  ;;  %v4292_v47 = vpack.c.bf16 %v623_v39, %v610_v44  ;;  %v1234_v50 = vld [vmem:[%s6984_s3 + $0x40] sm:$0xff]  ;;  %v1240_v56 = vld [vmem:[%s6984_s3 + $0x70] sm:$0xff]  ;;  %v4348_v44 = vpack.c.bf16 %v1272_v43, %v1270_v42 }
  0xe5   :  { %4121 = vmatmul.mubr.msk.f32.vlgmr.msra.gmra.mrb[0].mxu1 %vm632_vm0, %v5359_v46  ;;  %v4312_v27 = vpack.c.bf16 %v1236_v51, %v1234_v50  ;;  %v1238_v55 = vld [vmem:[%s6984_s3 + $0x60] sm:$0xff]  ;;  %v1247_v62 = vld [vmem:[%s6984_s3 + $0xa8] sm:$0xff]  ;;  %v1249_v63 = vld [vmem:[%s6984_s3 + $0xb8] sm:$0xff] }
  0xe6   :  { %4127 = vmatmul.mubr.msk.f32.vlgmr.msra.gmra.mrb[0].mxu0 %vm632_vm0, %v5359_v46  ;;  %4248 = vmatpush1.bf16.msra.mxu1 %v4247_v53  ;;  %v1241_v53 = vld [vmem:[%s6984_s3 + $0x78] sm:$0xff]  ;;  %v1242_v60 = vld [vmem:[%s6984_s3 + $0x80] sm:$0xff]  ;;  %v1263_v25 = vld [vmem:[%s6984_s3 + $0x128] sm:$0xff] }
  0xe7   :  { %4278 = vmatpush1.bf16.msra.mxu0 %v4277_v54  ;;  %4251 = vmatprep.subr.msk.bf16.mxu1 %vm5348_vm10, %v4249_v57  ;;  %v4314_v54 = vpack.c.bf16 %v1241_v53, %v1239_v52  ;;  %v1243_v57 = vld [vmem:[%s6984_s3 + $0x88] sm:$0xff]  ;;  %v1257_v14 = vld [vmem:[%s6984_s3 + $0xf8] sm:$0xff]  ;;  %v1254_v17 = vld [vmem:[%s6984_s3 + $0xe0] sm:$0xff] }
  0xe8   :  { %4281 = vmatprep.subr.msk.bf16.mxu0 %vm5348_vm10, %v4279_v58  ;;  %811 = vmatprep.mubr.f32.mxu1 %v5001_v28  ;;  %v4316_v58 = vpack.c.bf16 %v1240_v56, %v1238_v55  ;;  %v1261_v20 = vld [vmem:[%s6984_s3 + $0x118] sm:$0xff]  ;;  %v4332_v21 = vpack.c.bf16 %v1256_v18, %v1254_v17  ;;  %v1262_v31 = vld [vmem:[%s6984_s3 + $0x120] sm:$0xff]  ;;  %v1264_v32 = vld [vmem:[%s6984_s3 + $0x130] sm:$0xff] }
  0xe9   :  { %1024 = vmatprep.mubr.f32.mxu0 %v5001_v28  ;;  %v4334_v22 = vpack.c.bf16 %v1261_v20, %v1259_v19  ;;  %v4340_v33 = vpack.c.bf16 %v1264_v32, %v1262_v31  ;;  %v1267_v34 = vld [vmem:[%s6984_s3 + $0x148] sm:$0xff]  ;;  %v1269_v35 = vld [vmem:[%s6984_s3 + $0x158] sm:$0xff]  ;;  %v1268_v7 = vld [vmem:[%s6984_s3 + $0x150] sm:$0xff] }
  0xea   :  { %4254 = vmatpush1.bf16.msk.msra.mxu1 %vm5348_vm10, %v4252_v0  ;;  %v4320_v0 = vpack.c.bf16 %v1244_v61, %v1242_v60  ;;  %v4342_v36 = vpack.c.bf16 %v1269_v35, %v1267_v34  ;;  %v1271_v39 = vld [vmem:[%s6984_s3 + $0x168] sm:$0xff]  ;;  %v1281_v52 = vld [vmem:[%s6984_s3 + $0x1b8] sm:$0xff] }
  0xeb   :  { %4284 = vmatpush1.bf16.msk.msra.mxu0 %vm5348_vm10, %v4282_v1  ;;  %4266 = vmatprep.subr.bf16.mxu1 %v4265_v3  ;;  %v4322_v1 = vpack.c.bf16 %v1249_v63, %v1247_v62  ;;  %v1248_v3 = vld [vmem:[%s6984_s3 + $0xb0] sm:$0xff]  ;;  %v1279_v51 = vld [vmem:[%s6984_s3 + $0x1a8] sm:$0xff]  ;;  %v1289_v62 = vld [vmem:[%s6984_s3 + $0x1f8] sm:$0xff] }
  0xec   :  { %4295 = vmatprep.subr.bf16.mxu0 %v6992_v9  ;;  %v4324_v8 = vpack.c.bf16 %v1248_v3, %v1246_v2  ;;  %v4354_v53 = vpack.c.bf16 %v1281_v52, %v1279_v51  ;;  %v1283_v56 = vld [vmem:[%s6984_s3 + $0x1c8] sm:$0xff]  ;;  %v1297_v35 = vld [vmem:[%s6984_s3 + $0x238] sm:$0xff] }
  0xed   :  { %4124 = vmatmul.mubr.msk.f32.vlgmr.msra.gmra.mrb[2].mxu1 %vm632_vm0, %v5359_v46  ;;  %v1287_v61 = vld [vmem:[%s6984_s3 + $0x1e8] sm:$0xff] }
  0xee   :  { %4133 = vmatmul.mubr.msk.f32.vlgmr.msra.gmra.mrb[2].mxu0 %vm632_vm0, %v5359_v46  ;;  %4268 = vmatpush1.bf16.msra.mxu1 %v4267_v12  ;;  %v1252_v12 = vld [vmem:[%s6984_s3 + $0xd0] sm:$0xff]  ;;  %v4362_v63 = vpack.c.bf16 %v1289_v62, %v1287_v61  ;;  %v1291_v3 = vld [vmem:[%s6984_s3 + $0x208] sm:$0xff] }
  0xef   :  { %4297 = vmatpush3.bf16.msra.mxu0 %v4296_v13  ;;  %4271 = vmatprep.subr.msk.bf16.mxu1 %vm5348_vm10, %v4269_v15  ;;  %v1255_v13 = vld [vmem:[%s6984_s3 + $0xe8] sm:$0xff]  ;;  %v4328_v15 = vpack.c.bf16 %v1252_v12, %v1250_v11  ;;  %v4366_v6 = vpack.c.bf16 %v1293_v4, %v1291_v3  ;;  %v1302_v4 = vld [vmem:[%s6984_s3 + $0x260] sm:$0xff] }
  0xf0   :  { %4298 = vmatprep.subr.bf16.mxu0 %v6992_v9  ;;  %953 = vmatprep.mubr.f32.mxu1 %v5001_v28  ;;  %v4330_v16 = vpack.c.bf16 %v1257_v14, %v1255_v13  ;;  %v1295_v34 = vld [vmem:[%s6984_s3 + $0x228] sm:$0xff] }
  0xf1   :  { %4203 = vmatprep.mubr.msk.f32.mxu0 %vm5005_vm2, %v5001_v28  ;;  %v1403_v9 = vld [vmem:[%s6984_s3 + $0x588] sm:$0xff] }
  0xf2   :  { %4274 = vmatpush1.bf16.msk.msra.mxu1 %vm5348_vm10, %v4272_v23  ;;  %v1258_v23 = vld [vmem:[%s6984_s3 + $0x100] sm:$0xff] }
  0xf3   :  { %4301 = vmatpush3.bf16.msk.msra.mxu0 %vm5348_vm10, %v4299_v24  ;;  %4286 = vmatprep.subr.bf16.mxu1 %v4285_v26  ;;  %v1260_v24 = vld [vmem:[%s6984_s3 + $0x110] sm:$0xff]  ;;  %v1265_v26 = vld [vmem:[%s6984_s3 + $0x138] sm:$0xff] }
  0xf4   :  { %4499 = vmatprep.subr.bf16.mxu0 %v4302_v30  ;;  %v4336_v29 = vpack.c.bf16 %v1260_v24, %v1258_v23 }
  0xf5   :  { %4130 = vmatmul.mubr.msk.f32.vlgmr.msra.gmra.mrb[4].mxu1 %vm632_vm0, %v5359_v46 }
  0xf6   :  { %4204 = vmatmul.mubr.msk.f32.vlgmr.msra.gmra.mrb[4].mxu0 %vm632_vm0, %v5359_v46  ;;  %4288 = vmatpush1.bf16.msra.mxu1 %v4287_v37  ;;  %v1266_v37 = vld [vmem:[%s6984_s3 + $0x140] sm:$0xff] }
  0xf7   :  { %1095 = vmatprep.mubr.f32.mxu1 %v5001_v28  ;;  %4291 = vmatprep.subr.msk.bf16.mxu1 %vm5348_vm10, %v4289_v38  ;;  %v1237_v28 = vld [vmem:[%s6984_s3 + $0x58] sm:$0xff]  ;;  %v4344_v38 = vpack.c.bf16 %v1268_v7, %v1266_v37 }
  0xf8   :  { %4501 = vmatpush1.bf16.msra.mxu0 %v4304_v40  ;;  %v4310_v49 = vpack.c.bf16 %v1237_v28, %v1235_v45  ;;  %v1275_v45 = vld [vmem:[%s6984_s3 + $0x188] sm:$0xff]  ;;  %v1277_v28 = vld [vmem:[%s6984_s3 + $0x198] sm:$0xff] }
  0xf9   :  { %4503 = vmatprep.subr.bf16.mxu0 %v4306_v41 }
  0xfa   :  { %4294 = vmatpush1.bf16.msk.msra.mxu1 %vm5348_vm10, %v4292_v47  ;;  %v4350_v47 = vpack.c.bf16 %v1277_v28, %v1275_v45  ;;  %v5635_v28 = vpack.c.bf16 %v1297_v35, %v1295_v34  ;;  %vm2253_vm10 = vcmask 1043584  }
  0xfb   :  { %4303 = vmatprep.subr.bf16.mxu1 %v4302_v30  ;;  %v4338_v30 = vpack.c.bf16 %v1265_v26, %v1263_v25 }
  0xfc   :  { %4505 = vmatpush1.bf16.msra.mxu0 %v4308_v48 }
  0xfd   :  { %4507 = vmatprep.subr.bf16.mxu0 %v4310_v49  ;;  %4136 = vmatmul.mubr.msk.f32.vlgmr.msra.gmra.mrb[6].mxu1 %vm632_vm0, %v5359_v46  ;;  %v1245_v46 = vld [vmem:[%s6984_s3 + $0x98] sm:$0xff]  ;;  %vm2254_vm0 = vmor %vm1219_vm8, %vm2253_vm10  ;;  %vm2339_vm8 = vcmask 924672   ;;  %vm7022_vm10 = vcmask 850944  }
  0xfe   :  { %4305 = vmatpush1.bf16.msra.mxu1 %v4304_v40  ;;  %v4318_v59 = vpack.c.bf16 %v1245_v46, %v1243_v57  ;;  %v1273_v40 = vld [vmem:[%s6984_s3 + $0x178] sm:$0xff] }
  0xff   :  { %4307 = vmatprep.subr.bf16.mxu1 %v4306_v41  ;;  %v4346_v41 = vpack.c.bf16 %v1273_v40, %v1271_v39  ;;  %v1285_v57 = vld [vmem:[%s6984_s3 + $0x1d8] sm:$0xff]  ;;  %v1404_v39 = vld [vmem:[%s6984_s3 + $0x590] sm:$0xff] }
 0x100   :  { %4509 = vmatpush1.bf16.msra.mxu0 %v4312_v27  ;;  %v4358_v46 = vpack.c.bf16 %v1285_v57, %v1283_v56 }
 0x101   :  { %4511 = vmatprep.subr.bf16.mxu0 %v4314_v54 }
 0x102   :  { %4309 = vmatpush1.bf16.msra.mxu1 %v4308_v48  ;;  %v1274_v48 = vld [vmem:[%s6984_s3 + $0x180] sm:$0xff] }
 0x103   :  { %4311 = vmatprep.subr.bf16.mxu1 %v4310_v49  ;;  %v1276_v49 = vld [vmem:[%s6984_s3 + $0x190] sm:$0xff] }
 0x104   :  { %4513 = vmatpush1.bf16.msra.mxu0 %v4316_v58  ;;  %v4352_v50 = vpack.c.bf16 %v1276_v49, %v1274_v48  ;;  %v1296_v48 = vld [vmem:[%s6984_s3 + $0x230] sm:$0xff]  ;;  %v1299_v49 = vld [vmem:[%s6984_s3 + $0x248] sm:$0xff] }
 0x105   :  { %4515 = vmatprep.subr.bf16.mxu0 %v4318_v59 }
 0x106   :  { %4313 = vmatpush1.bf16.msra.mxu1 %v4312_v27  ;;  %v1278_v27 = vld [vmem:[%s6984_s3 + $0x1a0] sm:$0xff] }
 0x107   :  { %4315 = vmatprep.subr.bf16.mxu1 %v4314_v54  ;;  %v1280_v54 = vld [vmem:[%s6984_s3 + $0x1b0] sm:$0xff] }
 0x108   :  { %4517 = vmatpush1.bf16.msra.mxu0 %v4320_v0  ;;  %v4356_v55 = vpack.c.bf16 %v1280_v54, %v1278_v27  ;;  %v1298_v54 = vld [vmem:[%s6984_s3 + $0x240] sm:$0xff] }
 0x109   :  { %4519 = vmatprep.subr.bf16.mxu0 %v4322_v1 }
 0x10a   :  { %4317 = vmatpush1.bf16.msra.mxu1 %v4316_v58  ;;  %v1282_v58 = vld [vmem:[%s6984_s3 + $0x1c0] sm:$0xff] }
 0x10b   :  { %4319 = vmatprep.subr.bf16.mxu1 %v4318_v59  ;;  %v1284_v59 = vld [vmem:[%s6984_s3 + $0x1d0] sm:$0xff] }
 0x10c   :  { %4521 = vmatpush1.bf16.msra.mxu0 %v4324_v8  ;;  %v4360_v60 = vpack.c.bf16 %v1284_v59, %v1282_v58  ;;  %v1305_v58 = vld [vmem:[%s6984_s3 + $0x278] sm:$0xff] }
 0x10d   :  { %4523 = vmatprep.subr.bf16.mxu0 %v4326_v10 }
 0x10e   :  { %4321 = vmatpush1.bf16.msra.mxu1 %v4320_v0  ;;  %v1286_v0 = vld [vmem:[%s6984_s3 + $0x1e0] sm:$0xff] }
 0x10f   :  { %4323 = vmatprep.subr.bf16.mxu1 %v4322_v1  ;;  %v1288_v1 = vld [vmem:[%s6984_s3 + $0x1f0] sm:$0xff] }
 0x110   :  { %4525 = vmatpush1.bf16.msra.mxu0 %v4328_v15  ;;  %v4364_v2 = vpack.c.bf16 %v1288_v1, %v1286_v0 }
 0x111   :  { %4527 = vmatprep.subr.bf16.mxu0 %v4330_v16 }
 0x112   :  { %4325 = vmatpush1.bf16.msra.mxu1 %v4324_v8  ;;  %v5602_v8 = vpop.permute.xlu0 %629 }
 0x113   :  { %4327 = vmatprep.subr.bf16.mxu1 %v4326_v10 }
 0x114   :  { %4529 = vmatpush1.bf16.msra.mxu0 %v4332_v21 }
 0x115   :  { %4531 = vmatprep.subr.bf16.mxu0 %v4334_v22 }
 0x116   :  { %4329 = vmatpush1.bf16.msra.mxu1 %v4328_v15 }
 0x117   :  { %4331 = vmatprep.subr.bf16.mxu1 %v4330_v16 }
 0x118   :  { %4533 = vmatpush1.bf16.msra.mxu0 %v4336_v29 }
 0x119   :  { %4535 = vmatprep.subr.bf16.mxu0 %v4338_v30 }
 0x11a   :  { %4333 = vmatpush1.bf16.msra.mxu1 %v4332_v21 }
 0x11b   :  { %4335 = vmatprep.subr.bf16.mxu1 %v4334_v22 }
 0x11c   :  { %4537 = vmatpush1.bf16.msra.mxu0 %v4340_v33 }
 0x11d   :  { %4539 = vmatprep.subr.bf16.mxu0 %v4342_v36 }
 0x11e   :  { %4337 = vmatpush1.bf16.msra.mxu1 %v4336_v29  ;;  %v1290_v29 = vld [vmem:[%s6984_s3 + $0x200] sm:$0xff] }
 0x11f   :  { %4339 = vmatprep.subr.bf16.mxu1 %v4338_v30  ;;  %v1292_v30 = vld [vmem:[%s6984_s3 + $0x210] sm:$0xff] }
 0x120   :  { %4541 = vmatpush1.bf16.msra.mxu0 %v4344_v38 }
 0x121   :  { %4543 = vmatprep.subr.bf16.mxu0 %v4346_v41 }
 0x122   :  { %4341 = vmatpush1.bf16.msra.mxu1 %v4340_v33 }
 0x123   :  { %4343 = vmatprep.subr.bf16.mxu1 %v4342_v36 }
 0x124   :  { %4545 = vmatpush1.bf16.msra.mxu0 %v4348_v44 }
 0x125   :  { %4547 = vmatprep.subr.bf16.mxu0 %v4350_v47 }
 0x126   :  { %4345 = vmatpush1.bf16.msra.mxu1 %v4344_v38  ;;  %v5628_v38 = vpack.c.bf16 %v1292_v30, %v1290_v29  ;;  %v1315_v29 = vld [vmem:[%s6984_s3 + $0x2c8] sm:$0xff]  ;;  %v1317_v30 = vld [vmem:[%s6984_s3 + $0x2d8] sm:$0xff] }
 0x127   :  { %4347 = vmatprep.subr.bf16.mxu1 %v4346_v41  ;;  %v5737_v35 = vpack.c.bf16 %v1317_v30, %v1315_v29  ;;  %v1338_v30 = vld [vmem:[%s6984_s3 + $0x380] sm:$0xff] }
 0x128   :  { %4549 = vmatpush1.bf16.msra.mxu0 %v4352_v50 }
 0x129   :  { %4551 = vmatprep.subr.bf16.mxu0 %v4354_v53 }
 0x12a   :  { %4349 = vmatpush1.bf16.msra.mxu1 %v4348_v44 }
 0x12b   :  { %4351 = vmatprep.subr.bf16.mxu1 %v4350_v47  ;;  %v1294_v47 = vld [vmem:[%s6984_s3 + $0x220] sm:$0xff] }
 0x12c   :  { %4553 = vmatpush1.bf16.msra.mxu0 %v4356_v55  ;;  %v5652_v52 = vpack.c.bf16 %v1296_v48, %v1294_v47  ;;  %v1318_v48 = vld [vmem:[%s6984_s3 + $0x2e0] sm:$0xff] }
 0x12d   :  { %4555 = vmatprep.subr.bf16.mxu0 %v4358_v46 }
 0x12e   :  { %4353 = vmatpush1.bf16.msra.mxu1 %v4352_v50  ;;  %v1301_v50 = vld [vmem:[%s6984_s3 + $0x258] sm:$0xff] }
 0x12f   :  { %4355 = vmatprep.subr.bf16.mxu1 %v4354_v53  ;;  %v5657_v27 = vpack.c.bf16 %v1301_v50, %v1299_v49  ;;  %v1320_v49 = vld [vmem:[%s6984_s3 + $0x2f0] sm:$0xff] }
 0x130   :  { %4557 = vmatpush1.bf16.msra.mxu0 %v4360_v60 }
 0x131   :  { %4559 = vmatprep.subr.bf16.mxu0 %v4362_v63 }
 0x132   :  { %4357 = vmatpush1.bf16.msra.mxu1 %v4356_v55  ;;  %v1300_v55 = vld [vmem:[%s6984_s3 + $0x250] sm:$0xff] }
 0x133   :  { %4359 = vmatprep.subr.bf16.mxu1 %v4358_v46  ;;  %v1303_v46 = vld [vmem:[%s6984_s3 + $0x268] sm:$0xff]  ;;  %v5677_v1 = vpack.c.bf16 %v1300_v55, %v1298_v54  ;;  %v1325_v55 = vld [vmem:[%s6984_s3 + $0x318] sm:$0xff] }
 0x134   :  { %4561 = vmatpush1.bf16.msra.mxu0 %v4364_v2  ;;  %v5681_v3 = vpack.c.bf16 %v1305_v58, %v1303_v46  ;;  %v1323_v54 = vld [vmem:[%s6984_s3 + $0x308] sm:$0xff] }
 0x135   :  { %4563 = vmatprep.subr.bf16.mxu0 %v4366_v6  ;;  %v5776_v58 = vpack.c.bf16 %v1325_v55, %v1323_v54  ;;  %v1348_v54 = vld [vmem:[%s6984_s3 + $0x3d0] sm:$0xff]  ;;  %v1351_v55 = vld [vmem:[%s6984_s3 + $0x3e8] sm:$0xff] }
 0x136   :  { %4361 = vmatpush1.bf16.msra.mxu1 %v4360_v60 }
 0x137   :  { %4363 = vmatprep.subr.bf16.mxu1 %v4362_v63 }
 0x13a   :  { %4365 = vmatpush1.bf16.msra.mxu1 %v4364_v2 }
 0x13b   :  { %4367 = vmatprep.subr.bf16.mxu1 %v4366_v6  ;;  %v1304_v6 = vld [vmem:[%s6984_s3 + $0x270] sm:$0xff] }
 0x1b8   :  { %v742_v10 = vpop.f32.mrb[0].mxu1 }
 0x1b9   :  { %v884_v11 = vpop.f32.mrb[0].mxu0  ;;  %v743_v12 = vadd.f32 %v742_v10, %v5602_v8  ;;  %v744_v13 = vpop.f32.mrb[1].mxu1  ;;  %v1307_v10 = vld [vmem:[%s6984_s3 + $0x288] sm:$0xff] }
 0x1ba   :  { %v885_v14 = vadd.f32 %v884_v11, %v5602_v8  ;;  %v886_v15 = vpop.f32.mrb[1].mxu0  ;;  %v745_v16 = vadd.f32 %v744_v13, %v5602_v8 }
 0x1bb   :  { %v887_v17 = vadd.f32 %v886_v15, %v5602_v8  ;;  %4908 = vtanh.f32 %v743_v12  ;;  %v5696_v12 = vpack.c.bf16 %v1304_v6, %v1302_v4  ;;  %v1306_v15 = vld [vmem:[%s6984_s3 + $0x280] sm:$0xff]  ;;  %v1328_v4 = vld [vmem:[%s6984_s3 + $0x330] sm:$0xff]  ;;  %v1331_v6 = vld [vmem:[%s6984_s3 + $0x348] sm:$0xff] }
 0x1bc   :  { %4910 = vtanh.f32 %v745_v16  ;;  %v1308_v16 = vld [vmem:[%s6984_s3 + $0x290] sm:$0xff] }
 0x1bd   :  { %4912 = vtanh.f32 %v885_v14 }
 0x1be   :  { %4914 = vtanh.f32 %v887_v17 }
 0x1c0   :  { %v813_v18 = vpop.f32.mrb[2].mxu1 }
 0x1c1   :  { %v1026_v19 = vpop.f32.mrb[2].mxu0  ;;  %v814_v20 = vadd.f32 %v813_v18, %v5602_v8  ;;  %v815_v21 = vpop.f32.mrb[3].mxu1 }
 0x1c2   :  { %v1027_v22 = vadd.f32 %v1026_v19, %v5602_v8  ;;  %v1028_v23 = vpop.f32.mrb[3].mxu0  ;;  %v816_v24 = vadd.f32 %v815_v21, %v5602_v8  ;;  %v1311_v19 = vld [vmem:[%s6984_s3 + $0x2a8] sm:$0xff]  ;;  %v5715_v21 = vpack.c.bf16 %v1308_v16, %v1306_v15  ;;  %v1332_v15 = vld [vmem:[%s6984_s3 + $0x350] sm:$0xff] }
 0x1c3   :  { %v1029_v25 = vadd.f32 %v1028_v23, %v5602_v8  ;;  %4916 = vtanh.f32 %v814_v20  ;;  %v1313_v20 = vld [vmem:[%s6984_s3 + $0x2b8] sm:$0xff]  ;;  %v1335_v16 = vld [vmem:[%s6984_s3 + $0x368] sm:$0xff] }
 0x1c4   :  { %4918 = vtanh.f32 %v816_v24  ;;  %v5718_v23 = vpack.c.bf16 %v1313_v20, %v1311_v19  ;;  %v1310_v24 = vld [vmem:[%s6984_s3 + $0x2a0] sm:$0xff] }
 0x1c5   :  { %v4909_v26 = vpop.eup %4908  ;;  %4920 = vtanh.f32 %v1027_v22  ;;  %v1334_v20 = vld [vmem:[%s6984_s3 + $0x360] sm:$0xff] }
 0x1c6   :  { %v4911_v31 = vpop.eup %4910  ;;  %4922 = vtanh.f32 %v1029_v25  ;;  %v1312_v25 = vld [vmem:[%s6984_s3 + $0x2b0] sm:$0xff] }
 0x1c7   :  { %v5618_v32 = vpop.eup %4912  ;;  %v1197_v33 = vcombine.low %v4909_v26, %v4911_v31  ;;  %v4947_v43 = vcombine.low %v4911_v31, %v4911_v31 }
 0x1c8   :  { %v5626_v36 = vpop.eup %4914  ;;  %v955_v37 = vpop.f32.mrb[4].mxu1 }
 0x1c9   :  { %v1168_v7 = vpop.f32.mrb[4].mxu0  ;;  %v956_v40 = vadd.f32 %v955_v37, %v5602_v8  ;;  %v957_v41 = vpop.f32.mrb[5].mxu1  ;;  %1498 = vmatprep.mubr.f32.mxu1 %v4947_v43  ;;  %v1314_v37 = vld [vmem:[%s6984_s3 + $0x2c0] sm:$0xff]  ;;  %v1321_v43 = vld [vmem:[%s6984_s3 + $0x2f8] sm:$0xff] }
 0x1ca   :  { %v1169_v42 = vadd.f32 %v1168_v7, %v5602_v8  ;;  %v4205_v44 = vpop.f32.mrb[5].mxu0  ;;  %v958_v45 = vadd.f32 %v957_v41, %v5602_v8  ;;  %1499 = vmatmul.mubr.f32.vlgmr.msra.gmra.mrb[8].mxu1 %v1197_v33  ;;  %v5734_v33 = vpack.c.bf16 %v1312_v25, %v1310_v24  ;;  %v1316_v7 = vld [vmem:[%s6984_s3 + $0x2d0] sm:$0xff]  ;;  %v1339_v24 = vld [vmem:[%s6984_s3 + $0x388] sm:$0xff]  ;;  %v1341_v25 = vld [vmem:[%s6984_s3 + $0x398] sm:$0xff] }
 0x1cb   :  { %4924 = vtanh.f32 %v956_v40  ;;  %4369 = vmatpush1.bf16.msra.mxu1 %v5628_v38  ;;  %v5849_v29 = vpack.c.bf16 %v1341_v25, %v1339_v24  ;;  %v1358_v24 = vld [vmem:[%s6984_s3 + $0x420] sm:$0xff]  ;;  %v1360_v25 = vld [vmem:[%s6984_s3 + $0x430] sm:$0xff] }
 0x1cc   :  { %4926 = vtanh.f32 %v958_v45  ;;  %4371 = vmatprep.subr.bf16.mxu1 %v5635_v28  ;;  %v5753_v45 = vpack.c.bf16 %v1316_v7, %v1314_v37  ;;  %v1345_v37 = vld [vmem:[%s6984_s3 + $0x3b8] sm:$0xff] }
 0x1cd   :  { %v5649_v51 = vpop.eup %4916  ;;  %4928 = vtanh.f32 %v1169_v42  ;;  %v1319_v42 = vld [vmem:[%s6984_s3 + $0x2e8] sm:$0xff] }
 0x1ce   :  { %v5654_v53 = vpop.eup %4918  ;;  %v5756_v47 = vpack.c.bf16 %v1321_v43, %v1319_v42  ;;  %v1344_v42 = vld [vmem:[%s6984_s3 + $0x3b0] sm:$0xff]  ;;  %v1347_v43 = vld [vmem:[%s6984_s3 + $0x3c8] sm:$0xff] }
 0x1cf   :  { %v4921_v56 = vpop.eup %4920  ;;  %v1198_v57 = vcombine.low %v5649_v51, %v5654_v53  ;;  %4373 = vmatpush1.bf16.msra.mxu1 %v5652_v52  ;;  %v4948_v0 = vcombine.low %v5654_v53, %v5654_v53  ;;  %v1367_v51 = vld [vmem:[%s6984_s3 + $0x468] sm:$0xff]  ;;  %v1369_v53 = vld [vmem:[%s6984_s3 + $0x478] sm:$0xff] }
 0x1d0   :  { %v4923_v59 = vpop.eup %4922  ;;  %v1097_v60 = vpop.f32.mrb[6].mxu1  ;;  %4375 = vmatprep.subr.bf16.mxu1 %v5657_v27 }
 0x1d1   :  { %v1201_v61 = vcombine.low %v4921_v56, %v4923_v59  ;;  %v1098_v62 = vadd.f32 %v1097_v60, %v5602_v8  ;;  %v1099_v63 = vpop.f32.mrb[7].mxu1  ;;  %1569 = vmatprep.mubr.f32.mxu1 %v4948_v0  ;;  %v4950_v41 = vcombine.low %v4923_v59, %v4923_v59  ;;  %v5773_v56 = vpack.c.bf16 %v1320_v49, %v1318_v48  ;;  %v1322_v59 = vld [vmem:[%s6984_s3 + $0x300] sm:$0xff]  ;;  %v1324_v60 = vld [vmem:[%s6984_s3 + $0x310] sm:$0xff] }
 0x1d2   :  { %v1100_v2 = vadd.f32 %v1099_v63, %v5602_v8  ;;  %v1309_v8 = vld [vmem:[%s6984_s3 + $0x298] sm:$0xff]  ;;  %v5792_v63 = vpack.c.bf16 %v1324_v60, %v1322_v59 }
 0x1d3   :  { %4930 = vtanh.f32 %v1098_v62  ;;  %4377 = vmatpush1.bf16.msra.mxu1 %v5677_v1  ;;  %v5699_v14 = vpack.c.bf16 %v1309_v8, %v1307_v10  ;;  %v1329_v62 = vld [vmem:[%s6984_s3 + $0x338] sm:$0xff] }
 0x1d4   :  { %4932 = vtanh.f32 %v1100_v2  ;;  %4379 = vmatprep.subr.bf16.mxu1 %v5681_v3  ;;  %v1326_v2 = vld [vmem:[%s6984_s3 + $0x320] sm:$0xff]  ;;  %v1333_v10 = vld [vmem:[%s6984_s3 + $0x358] sm:$0xff] }
 0x1d5   :  { %v4925_v11 = vpop.eup %4924  ;;  %v5810_v8 = vpack.c.bf16 %v1328_v4, %v1326_v2  ;;  %v1355_v2 = vld [vmem:[%s6984_s3 + $0x408] sm:$0xff]  ;;  %v1357_v4 = vld [vmem:[%s6984_s3 + $0x418] sm:$0xff] }
 0x1d6   :  { %v4927_v13 = vpop.eup %4926 }
 0x1d7   :  { %v4929_v17 = vpop.eup %4928  ;;  %v1200_v18 = vcombine.low %v4925_v11, %v4927_v13  ;;  %4381 = vmatpush1.bf16.msra.mxu1 %v5696_v12  ;;  %v4949_v22 = vcombine.low %v4927_v13, %v4927_v13  ;;  %v5813_v11 = vpack.c.bf16 %v1333_v10, %v1331_v6  ;;  %v1330_v13 = vld [vmem:[%s6984_s3 + $0x340] sm:$0xff]  ;;  %v5921_v10 = vpack.c.bf16 %v1357_v4, %v1355_v2  ;;  %v1372_v4 = vld [vmem:[%s6984_s3 + $0x490] sm:$0xff] }
 0x1d8   :  { %1216 = vst.msk [vmem:[#allocation3 + $0x30] sm:$0xf] %vm7008_vm11, %v4929_v17  ;;  %4383 = vmatprep.subr.bf16.mxu1 %v5699_v14  ;;  %v1337_v17 = vld [vmem:[%s6984_s3 + $0x378] sm:$0xff]  ;;  %v1370_v2 = vld [vmem:[%s6984_s3 + $0x480] sm:$0xff]  ;;  %vm7011_vm11 = vcmask 842752  }
 0x1d9   :  { %1212 = vst [vmem:[#allocation3 + $0x18] sm:$0xff] %v1200_v18  ;;  %v4897_v26 = vpack.i.bf16 %v1201_v61, %v4949_v22  ;;  %v1327_v61 = vld [vmem:[%s6984_s3 + $0x328] sm:$0xff]  ;;  %v5831_v19 = vpack.c.bf16 %v1337_v17, %v1335_v16  ;;  %v1336_v22 = vld [vmem:[%s6984_s3 + $0x370] sm:$0xff]  ;;  %v1361_v17 = vld [vmem:[%s6984_s3 + $0x438] sm:$0xff] }
 0x1da   :  { %v5795_v0 = vpack.c.bf16 %v1329_v62, %v1327_v61  ;;  %v1350_v61 = vld [vmem:[%s6984_s3 + $0x3e0] sm:$0xff]  ;;  %v1352_v62 = vld [vmem:[%s6984_s3 + $0x3f0] sm:$0xff]  ;;  %v1359_v16 = vld [vmem:[%s6984_s3 + $0x428] sm:$0xff] }
 0x1db   :  { %4385 = vmatpush1.bf16.msra.mxu1 %v5715_v21  ;;  %4898 = vrot.lane.b32.xlu1 %v4897_v26, %s5006_s17  ;;  %v5846_v26 = vpack.c.bf16 %v1336_v22, %v1334_v20  ;;  %v5918_v6 = vpack.c.bf16 %v1352_v62, %v1350_v61  ;;  %v5939_v22 = vpack.c.bf16 %v1361_v17, %v1359_v16 }
 0x1dc   :  { %4387 = vmatprep.subr.bf16.mxu1 %v5718_v23  ;;  %v6013_v16 = vpack.c.bf16 %v1372_v4, %v1370_v2  ;;  %v1384_v2 = vld [vmem:[%s6984_s3 + $0x4f0] sm:$0xff]  ;;  %v1387_v4 = vld [vmem:[%s6984_s3 + $0x508] sm:$0xff] }
 0x1dd   :  { %v4931_v31 = vpop.eup %4930 }
 0x1de   :  { %v4933_v34 = vpop.eup %4932 }
 0x1df   :  { %v1202_v40 = vcombine.low %v4931_v31, %v4933_v34  ;;  %4389 = vmatpush1.bf16.msra.mxu1 %v5734_v33  ;;  %1932 = vrot.lane.b32.xlu1 %v1200_v18, %s5006_s17  ;;  %v4951_v50 = vcombine.low %v4933_v34, %v4933_v34  ;;  %v1728_v46 = vld [vmem:[#allocation3 + $0x30] sm:$0xf]  ;;  %v5828_v18 = vpack.c.bf16 %v1332_v15, %v1330_v13  ;;  %v1343_v34 = vld [vmem:[%s6984_s3 + $0x3a8] sm:$0xff]  ;;  %v1354_v13 = vld [vmem:[%s6984_s3 + $0x400] sm:$0xff] }
 0x1e0   :  { %4391 = vmatprep.subr.bf16.mxu1 %v5737_v35  ;;  %v1340_v31 = vld [vmem:[%s6984_s3 + $0x390] sm:$0xff] }
 0x1e1   :  { %v4902_v44 = vpack.i.bf16 %v1202_v40, %v4950_v41  ;;  %v5864_v7 = vpack.c.bf16 %v1340_v31, %v1338_v30  ;;  %v5867_v40 = vpack.c.bf16 %v1345_v37, %v1343_v34  ;;  %v1342_v41 = vld [vmem:[%s6984_s3 + $0x3a0] sm:$0xff]  ;;  %v1356_v15 = vld [vmem:[%s6984_s3 + $0x410] sm:$0xff]  ;;  %v4952_v30 = vcombine.low %v5626_v36, %v5626_v36  ;;  %v1363_v31 = vld [vmem:[%s6984_s3 + $0x448] sm:$0xff] }
 0x1e2   :  { %v5882_v48 = vpack.c.bf16 %v1344_v42, %v1342_v41  ;;  %v5936_v20 = vpack.c.bf16 %v1356_v15, %v1354_v13  ;;  %v1365_v34 = vld [vmem:[%s6984_s3 + $0x458] sm:$0xff]  ;;  %v5959_v37 = vpack.c.bf16 %v1360_v25, %v1358_v24  ;;  %v1362_v42 = vld [vmem:[%s6984_s3 + $0x440] sm:$0xff]  ;;  %v1375_v13 = vld [vmem:[%s6984_s3 + $0x4a8] sm:$0xff] }
 0x1e3   :  { %4903 = vrot.lane.b32.xlu0 %v4902_v44, %s5006_s17  ;;  %4393 = vmatpush1.bf16.msra.mxu1 %v5753_v45  ;;  %v1349_v44 = vld [vmem:[%s6984_s3 + $0x3d8] sm:$0xff]  ;;  %v5962_v41 = vpack.c.bf16 %v1365_v34, %v1363_v31  ;;  %v1374_v24 = vld [vmem:[%s6984_s3 + $0x4a0] sm:$0xff]  ;;  %v1376_v25 = vld [vmem:[%s6984_s3 + $0x4b0] sm:$0xff] }
 0x1e4   :  { %1942 = vrot.lane.b32.xlu1 %v4951_v50, %s5006_s17  ;;  %4395 = vmatprep.subr.bf16.mxu1 %v5756_v47  ;;  %v5885_v49 = vpack.c.bf16 %v1349_v44, %v1347_v43  ;;  %v1346_v50 = vld [vmem:[%s6984_s3 + $0x3c0] sm:$0xff]  ;;  %v1364_v43 = vld [vmem:[%s6984_s3 + $0x450] sm:$0xff]  ;;  %v5980_v44 = vpack.c.bf16 %v1369_v53, %v1367_v51  ;;  %v1377_v15 = vld [vmem:[%s6984_s3 + $0x4b8] sm:$0xff]  ;;  %v6031_v34 = vpack.c.bf16 %v1376_v25, %v1374_v24 }
 0x1e5   :  { %v5900_v59 = vpack.c.bf16 %v1348_v54, %v1346_v50  ;;  %v1366_v50 = vld [vmem:[%s6984_s3 + $0x460] sm:$0xff]  ;;  %v1368_v54 = vld [vmem:[%s6984_s3 + $0x470] sm:$0xff]  ;;  %v6016_v17 = vpack.c.bf16 %v1377_v15, %v1375_v13  ;;  %v1381_v31 = vld [vmem:[%s6984_s3 + $0x4d8] sm:$0xff] }
 0x1e6   :  { %v5995_v61 = vpack.c.bf16 %v1368_v54, %v1366_v50  ;;  %v1380_v51 = vld [vmem:[%s6984_s3 + $0x4d0] sm:$0xff]  ;;  %v1383_v53 = vld [vmem:[%s6984_s3 + $0x4e8] sm:$0xff]  ;;  %v1385_v50 = vld [vmem:[%s6984_s3 + $0x4f8] sm:$0xff] }
 0x1e7   :  { %1944 = vrot.lane.b32.xlu0 %v1728_v46, %s5006_s17  ;;  %4397 = vmatpush1.bf16.msra.mxu1 %v5773_v56  ;;  %v1353_v46 = vld [vmem:[%s6984_s3 + $0x3f8] sm:$0xff]  ;;  %v1386_v25 = vld [vmem:[%s6984_s3 + $0x500] sm:$0xff] }
 0x1e8   :  { %4399 = vmatprep.subr.bf16.mxu1 %v5776_v58  ;;  %v5903_v60 = vpack.c.bf16 %v1353_v46, %v1351_v55  ;;  %v1371_v55 = vld [vmem:[%s6984_s3 + $0x488] sm:$0xff]  ;;  %v1373_v46 = vld [vmem:[%s6984_s3 + $0x498] sm:$0xff] }
 0x1e9   :  { %v5998_v62 = vpack.c.bf16 %v1373_v46, %v1371_v55  ;;  %v6052_v55 = vpack.c.bf16 %v1385_v50, %v1383_v53  ;;  %v1382_v46 = vld [vmem:[%s6984_s3 + $0x4e0] sm:$0xff]  ;;  %v1389_v13 = vld [vmem:[%s6984_s3 + $0x518] sm:$0xff] }
 0x1ea   :  { %v6067_v15 = vpack.c.bf16 %v1384_v2, %v1382_v46  ;;  %v6070_v24 = vpack.c.bf16 %v1389_v13, %v1387_v4  ;;  %v1390_v50 = vld [vmem:[%s6984_s3 + $0x520] sm:$0xff]  ;;  %v1392_v46 = vld [vmem:[%s6984_s3 + $0x530] sm:$0xff]  ;;  %v1395_v2 = vld [vmem:[%s6984_s3 + $0x548] sm:$0xff] }
 0x1eb   :  { %4401 = vmatpush1.bf16.msra.mxu1 %v5792_v63  ;;  %v1397_v4 = vld [vmem:[%s6984_s3 + $0x558] sm:$0xff]  ;;  %v6103_v13 = vpack.c.bf16 %v1392_v46, %v1390_v50 }
 0x1ec   :  { %4403 = vmatprep.subr.bf16.mxu1 %v5795_v0  ;;  %v1401_v50 = vld [vmem:[%s6984_s3 + $0x578] sm:$0xff] }
 0x1ef   :  { %4405 = vmatpush1.bf16.msra.mxu1 %v5810_v8 }
 0x1f0   :  { %4407 = vmatprep.subr.bf16.mxu1 %v5813_v11 }
 0x1f3   :  { %4409 = vmatpush1.bf16.msra.mxu1 %v5828_v18 }
 0x1f4   :  { %4411 = vmatprep.subr.bf16.mxu1 %v5831_v19 }
 0x1f7   :  { %4413 = vmatpush1.bf16.msra.mxu1 %v5846_v26 }
 0x1f8   :  { %4415 = vmatprep.subr.bf16.mxu1 %v5849_v29 }
 0x1fb   :  { %4417 = vmatpush1.bf16.msra.mxu1 %v5864_v7 }
 0x1fc   :  { %4419 = vmatprep.subr.bf16.mxu1 %v5867_v40 }
 0x1ff   :  { %4421 = vmatpush1.bf16.msra.mxu1 %v5882_v48 }
 0x200   :  { %4423 = vmatprep.subr.bf16.mxu1 %v5885_v49 }
 0x203   :  { %4425 = vmatpush1.bf16.msra.mxu1 %v5900_v59 }
 0x204   :  { %4427 = vmatprep.subr.bf16.mxu1 %v5903_v60 }
 0x207   :  { %4429 = vmatpush1.bf16.msra.mxu1 %v5918_v6 }
 0x208   :  { %4431 = vmatprep.subr.bf16.mxu1 %v5921_v10 }
 0x20a   :  { %1570 = vmatmul.mubr.f32.vlgmr.msra.gmra.mrb[8].mxu1 %v1198_v57  ;;  %v5977_v57 = vpack.c.bf16 %v1364_v43, %v1362_v42  ;;  %v1378_v43 = vld [vmem:[%s6984_s3 + $0x4c0] sm:$0xff] }
 0x20b   :  { %4433 = vmatpush1.bf16.msra.mxu1 %v5936_v20  ;;  %1640 = vmatprep.mubr.f32.mxu1 %v4952_v30  ;;  %v1379_v30 = vld [vmem:[%s6984_s3 + $0x4c8] sm:$0xff]  ;;  %v6049_v54 = vpack.c.bf16 %v1380_v51, %v1378_v43  ;;  %v1393_v43 = vld [vmem:[%s6984_s3 + $0x538] sm:$0xff] }
 0x20c   :  { %4435 = vmatprep.subr.bf16.mxu1 %v5939_v22  ;;  %v6034_v42 = vpack.c.bf16 %v1381_v31, %v1379_v30  ;;  %v1388_v30 = vld [vmem:[%s6984_s3 + $0x510] sm:$0xff]  ;;  %v1391_v31 = vld [vmem:[%s6984_s3 + $0x528] sm:$0xff] }
 0x20d   :  { %v6085_v51 = vpack.c.bf16 %v1388_v30, %v1386_v25  ;;  %v6088_v53 = vpack.c.bf16 %v1393_v43, %v1391_v31  ;;  %v6106_v25 = vpack.c.bf16 %v1397_v4, %v1395_v2  ;;  %v1394_v30 = vld [vmem:[%s6984_s3 + $0x540] sm:$0xff]  ;;  %v1396_v31 = vld [vmem:[%s6984_s3 + $0x550] sm:$0xff]  ;;  %v1399_v43 = vld [vmem:[%s6984_s3 + $0x568] sm:$0xff] }
 0x20e   :  { %v6121_v46 = vpack.c.bf16 %v1396_v31, %v1394_v30  ;;  %v6124_v2 = vpack.c.bf16 %v1401_v50, %v1399_v43  ;;  %v1398_v4 = vld [vmem:[%s6984_s3 + $0x560] sm:$0xff]  ;;  %v1405_v30 = vld [vmem:[%s6984_s3 + $0x598] sm:$0xff] }
 0x20f   :  { %4437 = vmatpush1.bf16.msra.mxu1 %v5959_v37  ;;  %7028 = vst [vmem:[#allocation12_spill] sm:$0xff] %v6106_v25  ;;  %v6139_v31 = vpack.c.bf16 %v1400_v5, %v1398_v4  ;;  %v6142_v43 = vpack.c.bf16 %v1405_v30, %v1403_v9  ;;  %v1402_v50 = vld [vmem:[%s6984_s3 + $0x580] sm:$0xff]  ;;  %v1409_v5 = vld [vmem:[%s6984_s3 + $0x5b8] sm:$0xff] }
 0x210   :  { %4439 = vmatprep.subr.bf16.mxu1 %v5962_v41  ;;  %7029 = vst [vmem:[#allocation13_spill] sm:$0xff] %v6121_v46  ;;  %7030 = vst [vmem:[#allocation14_spill] sm:$0xff] %v6124_v2  ;;  %v6157_v9 = vpack.c.bf16 %v1404_v39, %v1402_v50  ;;  %v1406_v30 = vld [vmem:[%s6984_s3 + $0x5a0] sm:$0xff]  ;;  %v1413_v39 = vld [vmem:[%s6984_s3 + $0x5d8] sm:$0xff] }
 0x211   :  { %7031 = vst [vmem:[#allocation15_spill] sm:$0xff] %v6139_v31  ;;  %7032 = vst [vmem:[#allocation16_spill] sm:$0xff] %v6142_v43 }
 0x212   :  { %7033 = vst [vmem:[#allocation17_spill] sm:$0xff] %v6157_v9 }
 0x213   :  { %4441 = vmatpush1.bf16.msra.mxu1 %v5977_v57 }
 0x214   :  { %4443 = vmatprep.subr.bf16.mxu1 %v5980_v44 }
 0x217   :  { %4445 = vmatpush1.bf16.msra.mxu1 %v5995_v61 }
 0x218   :  { %4447 = vmatprep.subr.bf16.mxu1 %v5998_v62 }
 0x21b   :  { %4449 = vmatpush1.bf16.msra.mxu1 %v6013_v16 }
 0x21c   :  { %4451 = vmatprep.subr.bf16.mxu1 %v6016_v17 }
 0x21f   :  { %4453 = vmatpush1.bf16.msra.mxu1 %v6031_v34 }
 0x220   :  { %4455 = vmatprep.subr.bf16.mxu1 %v6034_v42 }
 0x223   :  { %4457 = vmatpush1.bf16.msra.mxu1 %v6049_v54 }
 0x224   :  { %4459 = vmatprep.subr.bf16.mxu1 %v6052_v55 }
 0x227   :  { %4461 = vmatpush1.bf16.msra.mxu1 %v6067_v15 }
 0x228   :  { %4463 = vmatprep.subr.bf16.mxu1 %v6070_v24 }
 0x22b   :  { %4465 = vmatpush1.bf16.msra.mxu1 %v6085_v51 }
 0x22c   :  { %4467 = vmatprep.subr.bf16.mxu1 %v6088_v53 }
 0x22f   :  { %4469 = vmatpush1.bf16.msra.mxu1 %v6103_v13 }
 0x230   :  { %4471 = vmatprep.subr.bf16.mxu1 %v6106_v25  ;;  %v1407_v25 = vld [vmem:[%s6984_s3 + $0x5a8] sm:$0xff] }
 0x231   :  { %v6160_v4 = vpack.c.bf16 %v1409_v5, %v1407_v25  ;;  %v1410_v5 = vld [vmem:[%s6984_s3 + $0x5c0] sm:$0xff] }
 0x233   :  { %4473 = vmatpush1.bf16.msra.mxu1 %v6121_v46  ;;  %7034 = vst [vmem:[#allocation18_spill] sm:$0xff] %v6160_v4  ;;  %v1411_v46 = vld [vmem:[%s6984_s3 + $0x5c8] sm:$0xff] }
 0x234   :  { %4475 = vmatprep.subr.bf16.mxu1 %v6124_v2  ;;  %v1408_v2 = vld [vmem:[%s6984_s3 + $0x5b0] sm:$0xff]  ;;  %v6178_v50 = vpack.c.bf16 %v1413_v39, %v1411_v46  ;;  %v1414_v39 = vld [vmem:[%s6984_s3 + $0x5e0] sm:$0xff] }
 0x235   :  { %v6175_v25 = vpack.c.bf16 %v1408_v2, %v1406_v30  ;;  %v1417_v2 = vld [vmem:[%s6984_s3 + $0x5f8] sm:$0xff] }
 0x236   :  { %7036 = vst [vmem:[#allocation20_spill] sm:$0xff] %v6178_v50 }
 0x237   :  { %4477 = vmatpush1.bf16.msra.mxu1 %v6139_v31  ;;  %7035 = vst [vmem:[#allocation19_spill] sm:$0xff] %v6175_v25  ;;  %v1415_v31 = vld [vmem:[%s6984_s3 + $0x5e8] sm:$0xff] }
 0x238   :  { %4479 = vmatprep.subr.bf16.mxu1 %v6142_v43  ;;  %v1412_v43 = vld [vmem:[%s6984_s3 + $0x5d0] sm:$0xff]  ;;  %v6196_v30 = vpack.c.bf16 %v1417_v2, %v1415_v31  ;;  %v1418_v2 = vld [vmem:[%s6984_s3 + $0x600] sm:$0xff] }
 0x239   :  { %v6193_v46 = vpack.c.bf16 %v1412_v43, %v1410_v5  ;;  %v1421_v43 = vld [vmem:[%s6984_s3 + $0x618] sm:$0xff] }
 0x23a   :  { %7037 = vst [vmem:[#allocation21_spill] sm:$0xff] %v6196_v30 }
 0x23b   :  { %4481 = vmatpush1.bf16.msra.mxu1 %v6157_v9  ;;  %v1419_v9 = vld [vmem:[%s6984_s3 + $0x608] sm:$0xff] }
 0x23c   :  { %4483 = vmatprep.subr.bf16.mxu1 %v6160_v4  ;;  %v1416_v4 = vld [vmem:[%s6984_s3 + $0x5f0] sm:$0xff]  ;;  %v6214_v5 = vpack.c.bf16 %v1421_v43, %v1419_v9 }
 0x23d   :  { %v6211_v31 = vpack.c.bf16 %v1416_v4, %v1414_v39  ;;  %v7040_v4 = vcombine.low %v5618_v32, %v5626_v36  ;;  %v6230_v9 = vld [vmem:[#allocation4] sm:$0xff]  ;;  %v7041_v39 = vmov 0.0|0.0  }
 0x23e   :  { %7039 = vst [vmem:[#allocation23_spill] sm:$0xff] %v6214_v5  ;;  %1221 = vst.msk [vmem:[#allocation4 + $0x8] sm:$0xff] %vm1220_vm9, %v6230_v9  ;;  %vm7023_vm9 = vcmask 932864  }
 0x23f   :  { %4485 = vmatpush1.bf16.msra.mxu1 %v6175_v25  ;;  %7038 = vst [vmem:[#allocation22_spill] sm:$0xff] %v6211_v31 }
 0x240   :  { %4487 = vmatprep.subr.bf16.mxu1 %v6178_v50  ;;  %v1420_v50 = vld [vmem:[%s6984_s3 + $0x610] sm:$0xff]  ;;  %s5007_s3 = smov 115  }
 0x241   :  { %v6223_v25 = vpack.c.bf16 %v1420_v50, %v1418_v2 }
 0x243   :  { %4489 = vmatpush1.bf16.msra.mxu1 %v6193_v46 }
 0x244   :  { %4491 = vmatprep.subr.bf16.mxu1 %v6196_v30 }
 0x247   :  { %4493 = vmatpush1.bf16.msra.mxu1 %v6211_v31 }
 0x248   :  { %4495 = vmatprep.subr.bf16.mxu1 %v6214_v5  ;;  %v1225_v5 = vld [vmem:[#allocation3 + $0x18] sm:$0xf] }
 0x24a   :  { %1641 = vmatmul.mubr.f32.vlgmr.msra.gmra.mrb[8].mxu1 %v7040_v4 }
 0x24b   :  { %4497 = vmatpush1.bf16.msra.mxu1 %v6223_v25  ;;  %1711 = vmatprep.mubr.f32.mxu1 %v6230_v9 }
 0x24c   :  { %4742 = vmatprep.subr.bf16.mxu1 %v7041_v39 }
 0x24d   :  { %v4899_v43 = vpop.permute.xlu1 %4898 }
 0x24e   :  { %v4901_v30 = vunpack.i.h.bf16 %v4899_v43  ;;  %v4900_v31 = vunpack.i.l.bf16 %v4899_v43 }
 0x250   :  { %v1948_v50 = vsel %vm7020_vm13, %v4900_v31, %v4901_v30 }
 0x251   :  { %v1933_v2 = vpop.permute.xlu1 %1932  ;;  %2025 = vmatprep.mubr.f32.mxu0 %v1948_v50 }
 0x252   :  { %v1947_v32 = vsel %vm7020_vm13, %v1933_v2, %v4900_v31  ;;  %4139 = vmatmul.mubr.msk.f32.vlgmr.msra.gmra.mrb[8].mxu1 %vm7009_vm12, %v1225_v5 }
 0x253   :  { %2026 = vmatmul.mubr.f32.vlgmr.msra.gmra.mrb[6].mxu0 %v1947_v32 }
 0x254   :  { %4565 = vmatpush1.bf16.msra.mxu0 %v5628_v38 }
 0x255   :  { %v6237_v36 = vpop.permute.xlu0 %4903  ;;  %4567 = vmatprep.subr.bf16.mxu0 %v5635_v28 }
 0x256   :  { %v4906_v4 = vunpack.i.h.bf16 %v6237_v36  ;;  %v4905_v39 = vunpack.i.l.bf16 %v6237_v36  ;;  %v1943_v28 = vpop.permute.xlu1 %1942 }
 0x258   :  { %v1950_v43 = vsel %vm7020_vm13, %v4905_v39, %v4906_v4  ;;  %4569 = vmatpush1.bf16.msra.mxu0 %v5652_v52  ;;  %v1949_v52 = vsel %vm7020_vm13, %v4901_v30, %v4905_v39 }
 0x259   :  { %2096 = vmatprep.mubr.f32.mxu0 %v1950_v43  ;;  %4571 = vmatprep.subr.bf16.mxu0 %v5657_v27  ;;  %v1945_v38 = vpop.permute.xlu0 %1944 }
 0x25a   :  { %v1952_v27 = vsel %vm7020_vm13, %v1943_v28, %v1945_v38 }
 0x25c   :  { %4573 = vmatpush1.bf16.msra.mxu0 %v5677_v1  ;;  %v7042_v1 = vld [vmem:[#allocation12_spill] sm:$0xff] }
 0x25d   :  { %4575 = vmatprep.subr.bf16.mxu0 %v5681_v3  ;;  %v7043_v3 = vld [vmem:[#allocation13_spill] sm:$0xff] }
 0x260   :  { %4577 = vmatpush1.bf16.msra.mxu0 %v5696_v12  ;;  %v7044_v12 = vld [vmem:[#allocation14_spill] sm:$0xff] }
 0x261   :  { %4579 = vmatprep.subr.bf16.mxu0 %v5699_v14  ;;  %v7045_v14 = vld [vmem:[#allocation15_spill] sm:$0xff] }
 0x264   :  { %4581 = vmatpush1.bf16.msra.mxu0 %v5715_v21  ;;  %v7046_v21 = vld [vmem:[#allocation16_spill] sm:$0xff] }
 0x265   :  { %4583 = vmatprep.subr.bf16.mxu0 %v5718_v23  ;;  %v7047_v23 = vld [vmem:[#allocation17_spill] sm:$0xff] }
 0x268   :  { %4585 = vmatpush1.bf16.msra.mxu0 %v5734_v33  ;;  %v7048_v33 = vld [vmem:[#allocation18_spill] sm:$0xff] }
 0x269   :  { %4587 = vmatprep.subr.bf16.mxu0 %v5737_v35  ;;  %v7049_v35 = vld [vmem:[#allocation19_spill] sm:$0xff] }
 0x26c   :  { %4589 = vmatpush1.bf16.msra.mxu0 %v5753_v45  ;;  %v7050_v45 = vld [vmem:[#allocation20_spill] sm:$0xff] }
 0x26d   :  { %4591 = vmatprep.subr.bf16.mxu0 %v5756_v47  ;;  %v7051_v47 = vld [vmem:[#allocation21_spill] sm:$0xff] }
 0x270   :  { %4593 = vmatpush1.bf16.msra.mxu0 %v5773_v56  ;;  %v7052_v56 = vld [vmem:[#allocation22_spill] sm:$0xff] }
 0x271   :  { %4595 = vmatprep.subr.bf16.mxu0 %v5776_v58  ;;  %v7053_v58 = vld [vmem:[#allocation23_spill] sm:$0xff] }
 0x274   :  { %4597 = vmatpush1.bf16.msra.mxu0 %v5792_v63  ;;  %v1951_v63 = vsel %vm7020_vm13, %v4906_v4, %v1943_v28 }
 0x275   :  { %4599 = vmatprep.subr.bf16.mxu0 %v5795_v0 }
 0x278   :  { %4601 = vmatpush1.bf16.msra.mxu0 %v5810_v8 }
 0x279   :  { %4603 = vmatprep.subr.bf16.mxu0 %v5813_v11 }
 0x27c   :  { %4605 = vmatpush1.bf16.msra.mxu0 %v5828_v18 }
 0x27d   :  { %4607 = vmatprep.subr.bf16.mxu0 %v5831_v19 }
 0x280   :  { %4609 = vmatpush1.bf16.msra.mxu0 %v5846_v26 }
 0x281   :  { %4611 = vmatprep.subr.bf16.mxu0 %v5849_v29 }
 0x284   :  { %4613 = vmatpush1.bf16.msra.mxu0 %v5864_v7 }
 0x285   :  { %4615 = vmatprep.subr.bf16.mxu0 %v5867_v40 }
 0x288   :  { %4617 = vmatpush1.bf16.msra.mxu0 %v5882_v48 }
 0x289   :  { %4619 = vmatprep.subr.bf16.mxu0 %v5885_v49 }
 0x28c   :  { %4621 = vmatpush1.bf16.msra.mxu0 %v5900_v59 }
 0x28d   :  { %4623 = vmatprep.subr.bf16.mxu0 %v5903_v60 }
 0x290   :  { %4625 = vmatpush1.bf16.msra.mxu0 %v5918_v6 }
 0x291   :  { %4627 = vmatprep.subr.bf16.mxu0 %v5921_v10 }
 0x293   :  { %2097 = vmatmul.mubr.f32.vlgmr.msra.gmra.mrb[6].mxu0 %v1949_v52 }
 0x294   :  { %4629 = vmatpush1.bf16.msra.mxu0 %v5936_v20  ;;  %2167 = vmatprep.mubr.f32.mxu0 %v1952_v27 }
 0x295   :  { %4631 = vmatprep.subr.bf16.mxu0 %v5939_v22 }
 0x298   :  { %4633 = vmatpush1.bf16.msra.mxu0 %v5959_v37 }
 0x299   :  { %4635 = vmatprep.subr.bf16.mxu0 %v5962_v41 }
 0x29c   :  { %4637 = vmatpush1.bf16.msra.mxu0 %v5977_v57 }
 0x29d   :  { %4639 = vmatprep.subr.bf16.mxu0 %v5980_v44 }
 0x2a0   :  { %4641 = vmatpush1.bf16.msra.mxu0 %v5995_v61 }
 0x2a1   :  { %4643 = vmatprep.subr.bf16.mxu0 %v5998_v62 }
 0x2a4   :  { %4645 = vmatpush1.bf16.msra.mxu0 %v6013_v16 }
 0x2a5   :  { %4647 = vmatprep.subr.bf16.mxu0 %v6016_v17 }
 0x2a8   :  { %4649 = vmatpush1.bf16.msra.mxu0 %v6031_v34 }
 0x2a9   :  { %4651 = vmatprep.subr.bf16.mxu0 %v6034_v42 }
 0x2ac   :  { %4653 = vmatpush1.bf16.msra.mxu0 %v6049_v54 }
 0x2ad   :  { %4655 = vmatprep.subr.bf16.mxu0 %v6052_v55 }
 0x2b0   :  { %4657 = vmatpush1.bf16.msra.mxu0 %v6067_v15  ;;  %v7054_v15 = vlaneseq }
 0x2b1   :  { %4659 = vmatprep.subr.bf16.mxu0 %v6070_v24 }
 0x2b2   :  { %vm6343_vm2 = vcmp.lt.s32.totalorder %v7054_v15, 288 }
 0x2b4   :  { %4661 = vmatpush1.bf16.msra.mxu0 %v6085_v51 }
 0x2b5   :  { %4663 = vmatprep.subr.bf16.mxu0 %v6088_v53 }
 0x2b8   :  { %4665 = vmatpush1.bf16.msra.mxu0 %v6103_v13 }
 0x2b9   :  { %4667 = vmatprep.subr.bf16.mxu0 %v7042_v1 }
 0x2bc   :  { %4669 = vmatpush1.bf16.msra.mxu0 %v7043_v3 }
 0x2bd   :  { %4671 = vmatprep.subr.bf16.mxu0 %v7044_v12 }
 0x2c0   :  { %4673 = vmatpush1.bf16.msra.mxu0 %v7045_v14 }
 0x2c1   :  { %4675 = vmatprep.subr.bf16.mxu0 %v7046_v21 }
 0x2c4   :  { %4677 = vmatpush1.bf16.msra.mxu0 %v7047_v23 }
 0x2c5   :  { %4679 = vmatprep.subr.bf16.mxu0 %v7048_v33 }
 0x2c8   :  { %4681 = vmatpush1.bf16.msra.mxu0 %v7049_v35 }
 0x2c9   :  { %4683 = vmatprep.subr.bf16.mxu0 %v7050_v45 }
 0x2cc   :  { %4685 = vmatpush1.bf16.msra.mxu0 %v6193_v46 }
 0x2cd   :  { %4687 = vmatprep.subr.bf16.mxu0 %v7051_v47 }
 0x2d0   :  { %4689 = vmatpush1.bf16.msra.mxu0 %v7052_v56 }
 0x2d1   :  { %4691 = vmatprep.subr.bf16.mxu0 %v7053_v58 }
 0x2d3   :  { %2168 = vmatmul.mubr.f32.vlgmr.msra.gmra.mrb[6].mxu0 %v1951_v63 }
 0x2d4   :  { %4693 = vmatpush1.bf16.msra.mxu0 %v6223_v25  ;;  %2238 = vmatprep.mubr.f32.mxu0 %v6230_v9 }
 0x2db   :  { %4140 = vmatmul.mubr.msk.f32.vlgmr.msra.gmra.mrb[6].mxu0 %vm7009_vm12, %v1945_v38 }
 0x2dc   :  { %3386 = vmatprep.mubr.f32.mxu0 %v6230_v9 }
 0x325   :  { %v1713_v0 = vpop.f32.mrb[8].mxu1 }
 0x326   :  { %v1715_v8 = vpop.f32.mrb[9].mxu1 }
 0x327   :  { %v1720_v11 = vcombine.low %v1713_v0, %v1715_v8 }
 0x329   :  { %1724 = vst.msk [vmem:[#allocation4] sm:$0xff] %vm1723_vm7, %v1720_v11  ;;  %vm2306_vm7 = vcmask 949248  }
 0x3ae   :  { %v2240_v18 = vpop.f32.mrb[6].mxu0 }
 0x3af   :  { %v2242_v19 = vpop.f32.mrb[7].mxu0 }
 0x3b0   :  { %v2247_v26 = vcombine.low %v2240_v18, %v2242_v19 }
 0x3b2   :  { %2248 = vrot.lane.b32.xlu1 %v2247_v26, %s4996_s25 }
 0x424   :  { %v2249_v29 = vpop.permute.xlu1 %2248 }
 0x425   :  { %v2250_v7 = vrot.slane %v2249_v29, 4 }
 0x427   :  { %v2251_v40 = vsel %vm7009_vm12, %v2250_v7, %v2249_v29  ;;  %vm7012_vm12 = vcmask 826368  }
 0x428   :  { %2255 = vst.msk [vmem:[#allocation4 + $0x4] sm:$0xff] %vm2254_vm0, %v2251_v40  ;;  %vm7021_vm0 = vcmask 834560  }
 0x42f   :  { %v2271_v48 = vld [vmem:[#allocation4] ss:$4 sm:$0x7]  ;;  %v2534_v30 = vld [vmem:[#allocation4 + $0x1] ss:$4 sm:$0x7] }
 0x430   :  { %v2261_v49 = vld [vmem:[#allocation4] ss:$4 sm:$0x7]  ;;  %2273 = vrot.lane.b32.xlu1 %v2271_v48, %s4977_s11  ;;  %v2524_v31 = vld [vmem:[#allocation4 + $0x1] ss:$4 sm:$0x7] }
 0x431   :  { %2263 = vrot.lane.b32.xlu0 %v2261_v49, %s4978_s12  ;;  %v2291_v59 = vld [vmem:[#allocation4] ss:$4 sm:$0x7]  ;;  %v2520_v5 = vld [vmem:[#allocation4 + $0x1] ss:$4 sm:$0x7] }
 0x432   :  { %v2281_v60 = vld [vmem:[#allocation4] ss:$4 sm:$0x7]  ;;  %v2554_v39 = vld [vmem:[#allocation4 + $0x1] ss:$4 sm:$0x7] }
 0x433   :  { %v2312_v6 = vld [vmem:[#allocation4] ss:$4 sm:$0x7]  ;;  %2522 = vst.msk [vmem:[#allocation5 + $0x49] ss:$8 sm:$0x7] %vm6343_vm2, %v2520_v5 }
 0x434   :  { %2293 = vrot.lane.b32.xlu1 %v2291_v59, %s4980_s22  ;;  %v2301_v10 = vld [vmem:[#allocation4] ss:$4 sm:$0x7]  ;;  %v2765_v50 = vld [vmem:[#allocation4 + $0x2] ss:$4 sm:$0x7] }
 0x435   :  { %2283 = vrot.lane.b32.xlu0 %v2281_v60, %s4979_s19  ;;  %v2334_v20 = vld [vmem:[#allocation4] ss:$4 sm:$0x7]  ;;  %v2544_v2 = vld [vmem:[#allocation4 + $0x1] ss:$4 sm:$0x7] }
 0x436   :  { %v2323_v22 = vld [vmem:[#allocation4] ss:$4 sm:$0x7]  ;;  %2767 = vst.msk [vmem:[#allocation5 + $0x92] ss:$8 sm:$0x7] %vm6343_vm2, %v2765_v50 }
 0x437   :  { %v2355_v37 = vld [vmem:[#allocation4] ss:$4 sm:$0x7]  ;;  %v3010_v32 = vld [vmem:[#allocation4 + $0x3] ss:$4 sm:$0x7] }
 0x438   :  { %2314 = vrot.lane.b32.xlu1 %v2312_v6, %s5007_s3  ;;  %v2345_v41 = vld [vmem:[#allocation4] ss:$4 sm:$0x7]  ;;  %3012 = vst.msk [vmem:[#allocation5 + $0xdb] ss:$8 sm:$0x7] %vm6343_vm2, %v3010_v32 }
 0x439   :  { %2303 = vrot.lane.b32.xlu0 %v2301_v10, %s5008_s2  ;;  %v2377_v57 = vld [vmem:[#allocation4] ss:$4 sm:$0x7]  ;;  %v2574_v36 = vld [vmem:[#allocation4 + $0x1] ss:$4 sm:$0x7] }
 0x43a   :  { %v2366_v44 = vld [vmem:[#allocation4] ss:$4 sm:$0x7]  ;;  %v2564_v4 = vld [vmem:[#allocation4 + $0x1] ss:$4 sm:$0x7] }
 0x43b   :  { %v2399_v61 = vld [vmem:[#allocation4] ss:$4 sm:$0x7]  ;;  %v2594_v43 = vld [vmem:[#allocation4 + $0x1] ss:$4 sm:$0x7] }
 0x43c   :  { %2336 = vrot.lane.b32.xlu1 %v2334_v20, %s5009_s24  ;;  %v2388_v62 = vld [vmem:[#allocation4] ss:$4 sm:$0x7]  ;;  %v2584_v38 = vld [vmem:[#allocation4 + $0x1] ss:$4 sm:$0x7] }
 0x43d   :  { %2325 = vrot.lane.b32.xlu0 %v2323_v22, %s5010_s1  ;;  %v2420_v16 = vld [vmem:[#allocation4] ss:$4 sm:$0x7]  ;;  %v2614_v28 = vld [vmem:[#allocation4 + $0x1] ss:$4 sm:$0x7] }
 0x43e   :  { %v2409_v17 = vld [vmem:[#allocation4] ss:$4 sm:$0x7]  ;;  %v2604_v52 = vld [vmem:[#allocation4 + $0x1] ss:$4 sm:$0x7] }
 0x43f   :  { %v2442_v34 = vld [vmem:[#allocation4] ss:$4 sm:$0x7]  ;;  %v2634_v27 = vld [vmem:[#allocation4 + $0x1] ss:$4 sm:$0x7] }
 0x440   :  { %2357 = vrot.lane.b32.xlu1 %v2355_v37, %s5011_s26  ;;  %v2431_v42 = vld [vmem:[#allocation4] ss:$4 sm:$0x7]  ;;  %v2624_v1 = vld [vmem:[#allocation4 + $0x1] ss:$4 sm:$0x7] }
 0x441   :  { %2347 = vrot.lane.b32.xlu0 %v2345_v41, %s5006_s17  ;;  %v2464_v54 = vld [vmem:[#allocation4] ss:$4 sm:$0x7]  ;;  %v2654_v3 = vld [vmem:[#allocation4 + $0x1] ss:$4 sm:$0x7] }
 0x442   :  { %v2453_v55 = vld [vmem:[#allocation4] ss:$4 sm:$0x7]  ;;  %v2644_v12 = vld [vmem:[#allocation4 + $0x1] ss:$4 sm:$0x7] }
 0x443   :  { %v2486_v51 = vld [vmem:[#allocation4] ss:$4 sm:$0x7]  ;;  %v2674_v14 = vld [vmem:[#allocation4 + $0x1] ss:$4 sm:$0x7] }
 0x444   :  { %2379 = vrot.lane.b32.xlu1 %v2377_v57, %s5012_s28  ;;  %v2475_v53 = vld [vmem:[#allocation4] ss:$4 sm:$0x7]  ;;  %v2664_v21 = vld [vmem:[#allocation4 + $0x1] ss:$4 sm:$0x7] }
 0x445   :  { %2368 = vrot.lane.b32.xlu0 %v2366_v44, %s5013_s29  ;;  %v2256_v13 = vld [vmem:[#allocation4] ss:$4 sm:$0x7]  ;;  %v2694_v23 = vld [vmem:[#allocation4 + $0x1] ss:$4 sm:$0x7] }
 0x446   :  { %2259 = vst.msk [vmem:[#allocation5] ss:$8 sm:$0x7] %vm6343_vm2, %v2256_v13  ;;  %v2508_v25 = vld [vmem:[#allocation4] ss:$4 sm:$0x7] }
 0x447   :  { %v2497_v46 = vld [vmem:[#allocation4] ss:$4 sm:$0x7]  ;;  %v2684_v33 = vld [vmem:[#allocation4 + $0x1] ss:$4 sm:$0x7] }
 0x448   :  { %2401 = vrot.lane.b32.xlu1 %v2399_v61, %s4981_s27  ;;  %v2714_v35 = vld [vmem:[#allocation4 + $0x1] ss:$4 sm:$0x7]  ;;  %v2779_v0 = vld [vmem:[#allocation4 + $0x2] ss:$4 sm:$0x7] }
 0x449   :  { %2390 = vrot.lane.b32.xlu0 %v2388_v62, %s5014_s30  ;;  %v2704_v45 = vld [vmem:[#allocation4 + $0x1] ss:$4 sm:$0x7]  ;;  %v2769_v8 = vld [vmem:[#allocation4 + $0x2] ss:$4 sm:$0x7] }
 0x44a   :  { %v2734_v47 = vld [vmem:[#allocation4 + $0x1] ss:$4 sm:$0x7]  ;;  %v2799_v11 = vld [vmem:[#allocation4 + $0x2] ss:$4 sm:$0x7] }
 0x44b   :  { %v2724_v56 = vld [vmem:[#allocation4 + $0x1] ss:$4 sm:$0x7]  ;;  %v2789_v18 = vld [vmem:[#allocation4 + $0x2] ss:$4 sm:$0x7] }
 0x44c   :  { %2422 = vrot.lane.b32.xlu1 %v2420_v16, %s5015_s10  ;;  %v2754_v58 = vld [vmem:[#allocation4 + $0x1] ss:$4 sm:$0x7]  ;;  %v2819_v19 = vld [vmem:[#allocation4 + $0x2] ss:$4 sm:$0x7] }
 0x44d   :  { %2411 = vrot.lane.b32.xlu0 %v2409_v17, %s5016_s13  ;;  %v2744_v63 = vld [vmem:[#allocation4 + $0x1] ss:$4 sm:$0x7]  ;;  %v2809_v26 = vld [vmem:[#allocation4 + $0x2] ss:$4 sm:$0x7] }
 0x44e   :  { %v2839_v29 = vld [vmem:[#allocation4 + $0x2] ss:$4 sm:$0x7] }
 0x44f   :  { %v2829_v7 = vld [vmem:[#allocation4 + $0x2] ss:$4 sm:$0x7] }
 0x450   :  { %2444 = vrot.lane.b32.xlu1 %v2442_v34, %s5017_s14  ;;  %v2859_v40 = vld [vmem:[#allocation4 + $0x2] ss:$4 sm:$0x7] }
 0x451   :  { %2433 = vrot.lane.b32.xlu0 %v2431_v42, %s5018_s15  ;;  %v2849_v48 = vld [vmem:[#allocation4 + $0x2] ss:$4 sm:$0x7] }
 0x452   :  { %v2879_v60 = vld [vmem:[#allocation4 + $0x2] ss:$4 sm:$0x7] }
 0x453   :  { %v2869_v20 = vld [vmem:[#allocation4 + $0x2] ss:$4 sm:$0x7] }
 0x454   :  { %2466 = vrot.lane.b32.xlu1 %v2464_v54, %s5019_s16  ;;  %v2899_v44 = vld [vmem:[#allocation4 + $0x2] ss:$4 sm:$0x7] }
 0x455   :  { %2455 = vrot.lane.b32.xlu0 %v2453_v55, %s5020_s18  ;;  %v2889_v16 = vld [vmem:[#allocation4 + $0x2] ss:$4 sm:$0x7] }
 0x456   :  { %v2919_v55 = vld [vmem:[#allocation4 + $0x2] ss:$4 sm:$0x7] }
 0x457   :  { %v2929_v50 = vld [vmem:[#allocation4 + $0x2] ss:$4 sm:$0x7] }
 0x458   :  { %2488 = vrot.lane.b32.xlu1 %v2486_v51, %s5021_s20 }
 0x459   :  { %2477 = vrot.lane.b32.xlu0 %v2475_v53, %s5022_s0  ;;  %v2909_v53 = vld [vmem:[#allocation4 + $0x2] ss:$4 sm:$0x7] }
 0x45c   :  { %2510 = vrot.lane.b32.xlu1 %v2508_v25, %s5023_s23 }
 0x45d   :  { %2499 = vrot.lane.b32.xlu0 %v2497_v46, %s5024_s21 }
 0x460   :  { %2536 = vrot.lane.b32.xlu1 %v2534_v30, %s4977_s11 }
 0x461   :  { %2526 = vrot.lane.b32.xlu0 %v2524_v31, %s4978_s12  ;;  %v2939_v31 = vld [vmem:[#allocation4 + $0x2] ss:$4 sm:$0x7] }
 0x464   :  { %2556 = vrot.lane.b32.xlu1 %v2554_v39, %s4980_s22 }
 0x465   :  { %2546 = vrot.lane.b32.xlu0 %v2544_v2, %s4979_s19 }
 0x468   :  { %2576 = vrot.lane.b32.xlu1 %v2574_v36, %s5007_s3 }
 0x469   :  { %2566 = vrot.lane.b32.xlu0 %v2564_v4, %s5008_s2 }
 0x46c   :  { %2596 = vrot.lane.b32.xlu1 %v2594_v43, %s5009_s24  ;;  %v2959_v43 = vld [vmem:[#allocation4 + $0x2] ss:$4 sm:$0x7] }
 0x46d   :  { %2586 = vrot.lane.b32.xlu0 %v2584_v38, %s5010_s1 }
 0x470   :  { %2616 = vrot.lane.b32.xlu1 %v2614_v28, %s5011_s26 }
 0x471   :  { %2606 = vrot.lane.b32.xlu0 %v2604_v52, %s5006_s17  ;;  %v2949_v52 = vld [vmem:[#allocation4 + $0x2] ss:$4 sm:$0x7] }
 0x474   :  { %2636 = vrot.lane.b32.xlu1 %v2634_v27, %s5012_s28 }
 0x475   :  { %2626 = vrot.lane.b32.xlu0 %v2624_v1, %s5013_s29 }
 0x478   :  { %2656 = vrot.lane.b32.xlu1 %v2654_v3, %s4981_s27 }
 0x479   :  { %2646 = vrot.lane.b32.xlu0 %v2644_v12, %s5014_s30 }
 0x47c   :  { %2676 = vrot.lane.b32.xlu1 %v2674_v14, %s5015_s10  ;;  %v2979_v14 = vld [vmem:[#allocation4 + $0x2] ss:$4 sm:$0x7] }
 0x47d   :  { %2666 = vrot.lane.b32.xlu0 %v2664_v21, %s5016_s13 }
 0x480   :  { %2696 = vrot.lane.b32.xlu1 %v2694_v23, %s5017_s14 }
 0x481   :  { %2686 = vrot.lane.b32.xlu0 %v2684_v33, %s5018_s15  ;;  %v2969_v33 = vld [vmem:[#allocation4 + $0x2] ss:$4 sm:$0x7] }
 0x484   :  { %2716 = vrot.lane.b32.xlu1 %v2714_v35, %s5019_s16 }
 0x485   :  { %2706 = vrot.lane.b32.xlu0 %v2704_v45, %s5020_s18 }
 0x488   :  { %2736 = vrot.lane.b32.xlu1 %v2734_v47, %s5021_s20 }
 0x489   :  { %2726 = vrot.lane.b32.xlu0 %v2724_v56, %s5022_s0 }
 0x48c   :  { %2756 = vrot.lane.b32.xlu1 %v2754_v58, %s5023_s23  ;;  %v2999_v58 = vld [vmem:[#allocation4 + $0x2] ss:$4 sm:$0x7] }
 0x48d   :  { %2746 = vrot.lane.b32.xlu0 %v2744_v63, %s5024_s21 }
 0x490   :  { %2781 = vrot.lane.b32.xlu1 %v2779_v0, %s4977_s11 }
 0x491   :  { %2771 = vrot.lane.b32.xlu0 %v2769_v8, %s4978_s12  ;;  %v2989_v8 = vld [vmem:[#allocation4 + $0x2] ss:$4 sm:$0x7] }
 0x494   :  { %2801 = vrot.lane.b32.xlu1 %v2799_v11, %s4980_s22 }
 0x495   :  { %2791 = vrot.lane.b32.xlu0 %v2789_v18, %s4979_s19 }
 0x498   :  { %2821 = vrot.lane.b32.xlu1 %v2819_v19, %s5007_s3 }
 0x499   :  { %2811 = vrot.lane.b32.xlu0 %v2809_v26, %s5008_s2 }
 0x49c   :  { %2841 = vrot.lane.b32.xlu1 %v2839_v29, %s5009_s24  ;;  %v3024_v29 = vld [vmem:[#allocation4 + $0x3] ss:$4 sm:$0x7] }
 0x49d   :  { %2831 = vrot.lane.b32.xlu0 %v2829_v7, %s5010_s1 }
 0x4a0   :  { %2861 = vrot.lane.b32.xlu1 %v2859_v40, %s5011_s26 }
 0x4a1   :  { %2851 = vrot.lane.b32.xlu0 %v2849_v48, %s5006_s17  ;;  %v3014_v48 = vld [vmem:[#allocation4 + $0x3] ss:$4 sm:$0x7] }
 0x4a2   :  { %v2274_v49 = vpop.permute.xlu1 %2273 }
 0x4a3   :  { %v2264_v59 = vpop.permute.xlu0 %2263  ;;  %v2275_v6 = vrot.slane %v2274_v49, 1 }
 0x4a4   :  { %v2265_v10 = vrot.slane %v2264_v59, 1  ;;  %2881 = vrot.lane.b32.xlu1 %v2879_v60, %s5012_s28 }
 0x4a5   :  { %2871 = vrot.lane.b32.xlu0 %v2869_v20, %s5013_s29  ;;  %v2276_v22 = vsel %vm78_vm1, %v2274_v49, %v2275_v6 }
 0x4a6   :  { %v2266_v37 = vsel %vm56_vm3, %v2264_v59, %v2265_v10  ;;  %2279 = vst.msk [vmem:[#allocation5 + $0x2] ss:$8 sm:$0x7] %vm6343_vm2, %v2276_v22  ;;  %v2294_v41 = vpop.permute.xlu1 %2293  ;;  %v3044_v10 = vld [vmem:[#allocation4 + $0x3] ss:$4 sm:$0x7] }
 0x4a7   :  { %2269 = vst.msk [vmem:[#allocation5 + $0x1] ss:$8 sm:$0x7] %vm6343_vm2, %v2266_v37  ;;  %v2284_v57 = vpop.permute.xlu0 %2283  ;;  %v2295_v61 = vrot.slane %v2294_v41, 1 }
 0x4a8   :  { %v2285_v62 = vrot.slane %v2284_v57, 1  ;;  %2901 = vrot.lane.b32.xlu1 %v2899_v44, %s4981_s27  ;;  %v3034_v37 = vld [vmem:[#allocation4 + $0x3] ss:$4 sm:$0x7] }
 0x4a9   :  { %2891 = vrot.lane.b32.xlu0 %v2889_v16, %s5014_s30  ;;  %v2296_v17 = vsel %vm122_vm5, %v2294_v41, %v2295_v61 }
 0x4aa   :  { %v2286_v34 = vsel %vm100_vm4, %v2284_v57, %v2285_v62  ;;  %2299 = vst.msk [vmem:[#allocation5 + $0x4] ss:$8 sm:$0x7] %vm6343_vm2, %v2296_v17  ;;  %v2315_v42 = vpop.permute.xlu1 %2314  ;;  %v3064_v62 = vld [vmem:[#allocation4 + $0x3] ss:$4 sm:$0x7] }
 0x4ab   :  { %2289 = vst.msk [vmem:[#allocation5 + $0x3] ss:$8 sm:$0x7] %vm6343_vm2, %v2286_v34  ;;  %v2304_v54 = vpop.permute.xlu0 %2303  ;;  %v2316_v15 = vrot.slane %v2315_v42, 1 }
 0x4ac   :  { %v2305_v51 = vrot.slane %v2304_v54, 1  ;;  %2921 = vrot.lane.b32.xlu1 %v2919_v55, %s5015_s10  ;;  %v3054_v34 = vld [vmem:[#allocation4 + $0x3] ss:$4 sm:$0x7] }
 0x4ad   :  { %2911 = vrot.lane.b32.xlu0 %v2909_v53, %s5016_s13  ;;  %v2318_v13 = vsel %vm2317_vm15, %v2315_v42, %v2316_v15 }
 0x4ae   :  { %v2307_v25 = vsel %vm2306_vm7, %v2304_v54, %v2305_v51  ;;  %2321 = vst.msk [vmem:[#allocation5 + $0x6] ss:$8 sm:$0x7] %vm6343_vm2, %v2318_v13  ;;  %v2337_v46 = vpop.permute.xlu1 %2336 }
 0x4af   :  { %2310 = vst.msk [vmem:[#allocation5 + $0x5] ss:$8 sm:$0x7] %vm6343_vm2, %v2307_v25  ;;  %v2326_v30 = vpop.permute.xlu0 %2325  ;;  %v2338_v5 = vrot.slane %v2337_v46, 1 }
 0x4b0   :  { %v2327_v39 = vrot.slane %v2326_v30, 1  ;;  %2941 = vrot.lane.b32.xlu1 %v2939_v31, %s5017_s14 }
 0x4b1   :  { %2931 = vrot.lane.b32.xlu0 %v2929_v50, %s5018_s15  ;;  %v2340_v2 = vsel %vm2339_vm8, %v2337_v46, %v2338_v5  ;;  %v3084_v46 = vld [vmem:[#allocation4 + $0x3] ss:$4 sm:$0x7] }
 0x4b2   :  { %v2329_v32 = vsel %vm7023_vm9, %v2326_v30, %v2327_v39  ;;  %2343 = vst.msk [vmem:[#allocation5 + $0x18] ss:$8 sm:$0x7] %vm6343_vm2, %v2340_v2  ;;  %v2358_v36 = vpop.permute.xlu1 %2357  ;;  %v3074_v50 = vld [vmem:[#allocation4 + $0x3] ss:$4 sm:$0x7] }
 0x4b3   :  { %2332 = vst.msk [vmem:[#allocation5 + $0x7] ss:$8 sm:$0x7] %vm6343_vm2, %v2329_v32  ;;  %v2348_v4 = vpop.permute.xlu0 %2347  ;;  %v2359_v38 = vrot.slane %v2358_v36, 1 }
 0x4b4   :  { %v2349_v28 = vrot.slane %v2348_v4, 1  ;;  %2961 = vrot.lane.b32.xlu1 %v2959_v43, %s5019_s16  ;;  %v3104_v43 = vld [vmem:[#allocation4 + $0x3] ss:$4 sm:$0x7] }
 0x4b5   :  { %2951 = vrot.lane.b32.xlu0 %v2949_v52, %s5020_s18  ;;  %v2361_v27 = vsel %vm7022_vm10, %v2358_v36, %v2359_v38  ;;  %v3094_v52 = vld [vmem:[#allocation4 + $0x3] ss:$4 sm:$0x7] }
 0x4b6   :  { %v2350_v1 = vsel %vm7020_vm13, %v2348_v4, %v2349_v28  ;;  %2364 = vst.msk [vmem:[#allocation5 + $0x1a] ss:$8 sm:$0x7] %vm6343_vm2, %v2361_v27  ;;  %v2380_v3 = vpop.permute.xlu1 %2379 }
 0x4b7   :  { %2353 = vst.msk [vmem:[#allocation5 + $0x19] ss:$8 sm:$0x7] %vm6343_vm2, %v2350_v1  ;;  %v2369_v12 = vpop.permute.xlu0 %2368  ;;  %v2381_v21 = vrot.slane %v2380_v3, 1 }
 0x4b8   :  { %v2370_v23 = vrot.slane %v2369_v12, 1  ;;  %2981 = vrot.lane.b32.xlu1 %v2979_v14, %s5021_s20  ;;  %v3124_v14 = vld [vmem:[#allocation4 + $0x3] ss:$4 sm:$0x7] }
 0x4b9   :  { %2971 = vrot.lane.b32.xlu0 %v2969_v33, %s5022_s0  ;;  %v2383_v35 = vsel %vm7021_vm0, %v2380_v3, %v2381_v21  ;;  %v3114_v33 = vld [vmem:[#allocation4 + $0x3] ss:$4 sm:$0x7] }
 0x4ba   :  { %v2372_v45 = vsel %vm7011_vm11, %v2369_v12, %v2370_v23  ;;  %2386 = vst.msk [vmem:[#allocation5 + $0x1c] ss:$8 sm:$0x7] %vm6343_vm2, %v2383_v35  ;;  %v2402_v47 = vpop.permute.xlu1 %2401  ;;  %vm7014_vm11 = vcmask 752640   ;;  %v3257_v42 = vld [vmem:[#allocation5 + $0x8] sm:$0xff]  ;;  %v3256_v51 = vld [vmem:[#allocation5] sm:$0xff] }
 0x4bb   :  { %2375 = vst.msk [vmem:[#allocation5 + $0x1b] ss:$8 sm:$0x7] %vm6343_vm2, %v2372_v45  ;;  %v2391_v56 = vpop.permute.xlu0 %2390  ;;  %v2403_v63 = vrot.slane %v2402_v47, 1 }
 0x4bc   :  { %v2392_v0 = vrot.slane %v2391_v56, 1  ;;  %3001 = vrot.lane.b32.xlu1 %v2999_v58, %s5023_s23  ;;  %v3144_v58 = vld [vmem:[#allocation4 + $0x3] ss:$4 sm:$0x7] }
 0x4bd   :  { %2991 = vrot.lane.b32.xlu0 %v2989_v8, %s5024_s21  ;;  %v2404_v11 = vsel %vm7013_vm6, %v2402_v47, %v2403_v63  ;;  %vm7016_vm6 = vcmask 736256   ;;  %v3134_v8 = vld [vmem:[#allocation4 + $0x3] ss:$4 sm:$0x7] }
 0x4be   :  { %v2394_v18 = vsel %vm7012_vm12, %v2391_v56, %v2392_v0  ;;  %2407 = vst.msk [vmem:[#allocation5 + $0x1e] ss:$8 sm:$0x7] %vm6343_vm2, %v2404_v11  ;;  %v2423_v19 = vpop.permute.xlu1 %2422  ;;  %vm7017_vm12 = vcmask 728064  }
 0x4bf   :  { %2397 = vst.msk [vmem:[#allocation5 + $0x1d] ss:$8 sm:$0x7] %vm6343_vm2, %v2394_v18  ;;  %v2412_v26 = vpop.permute.xlu0 %2411  ;;  %v2424_v7 = vrot.slane %v2423_v19, 1 }
 0x4c0   :  { %v2413_v40 = vrot.slane %v2412_v26, 1  ;;  %3026 = vrot.lane.b32.xlu1 %v3024_v29, %s4977_s11  ;;  %v3164_v29 = vld [vmem:[#allocation4 + $0x3] ss:$4 sm:$0x7] }
 0x4c1   :  { %3016 = vrot.lane.b32.xlu0 %v3014_v48, %s4978_s12  ;;  %v2426_v49 = vsel %vm7015_vm14, %v2423_v19, %v2424_v7  ;;  %vm7018_vm14 = vcmask 719872   ;;  %v3154_v48 = vld [vmem:[#allocation4 + $0x3] ss:$4 sm:$0x7] }
 0x4c2   :  { %v2415_v59 = vsel %vm7014_vm11, %v2412_v26, %v2413_v40  ;;  %2429 = vst.msk [vmem:[#allocation5 + $0x30] ss:$8 sm:$0x7] %vm6343_vm2, %v2426_v49  ;;  %v2445_v60 = vpop.permute.xlu1 %2444  ;;  %vm7019_vm11 = vcmask 654336  }
 0x4c3   :  { %2418 = vst.msk [vmem:[#allocation5 + $0x1f] ss:$8 sm:$0x7] %vm6343_vm2, %v2415_v59  ;;  %v2434_v6 = vpop.permute.xlu0 %2433  ;;  %v2446_v20 = vrot.slane %v2445_v60, 1 }
 0x4c4   :  { %v2435_v22 = vrot.slane %v2434_v6, 1  ;;  %3046 = vrot.lane.b32.xlu1 %v3044_v10, %s4980_s22  ;;  %v3184_v10 = vld [vmem:[#allocation4 + $0x3] ss:$4 sm:$0x7] }
 0x4c5   :  { %3036 = vrot.lane.b32.xlu0 %v3034_v37, %s4979_s19  ;;  %v2448_v41 = vsel %vm7017_vm12, %v2445_v60, %v2446_v20  ;;  %vm2480_vm12 = vcmask 646144   ;;  %v3174_v37 = vld [vmem:[#allocation4 + $0x3] ss:$4 sm:$0x7] }
 0x4c6   :  { %v2437_v57 = vsel %vm7016_vm6, %v2434_v6, %v2435_v22  ;;  %2451 = vst.msk [vmem:[#allocation5 + $0x32] ss:$8 sm:$0x7] %vm6343_vm2, %v2448_v41  ;;  %v2467_v44 = vpop.permute.xlu1 %2466  ;;  %vm2491_vm6 = vcmask 637952  }
 0x4c7   :  { %2440 = vst.msk [vmem:[#allocation5 + $0x31] ss:$8 sm:$0x7] %vm6343_vm2, %v2437_v57  ;;  %v2456_v61 = vpop.permute.xlu0 %2455  ;;  %v2468_v16 = vrot.slane %v2467_v44, 1 }
 0x4c8   :  { %v2457_v17 = vrot.slane %v2456_v61, 1  ;;  %3066 = vrot.lane.b32.xlu1 %v3064_v62, %s5007_s3  ;;  %v3204_v62 = vld [vmem:[#allocation4 + $0x3] ss:$4 sm:$0x7] }
 0x4c9   :  { %3056 = vrot.lane.b32.xlu0 %v3054_v34, %s5008_s2  ;;  %v2470_v54 = vsel %vm7019_vm11, %v2467_v44, %v2468_v16  ;;  %vm2502_vm11 = vcmask 629760   ;;  %v3194_v34 = vld [vmem:[#allocation4 + $0x3] ss:$4 sm:$0x7] }
 0x4ca   :  { %v2459_v55 = vsel %vm7018_vm14, %v2456_v61, %v2457_v17  ;;  %v3260_v15 = vld [vmem:[#allocation5 + $0x20] sm:$0xff]  ;;  %v3259_v53 = vld [vmem:[#allocation5 + $0x18] sm:$0xff]  ;;  %2473 = vst.msk [vmem:[#allocation5 + $0x34] ss:$8 sm:$0x7] %vm6343_vm2, %v2470_v54  ;;  %v2489_v13 = vpop.permute.xlu1 %2488  ;;  %vm2513_vm14 = vcmask 621568  }
 0x4cb   :  { %2462 = vst.msk [vmem:[#allocation5 + $0x33] ss:$8 sm:$0x7] %vm6343_vm2, %v2459_v55  ;;  %v2478_v25 = vpop.permute.xlu0 %2477  ;;  %v4694_v30 = vpack.c.bf16 %v3260_v15, %v3257_v42  ;;  %v4696_v31 = vpack.c.bf16 %v3259_v53, %v3256_v51  ;;  %v2490_v5 = vrot.slane %v2489_v13, 1 }
 0x4cc   :  { %v2479_v39 = vrot.slane %v2478_v25, 1  ;;  %3086 = vrot.lane.b32.xlu1 %v3084_v46, %s5009_s24  ;;  %v3224_v46 = vld [vmem:[#allocation4 + $0x3] ss:$4 sm:$0x7] }
 0x4cd   :  { %3076 = vrot.lane.b32.xlu0 %v3074_v50, %s5010_s1  ;;  %v2492_v2 = vsel %vm2491_vm6, %v2489_v13, %v2490_v5  ;;  %4695 = vmatprep.subr.bf16.mxu0 %v4694_v30  ;;  %v3214_v50 = vld [vmem:[#allocation4 + $0x3] ss:$4 sm:$0x7] }
 0x4ce   :  { %v2481_v32 = vsel %vm2480_vm12, %v2478_v25, %v2479_v39  ;;  %2495 = vst.msk [vmem:[#allocation5 + $0x36] ss:$8 sm:$0x7] %vm6343_vm2, %v2492_v2  ;;  %4697 = vmatpush1.bf16.msra.mxu0 %v4696_v31  ;;  %v2511_v36 = vpop.permute.xlu1 %2510 }
 0x4cf   :  { %2484 = vst.msk [vmem:[#allocation5 + $0x35] ss:$8 sm:$0x7] %vm6343_vm2, %v2481_v32  ;;  %v2500_v4 = vpop.permute.xlu0 %2499  ;;  %v2512_v38 = vrot.slane %v2511_v36, 1 }
 0x4d0   :  { %v2501_v28 = vrot.slane %v2500_v4, 1  ;;  %3106 = vrot.lane.b32.xlu1 %v3104_v43, %s5011_s26  ;;  %v3244_v43 = vld [vmem:[#allocation4 + $0x3] ss:$4 sm:$0x7] }
 0x4d1   :  { %3096 = vrot.lane.b32.xlu0 %v3094_v52, %s5006_s17  ;;  %v2514_v27 = vsel %vm2513_vm14, %v2511_v36, %v2512_v38  ;;  %v3234_v52 = vld [vmem:[#allocation4 + $0x3] ss:$4 sm:$0x7] }
 0x4d2   :  { %v2503_v1 = vsel %vm2502_vm11, %v2500_v4, %v2501_v28  ;;  %2517 = vst.msk [vmem:[#allocation5 + $0x48] ss:$8 sm:$0x7] %vm6343_vm2, %v2514_v27  ;;  %v2537_v3 = vpop.permute.xlu1 %2536 }
 0x4d3   :  { %2506 = vst.msk [vmem:[#allocation5 + $0x37] ss:$8 sm:$0x7] %vm6343_vm2, %v2503_v1  ;;  %v2527_v12 = vpop.permute.xlu0 %2526  ;;  %v2538_v21 = vrot.slane %v2537_v3, 1 }
 0x4d4   :  { %v2528_v23 = vrot.slane %v2527_v12, 1  ;;  %3126 = vrot.lane.b32.xlu1 %v3124_v14, %s5012_s28 }
 0x4d5   :  { %3116 = vrot.lane.b32.xlu0 %v3114_v33, %s5013_s29  ;;  %v2539_v35 = vsel %vm78_vm1, %v2537_v3, %v2538_v21  ;;  %v3295_v3 = vld [vmem:[%s6986_s5] sm:$0xff] }
 0x4d6   :  { %v2529_v45 = vsel %vm56_vm3, %v2527_v12, %v2528_v23  ;;  %2542 = vst.msk [vmem:[#allocation5 + $0x4b] ss:$8 sm:$0x7] %vm6343_vm2, %v2539_v35  ;;  %v2557_v47 = vpop.permute.xlu1 %2556 }
 0x4d7   :  { %2532 = vst.msk [vmem:[#allocation5 + $0x4a] ss:$8 sm:$0x7] %vm6343_vm2, %v2529_v45  ;;  %v2547_v56 = vpop.permute.xlu0 %2546  ;;  %v2558_v63 = vrot.slane %v2557_v47, 1 }
 0x4d8   :  { %v2548_v0 = vrot.slane %v2547_v56, 1  ;;  %3146 = vrot.lane.b32.xlu1 %v3144_v58, %s4981_s27 }
 0x4d9   :  { %3136 = vrot.lane.b32.xlu0 %v3134_v8, %s5014_s30  ;;  %v2559_v11 = vsel %vm122_vm5, %v2557_v47, %v2558_v63 }
 0x4da   :  { %v2549_v18 = vsel %vm100_vm4, %v2547_v56, %v2548_v0  ;;  %2562 = vst.msk [vmem:[#allocation5 + $0x4d] ss:$8 sm:$0x7] %vm6343_vm2, %v2559_v11  ;;  %v2577_v19 = vpop.permute.xlu1 %2576  ;;  %v3263_v42 = vld [vmem:[#allocation5 + $0x38] sm:$0xff]  ;;  %v3262_v51 = vld [vmem:[#allocation5 + $0x30] sm:$0xff]  ;;  %v3264_v24 = vld [vmem:[#allocation5 + $0x40] sm:$0xff] }
 0x4db   :  { %2552 = vst.msk [vmem:[#allocation5 + $0x4c] ss:$8 sm:$0x7] %vm6343_vm2, %v2549_v18  ;;  %v2567_v26 = vpop.permute.xlu0 %2566  ;;  %v2578_v7 = vrot.slane %v2577_v19, 1 }
 0x4dc   :  { %v2568_v40 = vrot.slane %v2567_v26, 1  ;;  %3166 = vrot.lane.b32.xlu1 %v3164_v29, %s5015_s10 }
 0x4dd   :  { %3156 = vrot.lane.b32.xlu0 %v3154_v48, %s5016_s13  ;;  %v2579_v49 = vsel %vm2317_vm15, %v2577_v19, %v2578_v7 }
 0x4de   :  { %v2569_v59 = vsel %vm2306_vm7, %v2567_v26, %v2568_v40  ;;  %2582 = vst.msk [vmem:[#allocation5 + $0x4f] ss:$8 sm:$0x7] %vm6343_vm2, %v2579_v49  ;;  %v2597_v60 = vpop.permute.xlu1 %2596 }
 0x4df   :  { %2572 = vst.msk [vmem:[#allocation5 + $0x4e] ss:$8 sm:$0x7] %vm6343_vm2, %v2569_v59  ;;  %v2587_v6 = vpop.permute.xlu0 %2586  ;;  %v2598_v20 = vrot.slane %v2597_v60, 1 }
 0x4e0   :  { %v2588_v22 = vrot.slane %v2587_v6, 1  ;;  %3186 = vrot.lane.b32.xlu1 %v3184_v10, %s5017_s14 }
 0x4e1   :  { %3176 = vrot.lane.b32.xlu0 %v3174_v37, %s5018_s15  ;;  %v2599_v41 = vsel %vm2339_vm8, %v2597_v60, %v2598_v20 }
 0x4e2   :  { %v2589_v57 = vsel %vm7023_vm9, %v2587_v6, %v2588_v22  ;;  %2602 = vst.msk [vmem:[#allocation5 + $0x61] ss:$8 sm:$0x7] %vm6343_vm2, %v2599_v41  ;;  %v2617_v44 = vpop.permute.xlu1 %2616  ;;  %vm7063_vm9 = vcmask 736256  }
 0x4e3   :  { %2592 = vst.msk [vmem:[#allocation5 + $0x60] ss:$8 sm:$0x7] %vm6343_vm2, %v2589_v57  ;;  %v2607_v61 = vpop.permute.xlu0 %2606  ;;  %v2618_v16 = vrot.slane %v2617_v44, 1 }
 0x4e4   :  { %v2608_v17 = vrot.slane %v2607_v61, 1  ;;  %3206 = vrot.lane.b32.xlu1 %v3204_v62, %s5019_s16 }
 0x4e5   :  { %3196 = vrot.lane.b32.xlu0 %v3194_v34, %s5020_s18  ;;  %v2619_v54 = vsel %vm7022_vm10, %v2617_v44, %v2618_v16  ;;  %vm7060_vm10 = vcmask 744448  }
 0x4e6   :  { %v2609_v55 = vsel %vm7020_vm13, %v2607_v61, %v2608_v17  ;;  %v3266_v15 = vld [vmem:[#allocation5 + $0x50] sm:$0xff]  ;;  %v3265_v53 = vld [vmem:[#allocation5 + $0x48] sm:$0xff]  ;;  %2622 = vst.msk [vmem:[#allocation5 + $0x63] ss:$8 sm:$0x7] %vm6343_vm2, %v2619_v54  ;;  %v2637_v13 = vpop.permute.xlu1 %2636  ;;  %vm7057_vm13 = vcmask 842752  }
 0x4e7   :  { %2612 = vst.msk [vmem:[#allocation5 + $0x62] ss:$8 sm:$0x7] %vm6343_vm2, %v2609_v55  ;;  %v2627_v25 = vpop.permute.xlu0 %2626  ;;  %v4698_v30 = vpack.c.bf16 %v3266_v15, %v3263_v42  ;;  %v4700_v31 = vpack.c.bf16 %v3265_v53, %v3262_v51  ;;  %v2638_v5 = vrot.slane %v2637_v13, 1 }
 0x4e8   :  { %v2628_v39 = vrot.slane %v2627_v25, 1  ;;  %3226 = vrot.lane.b32.xlu1 %v3224_v46, %s5021_s20  ;;  %v3491_v46 = vld [vmem:[%s6987_s6] sm:$0xff]  ;;  %s5027_s20 = smov 64  }
 0x4e9   :  { %3216 = vrot.lane.b32.xlu0 %v3214_v50, %s5022_s0  ;;  %v2639_v2 = vsel %vm7021_vm0, %v2637_v13, %v2638_v5  ;;  %4699 = vmatprep.subr.bf16.mxu0 %v4698_v30  ;;  %vm7058_vm0 = vcmask 818176   ;;  %v3492_v30 = vld [vmem:[%s6987_s6 + $0x8] sm:$0xff]  ;;  %v3493_v50 = vld [vmem:[%s6987_s6 + $0x10] sm:$0xff]  ;;  %s7109_s0 = smov 96  }
 0x4ea   :  { %v2629_v32 = vsel %vm7057_vm13, %v2627_v25, %v2628_v39  ;;  %2642 = vst.msk [vmem:[#allocation5 + $0x65] ss:$8 sm:$0x7] %vm6343_vm2, %v2639_v2  ;;  %4701 = vmatpush1.bf16.msra.mxu0 %v4700_v31  ;;  %v2657_v36 = vpop.permute.xlu1 %2656  ;;  %vm7059_vm13 = vcmask 826368   ;;  %v3296_v25 = vld [vmem:[%s6986_s5 + $0x8] sm:$0xf]  ;;  %v6593_v39 = vpack.c.bf16 %v3492_v30, %v3491_v46 }
 0x4eb   :  { %2632 = vst.msk [vmem:[#allocation5 + $0x64] ss:$8 sm:$0x7] %vm6343_vm2, %v2629_v32  ;;  %v2647_v4 = vpop.permute.xlu0 %2646  ;;  %v2658_v38 = vrot.slane %v2657_v36, 1  ;;  %v3494_v2 = vld [vmem:[%s6987_s6 + $0x18] sm:$0xff] }
 0x4ec   :  { %v2648_v28 = vrot.slane %v2647_v4, 1  ;;  %3246 = vrot.lane.b32.xlu1 %v3244_v43, %s5023_s23  ;;  %4744 = vmatpush1.bf16.msra.mxu1 %v6593_v39 }
 0x4ed   :  { %3236 = vrot.lane.b32.xlu0 %v3234_v52, %s5024_s21  ;;  %v2659_v27 = vsel %vm7058_vm0, %v2657_v36, %v2658_v38  ;;  %vm7061_vm0 = vcmask 752640   ;;  %v3495_v52 = vld [vmem:[%s6987_s6 + $0x20] sm:$0xff] }
 0x4ee   :  { %v2649_v1 = vsel %vm7059_vm13, %v2647_v4, %v2648_v28  ;;  %2662 = vst.msk [vmem:[#allocation5 + $0x67] ss:$8 sm:$0x7] %vm6343_vm2, %v2659_v27  ;;  %v2677_v12 = vpop.permute.xlu1 %2676  ;;  %vm7062_vm13 = vcmask 728064   ;;  %v6604_v4 = vpack.c.bf16 %v3494_v2, %v3493_v50  ;;  %v7066_v28 = vmov 0.0|0.0   ;;  %v3496_v27 = vld [vmem:[%s6987_s6 + $0x28] sm:$0xff] }
 0x4ef   :  { %2652 = vst.msk [vmem:[#allocation5 + $0x66] ss:$8 sm:$0x7] %vm6343_vm2, %v2649_v1  ;;  %v2667_v14 = vpop.permute.xlu0 %2666  ;;  %v2678_v21 = vrot.slane %v2677_v12, 1  ;;  %4745 = vmatprep.subr.bf16.mxu1 %v7066_v28 }
 0x4f0   :  { %v2668_v23 = vrot.slane %v2667_v14, 1  ;;  %3304 = vperm.xlu1 %4907, %v3296_v25   ;;  %4747 = vmatpush1.bf16.msra.mxu1 %v6604_v4 }
 0x4f1   :  { %3299 = vperm.xlu0 %4896, %v3295_v3   ;;  %v2679_v33 = vsel %vm7060_vm10, %v2677_v12, %v2678_v21  ;;  %vm7064_vm10 = vcmask 654336   ;;  %v6620_v21 = vpack.c.bf16 %v3496_v27, %v3495_v52  ;;  %4748 = vmatprep.subr.bf16.mxu1 %v7066_v28 }
 0x4f2   :  { %v2669_v35 = vsel %vm7061_vm0, %v2667_v14, %v2668_v23  ;;  %2682 = vst.msk [vmem:[#allocation5 + $0x79] ss:$8 sm:$0x7] %vm6343_vm2, %v2679_v33  ;;  %v2697_v45 = vpop.permute.xlu1 %2696  ;;  %vm7065_vm0 = vcmask 719872  }
 0x4f3   :  { %2672 = vst.msk [vmem:[#allocation5 + $0x78] ss:$8 sm:$0x7] %vm6343_vm2, %v2669_v35  ;;  %v2687_v47 = vpop.permute.xlu0 %2686  ;;  %v2698_v56 = vrot.slane %v2697_v45, 1 }
 0x4f4   :  { %v2688_v58 = vrot.slane %v2687_v47, 1  ;;  %4750 = vmatpush1.bf16.msra.mxu1 %v6620_v21 }
 0x4f5   :  { %v2699_v63 = vsel %vm7062_vm13, %v2697_v45, %v2698_v56  ;;  %4751 = vmatprep.subr.bf16.mxu1 %v7066_v28  ;;  %vm7068_vm13 = vcmask 850944  }
 0x4f6   :  { %v2689_v0 = vsel %vm7063_vm9, %v2687_v47, %v2688_v58  ;;  %2702 = vst.msk [vmem:[#allocation5 + $0x7b] ss:$8 sm:$0x7] %vm6343_vm2, %v2699_v63  ;;  %v2717_v8 = vpop.permute.xlu1 %2716  ;;  %v3269_v16 = vld [vmem:[#allocation5 + $0x68] sm:$0xff]  ;;  %v3268_v54 = vld [vmem:[#allocation5 + $0x60] sm:$0xff]  ;;  %vm7067_vm9 = vcmask 932864  }
 0x4f7   :  { %2692 = vst.msk [vmem:[#allocation5 + $0x7a] ss:$8 sm:$0x7] %vm6343_vm2, %v2689_v0  ;;  %v2707_v11 = vpop.permute.xlu0 %2706  ;;  %v2718_v18 = vrot.slane %v2717_v8, 1 }
 0x4f8   :  { %v2708_v19 = vrot.slane %v2707_v11, 1 }
 0x4f9   :  { %v2719_v26 = vsel %vm7064_vm10, %v2717_v8, %v2718_v18  ;;  %vm7069_vm10 = vcmask 916480  }
 0x4fa   :  { %v2709_v29 = vsel %vm7065_vm0, %v2707_v11, %v2708_v19  ;;  %2722 = vst.msk [vmem:[#allocation5 + $0x7d] ss:$8 sm:$0x7] %vm6343_vm2, %v2719_v26  ;;  %v2737_v7 = vpop.permute.xlu1 %2736  ;;  %vm7070_vm0 = vcmask 834560  }
 0x4fb   :  { %2712 = vst.msk [vmem:[#allocation5 + $0x7c] ss:$8 sm:$0x7] %vm6343_vm2, %v2709_v29  ;;  %v2727_v40 = vpop.permute.xlu0 %2726  ;;  %v2738_v48 = vrot.slane %v2737_v7, 1 }
 0x4fc   :  { %v2728_v49 = vrot.slane %v2727_v40, 1 }
 0x4fd   :  { %v2739_v59 = vsel %vm2491_vm6, %v2737_v7, %v2738_v48 }
 0x4fe   :  { %v2729_v60 = vsel %vm2480_vm12, %v2727_v40, %v2728_v49  ;;  %2742 = vst.msk [vmem:[#allocation5 + $0x7f] ss:$8 sm:$0x7] %vm6343_vm2, %v2739_v59  ;;  %v2757_v6 = vpop.permute.xlu1 %2756 }
 0x4ff   :  { %2732 = vst.msk [vmem:[#allocation5 + $0x7e] ss:$8 sm:$0x7] %vm6343_vm2, %v2729_v60  ;;  %v2747_v10 = vpop.permute.xlu0 %2746  ;;  %v2758_v20 = vrot.slane %v2757_v6, 1 }
 0x500   :  { %v2748_v22 = vrot.slane %v2747_v10, 1 }
 0x501   :  { %v2759_v37 = vsel %vm2513_vm14, %v2757_v6, %v2758_v20 }
 0x502   :  { %v2749_v41 = vsel %vm2502_vm11, %v2747_v10, %v2748_v22  ;;  %2762 = vst.msk [vmem:[#allocation5 + $0x91] ss:$8 sm:$0x7] %vm6343_vm2, %v2759_v37  ;;  %v2782_v57 = vpop.permute.xlu1 %2781 }
 0x503   :  { %2752 = vst.msk [vmem:[#allocation5 + $0x90] ss:$8 sm:$0x7] %vm6343_vm2, %v2749_v41  ;;  %v2772_v44 = vpop.permute.xlu0 %2771  ;;  %v2783_v61 = vrot.slane %v2782_v57, 1 }
 0x504   :  { %v2773_v62 = vrot.slane %v2772_v44, 1 }
 0x505   :  { %v2784_v17 = vsel %vm78_vm1, %v2782_v57, %v2783_v61 }
 0x506   :  { %v2774_v34 = vsel %vm56_vm3, %v2772_v44, %v2773_v62  ;;  %v3272_v42 = vld [vmem:[#allocation5 + $0x80] sm:$0xff]  ;;  %v3271_v55 = vld [vmem:[#allocation5 + $0x78] sm:$0xff]  ;;  %2787 = vst.msk [vmem:[#allocation5 + $0x94] ss:$8 sm:$0x7] %vm6343_vm2, %v2784_v17  ;;  %v2802_v15 = vpop.permute.xlu1 %2801 }
 0x507   :  { %2777 = vst.msk [vmem:[#allocation5 + $0x93] ss:$8 sm:$0x7] %vm6343_vm2, %v2774_v34  ;;  %v2792_v51 = vpop.permute.xlu0 %2791  ;;  %v4702_v53 = vpack.c.bf16 %v3272_v42, %v3269_v16  ;;  %v4704_v13 = vpack.c.bf16 %v3271_v55, %v3268_v54  ;;  %v2803_v31 = vrot.slane %v2802_v15, 1 }
 0x508   :  { %v2793_v5 = vrot.slane %v2792_v51, 1 }
 0x509   :  { %4703 = vmatprep.subr.bf16.mxu0 %v4702_v53  ;;  %v2804_v32 = vsel %vm122_vm5, %v2802_v15, %v2803_v31 }
 0x50a   :  { %v2794_v36 = vsel %vm100_vm4, %v2792_v51, %v2793_v5  ;;  %4705 = vmatpush1.bf16.msra.mxu0 %v4704_v13  ;;  %2807 = vst.msk [vmem:[#allocation5 + $0x96] ss:$8 sm:$0x7] %vm6343_vm2, %v2804_v32  ;;  %v2822_v43 = vpop.permute.xlu1 %2821 }
 0x50b   :  { %2797 = vst.msk [vmem:[#allocation5 + $0x95] ss:$8 sm:$0x7] %vm6343_vm2, %v2794_v36  ;;  %v2812_v38 = vpop.permute.xlu0 %2811  ;;  %v2823_v1 = vrot.slane %v2822_v43, 1 }
 0x50c   :  { %v2813_v3 = vrot.slane %v2812_v38, 1 }
 0x50d   :  { %v2824_v12 = vsel %vm2317_vm15, %v2822_v43, %v2823_v1 }
 0x50e   :  { %v2814_v14 = vsel %vm2306_vm7, %v2812_v38, %v2813_v3  ;;  %2827 = vst.msk [vmem:[#allocation5 + $0xa8] ss:$8 sm:$0x7] %vm6343_vm2, %v2824_v12  ;;  %v2842_v23 = vpop.permute.xlu1 %2841 }
 0x50f   :  { %2817 = vst.msk [vmem:[#allocation5 + $0x97] ss:$8 sm:$0x7] %vm6343_vm2, %v2814_v14  ;;  %v2832_v33 = vpop.permute.xlu0 %2831  ;;  %v2843_v35 = vrot.slane %v2842_v23, 1 }
 0x510   :  { %v2833_v45 = vrot.slane %v2832_v33, 1 }
 0x511   :  { %v2844_v47 = vsel %vm2339_vm8, %v2842_v23, %v2843_v35 }
 0x512   :  { %v2834_v56 = vsel %vm7067_vm9, %v2832_v33, %v2833_v45  ;;  %2847 = vst.msk [vmem:[#allocation5 + $0xaa] ss:$8 sm:$0x7] %vm6343_vm2, %v2844_v47  ;;  %v2862_v58 = vpop.permute.xlu1 %2861  ;;  %vm7071_vm9 = vcmask 842752  }
 0x513   :  { %2837 = vst.msk [vmem:[#allocation5 + $0xa9] ss:$8 sm:$0x7] %vm6343_vm2, %v2834_v56  ;;  %v2852_v63 = vpop.permute.xlu0 %2851  ;;  %v2863_v0 = vrot.slane %v2862_v58, 1 }
 0x514   :  { %v2853_v8 = vrot.slane %v2852_v63, 1 }
 0x515   :  { %v2864_v11 = vsel %vm7068_vm13, %v2862_v58, %v2863_v0  ;;  %vm7072_vm13 = vcmask 818176  }
 0x516   :  { %v2854_v18 = vsel %vm7069_vm10, %v2852_v63, %v2853_v8  ;;  %2867 = vst.msk [vmem:[#allocation5 + $0xac] ss:$8 sm:$0x7] %vm6343_vm2, %v2864_v11  ;;  %v2882_v19 = vpop.permute.xlu1 %2881  ;;  %vm7073_vm10 = vcmask 826368   ;;  %v3275_v42 = vld [vmem:[#allocation5 + $0x98] sm:$0xff]  ;;  %v3274_v51 = vld [vmem:[#allocation5 + $0x90] sm:$0xff] }
 0x517   :  { %2857 = vst.msk [vmem:[#allocation5 + $0xab] ss:$8 sm:$0x7] %vm6343_vm2, %v2854_v18  ;;  %v2872_v26 = vpop.permute.xlu0 %2871  ;;  %v2883_v29 = vrot.slane %v2882_v19, 1 }
 0x518   :  { %v2873_v7 = vrot.slane %v2872_v26, 1 }
 0x519   :  { %v2884_v40 = vsel %vm7070_vm0, %v2882_v19, %v2883_v29  ;;  %vm7074_vm0 = vcmask 744448  }
 0x51a   :  { %v2874_v48 = vsel %vm7071_vm9, %v2872_v26, %v2873_v7  ;;  %2887 = vst.msk [vmem:[#allocation5 + $0xae] ss:$8 sm:$0x7] %vm6343_vm2, %v2884_v40  ;;  %v2902_v49 = vpop.permute.xlu1 %2901  ;;  %vm7075_vm9 = vcmask 752640  }
 0x51b   :  { %2877 = vst.msk [vmem:[#allocation5 + $0xad] ss:$8 sm:$0x7] %vm6343_vm2, %v2874_v48  ;;  %v2892_v59 = vpop.permute.xlu0 %2891  ;;  %v2903_v60 = vrot.slane %v2902_v49, 1 }
 0x51c   :  { %v2893_v6 = vrot.slane %v2892_v59, 1 }
 0x51d   :  { %v2904_v10 = vsel %vm7072_vm13, %v2902_v49, %v2903_v60  ;;  %vm7076_vm13 = vcmask 728064  }
 0x51e   :  { %v2894_v20 = vsel %vm7073_vm10, %v2892_v59, %v2893_v6  ;;  %2907 = vst.msk [vmem:[#allocation5 + $0xc0] ss:$8 sm:$0x7] %vm6343_vm2, %v2904_v10  ;;  %v2922_v22 = vpop.permute.xlu1 %2921  ;;  %vm7077_vm10 = vcmask 736256  }
 0x51f   :  { %2897 = vst.msk [vmem:[#allocation5 + $0xaf] ss:$8 sm:$0x7] %vm6343_vm2, %v2894_v20  ;;  %v2912_v37 = vpop.permute.xlu0 %2911  ;;  %v2923_v41 = vrot.slane %v2922_v22, 1 }
 0x520   :  { %v2913_v57 = vrot.slane %v2912_v37, 1 }
 0x521   :  { %v2924_v44 = vsel %vm7074_vm0, %v2922_v22, %v2923_v41  ;;  %vm7078_vm0 = vcmask 654336  }
 0x522   :  { %v2914_v61 = vsel %vm7075_vm9, %v2912_v37, %v2913_v57  ;;  %2927 = vst.msk [vmem:[#allocation5 + $0xc2] ss:$8 sm:$0x7] %vm6343_vm2, %v2924_v44  ;;  %v2942_v62 = vpop.permute.xlu1 %2941  ;;  %vm7079_vm9 = vcmask 719872  }
 0x523   :  { %2917 = vst.msk [vmem:[#allocation5 + $0xc1] ss:$8 sm:$0x7] %vm6343_vm2, %v2914_v61  ;;  %v2932_v16 = vpop.permute.xlu0 %2931  ;;  %v2943_v17 = vrot.slane %v2942_v62, 1 }
 0x524   :  { %v2933_v34 = vrot.slane %v2932_v16, 1 }
 0x525   :  { %v2944_v54 = vsel %vm7076_vm13, %v2942_v62, %v2943_v17  ;;  %vm7087_vm13 = vcmask 744448  }
 0x526   :  { %v2934_v55 = vsel %vm7077_vm10, %v2932_v16, %v2933_v34  ;;  %v3278_v15 = vld [vmem:[#allocation5 + $0xb0] sm:$0xff]  ;;  %v3277_v53 = vld [vmem:[#allocation5 + $0xa8] sm:$0xff]  ;;  %2947 = vst.msk [vmem:[#allocation5 + $0xc4] ss:$8 sm:$0x7] %vm6343_vm2, %v2944_v54  ;;  %v2962_v13 = vpop.permute.xlu1 %2961  ;;  %vm7088_vm10 = vcmask 752640  }
 0x527   :  { %2937 = vst.msk [vmem:[#allocation5 + $0xc3] ss:$8 sm:$0x7] %vm6343_vm2, %v2934_v55  ;;  %v2952_v25 = vpop.permute.xlu0 %2951  ;;  %v4706_v46 = vpack.c.bf16 %v3278_v15, %v3275_v42  ;;  %v4708_v30 = vpack.c.bf16 %v3277_v53, %v3274_v51  ;;  %v2963_v31 = vrot.slane %v2962_v13, 1 }
 0x528   :  { %v2953_v5 = vrot.slane %v2952_v25, 1 }
 0x529   :  { %4707 = vmatprep.subr.bf16.mxu0 %v4706_v46  ;;  %v2964_v50 = vsel %vm7078_vm0, %v2962_v13, %v2963_v31  ;;  %vm7089_vm0 = vcmask 728064  }
 0x52a   :  { %v2954_v2 = vsel %vm7079_vm9, %v2952_v25, %v2953_v5  ;;  %4709 = vmatpush1.bf16.msra.mxu0 %v4708_v30  ;;  %2967 = vst.msk [vmem:[#allocation5 + $0xc6] ss:$8 sm:$0x7] %vm6343_vm2, %v2964_v50  ;;  %v2982_v32 = vpop.permute.xlu1 %2981  ;;  %vm7090_vm9 = vcmask 736256  }
 0x52b   :  { %2957 = vst.msk [vmem:[#allocation5 + $0xc5] ss:$8 sm:$0x7] %vm6343_vm2, %v2954_v2  ;;  %v2972_v36 = vpop.permute.xlu0 %2971  ;;  %v2983_v43 = vrot.slane %v2982_v32, 1 }
 0x52c   :  { %v2973_v38 = vrot.slane %v2972_v36, 1 }
 0x52d   :  { %v2984_v52 = vsel %vm2491_vm6, %v2982_v32, %v2983_v43 }
 0x52e   :  { %v2974_v27 = vsel %vm2480_vm12, %v2972_v36, %v2973_v38  ;;  %2987 = vst.msk [vmem:[#allocation5 + $0xd8] ss:$8 sm:$0x7] %vm6343_vm2, %v2984_v52  ;;  %v3002_v1 = vpop.permute.xlu1 %3001 }
 0x52f   :  { %2977 = vst.msk [vmem:[#allocation5 + $0xc7] ss:$8 sm:$0x7] %vm6343_vm2, %v2974_v27  ;;  %v2992_v3 = vpop.permute.xlu0 %2991  ;;  %v3003_v12 = vrot.slane %v3002_v1, 1 }
 0x530   :  { %v2993_v14 = vrot.slane %v2992_v3, 1 }
 0x531   :  { %v3004_v23 = vsel %vm2513_vm14, %v3002_v1, %v3003_v12 }
 0x532   :  { %v2994_v33 = vsel %vm2502_vm11, %v2992_v3, %v2993_v14  ;;  %3007 = vst.msk [vmem:[#allocation5 + $0xda] ss:$8 sm:$0x7] %vm6343_vm2, %v3004_v23  ;;  %v3027_v35 = vpop.permute.xlu1 %3026 }
 0x533   :  { %2997 = vst.msk [vmem:[#allocation5 + $0xd9] ss:$8 sm:$0x7] %vm6343_vm2, %v2994_v33  ;;  %v3017_v45 = vpop.permute.xlu0 %3016  ;;  %v3028_v47 = vrot.slane %v3027_v35, 1 }
 0x534   :  { %v3018_v56 = vrot.slane %v3017_v45, 1 }
 0x535   :  { %v3029_v58 = vsel %vm78_vm1, %v3027_v35, %v3028_v47  ;;  %vm7080_vm1 = vcmask 932864  }
 0x536   :  { %v3019_v63 = vsel %vm56_vm3, %v3017_v45, %v3018_v56  ;;  %3032 = vst.msk [vmem:[#allocation5 + $0xdd] ss:$8 sm:$0x7] %vm6343_vm2, %v3029_v58  ;;  %v3047_v0 = vpop.permute.xlu1 %3046  ;;  %v3281_v22 = vld [vmem:[#allocation5 + $0xc8] sm:$0xff]  ;;  %v3280_v44 = vld [vmem:[#allocation5 + $0xc0] sm:$0xff]  ;;  %vm7081_vm3 = vcmask 850944  }
 0x537   :  { %3022 = vst.msk [vmem:[#allocation5 + $0xdc] ss:$8 sm:$0x7] %vm6343_vm2, %v3019_v63  ;;  %v3037_v8 = vpop.permute.xlu0 %3036  ;;  %v3048_v11 = vrot.slane %v3047_v0, 1 }
 0x538   :  { %v3038_v18 = vrot.slane %v3037_v8, 1 }
 0x539   :  { %v3049_v19 = vsel %vm122_vm5, %v3047_v0, %v3048_v11  ;;  %vm7083_vm5 = vcmask 834560  }
 0x53a   :  { %v3039_v26 = vsel %vm100_vm4, %v3037_v8, %v3038_v18  ;;  %3052 = vst.msk [vmem:[#allocation5 + $0xdf] ss:$8 sm:$0x7] %vm6343_vm2, %v3049_v19  ;;  %v3067_v29 = vpop.permute.xlu1 %3066  ;;  %vm7082_vm4 = vcmask 916480  }
 0x53b   :  { %3042 = vst.msk [vmem:[#allocation5 + $0xde] ss:$8 sm:$0x7] %vm6343_vm2, %v3039_v26  ;;  %v3057_v7 = vpop.permute.xlu0 %3056  ;;  %v3068_v40 = vrot.slane %v3067_v29, 1 }
 0x53c   :  { %v3058_v48 = vrot.slane %v3057_v7, 1 }
 0x53d   :  { %v3069_v49 = vsel %vm2317_vm15, %v3067_v29, %v3068_v40  ;;  %vm7084_vm15 = vcmask 842752  }
 0x53e   :  { %v3059_v59 = vsel %vm2306_vm7, %v3057_v7, %v3058_v48  ;;  %3072 = vst.msk [vmem:[#allocation5 + $0xf1] ss:$8 sm:$0x7] %vm6343_vm2, %v3069_v49  ;;  %v3087_v60 = vpop.permute.xlu1 %3086  ;;  %vm7085_vm7 = vcmask 818176  }
 0x53f   :  { %3062 = vst.msk [vmem:[#allocation5 + $0xf0] ss:$8 sm:$0x7] %vm6343_vm2, %v3059_v59  ;;  %v3077_v6 = vpop.permute.xlu0 %3076  ;;  %v3088_v10 = vrot.slane %v3087_v60, 1 }
 0x540   :  { %v3078_v20 = vrot.slane %v3077_v6, 1 }
 0x541   :  { %v3089_v37 = vsel %vm2339_vm8, %v3087_v60, %v3088_v10  ;;  %vm7086_vm8 = vcmask 826368  }
 0x542   :  { %v3079_v41 = vsel %vm7080_vm1, %v3077_v6, %v3078_v20  ;;  %v3284_v57 = vld [vmem:[#allocation5 + $0xe0] sm:$0xff]  ;;  %v3283_v61 = vld [vmem:[#allocation5 + $0xd8] sm:$0xff]  ;;  %3092 = vst.msk [vmem:[#allocation5 + $0xf3] ss:$8 sm:$0x7] %vm6343_vm2, %v3089_v37  ;;  %v3107_v62 = vpop.permute.xlu1 %3106  ;;  %vm7091_vm1 = vcmask 654336  }
 0x543   :  { %3082 = vst.msk [vmem:[#allocation5 + $0xf2] ss:$8 sm:$0x7] %vm6343_vm2, %v3079_v41  ;;  %v3097_v16 = vpop.permute.xlu0 %3096  ;;  %v4710_v17 = vpack.c.bf16 %v3284_v57, %v3281_v22  ;;  %v4712_v34 = vpack.c.bf16 %v3283_v61, %v3280_v44  ;;  %v3108_v42 = vrot.slane %v3107_v62, 1  ;;  %v3261_v44 = vld [vmem:[#allocation5 + $0x28] sm:$0xff]  ;;  %v3258_v61 = vld [vmem:[#allocation5 + $0x10] sm:$0xff] }
 0x544   :  { %v3098_v54 = vrot.slane %v3097_v16, 1 }
 0x545   :  { %4711 = vmatprep.subr.bf16.mxu0 %v4710_v17  ;;  %v3109_v55 = vsel %vm7081_vm3, %v3107_v62, %v3108_v42  ;;  %vm7092_vm3 = vcmask 719872   ;;  %v3267_v62 = vld [vmem:[#allocation5 + $0x58] sm:$0xff]  ;;  %v4718_v42 = vpack.c.bf16 %v3261_v44, %v3258_v61 }
 0x546   :  { %v3099_v15 = vsel %vm7082_vm4, %v3097_v16, %v3098_v54  ;;  %4713 = vmatpush1.bf16.msra.mxu0 %v4712_v34  ;;  %3112 = vst.msk [vmem:[#allocation5 + $0xf5] ss:$8 sm:$0x7] %vm6343_vm2, %v3109_v55  ;;  %v3127_v51 = vpop.permute.xlu1 %3126  ;;  %v3254_v34 = vld [vmem:[%s6985_s4] sm:$0xff]  ;;  %v4722_v54 = vpack.c.bf16 %v3267_v62, %v3264_v24  ;;  %v3273_v55 = vld [vmem:[#allocation5 + $0x88] sm:$0xff] }
 0x547   :  { %3102 = vst.msk [vmem:[#allocation5 + $0xf4] ss:$8 sm:$0x7] %vm6343_vm2, %v3099_v15  ;;  %v3117_v53 = vpop.permute.xlu0 %3116  ;;  %v3128_v13 = vrot.slane %v3127_v51, 1  ;;  %v3255_v15 = vld [vmem:[%s6985_s4 + $0x8] sm:$0xf] }
 0x548   :  { %v3118_v25 = vrot.slane %v3117_v53, 1  ;;  %s5026_s4 = smov 48  }
 0x549   :  { %v3129_v46 = vsel %vm7083_vm5, %v3127_v51, %v3128_v13  ;;  %v3270_v51 = vld [vmem:[#allocation5 + $0x70] sm:$0xff]  ;;  %v3279_v13 = vld [vmem:[#allocation5 + $0xb8] sm:$0xff] }
 0x54a   :  { %v3119_v30 = vsel %vm7084_vm15, %v3117_v53, %v3118_v25  ;;  %3132 = vst.msk [vmem:[#allocation5 + $0xf7] ss:$8 sm:$0x7] %vm6343_vm2, %v3129_v46  ;;  %v3147_v31 = vpop.permute.xlu1 %3146  ;;  %v4726_v53 = vpack.c.bf16 %v3273_v55, %v3270_v51  ;;  %v3276_v25 = vld [vmem:[#allocation5 + $0xa0] sm:$0xff] }
 0x54b   :  { %3122 = vst.msk [vmem:[#allocation5 + $0xf6] ss:$8 sm:$0x7] %vm6343_vm2, %v3119_v30  ;;  %v3137_v5 = vpop.permute.xlu0 %3136  ;;  %v3148_v50 = vrot.slane %v3147_v31, 1  ;;  %v4730_v46 = vpack.c.bf16 %v3279_v13, %v3276_v25  ;;  %v3285_v30 = vld [vmem:[#allocation5 + $0xe8] sm:$0xff] }
 0x54c   :  { %v3138_v2 = vrot.slane %v3137_v5, 1 }
 0x54d   :  { %v3149_v32 = vsel %vm7085_vm7, %v3147_v31, %v3148_v50 }
 0x54e   :  { %v3139_v36 = vsel %vm7086_vm8, %v3137_v5, %v3138_v2  ;;  %3152 = vst.msk [vmem:[#allocation5 + $0x109] ss:$8 sm:$0x7] %vm6343_vm2, %v3149_v32  ;;  %v3167_v43 = vpop.permute.xlu1 %3166 }
 0x54f   :  { %3142 = vst.msk [vmem:[#allocation5 + $0x108] ss:$8 sm:$0x7] %vm6343_vm2, %v3139_v36  ;;  %v3157_v38 = vpop.permute.xlu0 %3156  ;;  %v3168_v52 = vrot.slane %v3167_v43, 1  ;;  %v3497_v36 = vld [vmem:[%s6987_s6 + $0x30] sm:$0xff] }
 0x550   :  { %v3158_v27 = vrot.slane %v3157_v38, 1 }
 0x551   :  { %v3169_v1 = vsel %vm7087_vm13, %v3167_v43, %v3168_v52  ;;  %v3498_v43 = vld [vmem:[%s6987_s6 + $0x38] sm:$0xff]  ;;  %v3501_v52 = vld [vmem:[%s6987_s6 + $0x50] sm:$0xff]  ;;  %vm3482_vm13 = vcmask 261120  }
 0x552   :  { %v3159_v3 = vsel %vm7088_vm10, %v3157_v38, %v3158_v27  ;;  %3172 = vst.msk [vmem:[#allocation5 + $0x10b] ss:$8 sm:$0x7] %vm6343_vm2, %v3169_v1  ;;  %v3187_v12 = vpop.permute.xlu1 %3186  ;;  %v3287_v60 = vld [vmem:[#allocation5 + $0xf8] sm:$0xff]  ;;  %v3286_v22 = vld [vmem:[#allocation5 + $0xf0] sm:$0xff]  ;;  %v3288_v50 = vld [vmem:[#allocation5 + $0x100] sm:$0xff]  ;;  %v4752_v38 = vpack.c.bf16 %v3498_v43, %v3497_v36 }
 0x553   :  { %3162 = vst.msk [vmem:[#allocation5 + $0x10a] ss:$8 sm:$0x7] %vm6343_vm2, %v3159_v3  ;;  %v3177_v14 = vpop.permute.xlu0 %3176  ;;  %v3188_v23 = vrot.slane %v3187_v12, 1  ;;  %v3502_v27 = vld [vmem:[%s6987_s6 + $0x58] sm:$0xff]  ;;  %v3503_v3 = vld [vmem:[%s6987_s6 + $0x60] sm:$0xff] }
 0x554   :  { %v3178_v33 = vrot.slane %v3177_v14, 1  ;;  %4753 = vmatpush1.bf16.msra.mxu1 %v4752_v38  ;;  %v4758_v1 = vpack.c.bf16 %v3502_v27, %v3501_v52  ;;  %vm7103_vm10 = vcmask 257024   ;;  %v3992_v52 = vld [vmem:[%s6988_s7 + $0x18] sm:$0xff] }
 0x555   :  { %v3189_v35 = vsel %vm7089_vm0, %v3187_v12, %v3188_v23  ;;  %4754 = vmatprep.subr.bf16.mxu1 %v7066_v28  ;;  %v3504_v12 = vld [vmem:[%s6987_s6 + $0x68] sm:$0xff]  ;;  %v3505_v23 = vld [vmem:[%s6987_s6 + $0x70] sm:$0xff]  ;;  %vm7104_vm0 = vcmask 916480  }
 0x556   :  { %v3179_v45 = vsel %vm7090_vm9, %v3177_v14, %v3178_v33  ;;  %3192 = vst.msk [vmem:[#allocation5 + $0x10d] ss:$8 sm:$0x7] %vm6343_vm2, %v3189_v35  ;;  %v3207_v47 = vpop.permute.xlu1 %3206  ;;  %v4761_v14 = vpack.c.bf16 %v3504_v12, %v3503_v3  ;;  %v3506_v33 = vld [vmem:[%s6987_s6 + $0x78] sm:$0xff]  ;;  %v3994_v3 = vld [vmem:[%s6988_s7 + $0x28] sm:$0xff] }
 0x557   :  { %3182 = vst.msk [vmem:[#allocation5 + $0x10c] ss:$8 sm:$0x7] %vm6343_vm2, %v3179_v45  ;;  %v3197_v56 = vpop.permute.xlu0 %3196  ;;  %v3208_v58 = vrot.slane %v3207_v47, 1  ;;  %v4764_v35 = vpack.c.bf16 %v3506_v33, %v3505_v23  ;;  %v3507_v45 = vld [vmem:[%s6987_s6 + $0x80] sm:$0xff] }
 0x558   :  { %v3198_v63 = vrot.slane %v3197_v56, 1 }
 0x559   :  { %v3209_v0 = vsel %vm7091_vm1, %v3207_v47, %v3208_v58  ;;  %v3508_v47 = vld [vmem:[%s6987_s6 + $0x88] sm:$0xff] }
 0x55a   :  { %v3199_v8 = vsel %vm7092_vm3, %v3197_v56, %v3198_v63  ;;  %3212 = vst.msk [vmem:[#allocation5 + $0x10f] ss:$8 sm:$0x7] %vm6343_vm2, %v3209_v0  ;;  %v3227_v11 = vpop.permute.xlu1 %3226  ;;  %v4767_v56 = vpack.c.bf16 %v3508_v47, %v3507_v45  ;;  %vm7107_vm3 = vmmov %vm7104_vm0 }
 0x55b   :  { %3202 = vst.msk [vmem:[#allocation5 + $0x10e] ss:$8 sm:$0x7] %vm6343_vm2, %v3199_v8  ;;  %v3217_v18 = vpop.permute.xlu0 %3216  ;;  %v3228_v19 = vrot.slane %v3227_v11, 1 }
 0x55c   :  { %v3218_v26 = vrot.slane %v3217_v18, 1 }
 0x55d   :  { %v3229_v29 = vsel %vm2491_vm6, %v3227_v11, %v3228_v19  ;;  %vm7093_vm6 = vcmask 1043456  }
 0x55e   :  { %v3219_v7 = vsel %vm2480_vm12, %v3217_v18, %v3218_v26  ;;  %3232 = vst.msk [vmem:[#allocation5 + $0x121] ss:$8 sm:$0x7] %vm6343_vm2, %v3229_v29  ;;  %v3247_v40 = vpop.permute.xlu1 %3246  ;;  %vm7094_vm12 = vmmov %vm7093_vm6 }
 0x55f   :  { %3222 = vst.msk [vmem:[#allocation5 + $0x120] ss:$8 sm:$0x7] %vm6343_vm2, %v3219_v7  ;;  %v3237_v48 = vpop.permute.xlu0 %3236  ;;  %v3248_v49 = vrot.slane %v3247_v40, 1  ;;  %vm7098_vm4 = vmmov %vm7093_vm6 }
 0x560   :  { %v3238_v59 = vrot.slane %v3237_v48, 1  ;;  %vm7099_vm5 = vmmov %vm7098_vm4 }
 0x561   :  { %v3249_v6 = vsel %vm2513_vm14, %v3247_v40, %v3248_v49  ;;  %vm7096_vm14 = vmmov %vm7085_vm7 }
 0x562   :  { %v3239_v10 = vsel %vm2502_vm11, %v3237_v48, %v3238_v59  ;;  %v3290_v20 = vld [vmem:[#allocation5 + $0x110] sm:$0xff]  ;;  %v3289_v37 = vld [vmem:[#allocation5 + $0x108] sm:$0xff]  ;;  %3252 = vst.msk [vmem:[#allocation5 + $0x123] ss:$8 sm:$0x7] %vm6343_vm2, %v3249_v6  ;;  %vm7095_vm11 = vmmov %vm7085_vm7 }
 0x563   :  { %3242 = vst.msk [vmem:[#allocation5 + $0x122] ss:$8 sm:$0x7] %vm6343_vm2, %v3239_v10  ;;  %v4714_v41 = vpack.c.bf16 %v3290_v20, %v3287_v60  ;;  %v4716_v57 = vpack.c.bf16 %v3289_v37, %v3286_v22  ;;  %vm7097_vm2 = vmmov %vm7085_vm7  ;;  %v3291_v5 = vld [vmem:[#allocation5 + $0x118] sm:$0xff]  ;;  %vm7101_vm7 = vcmask 130048  }
 0x564   :  { %v4738_v2 = vpack.c.bf16 %v3291_v5, %v3288_v50  ;;  %vm7100_vm15 = vmmov %vm7097_vm2 }
 0x565   :  { %4715 = vmatprep.subr.bf16.mxu0 %v4714_v41  ;;  %vm7102_vm8 = vmmov %vm7101_vm7 }
 0x566   :  { %4717 = vmatpush1.bf16.msra.mxu0 %v4716_v57  ;;  %vm7105_vm9 = vmmov %vm7101_vm7 }
 0x567   :  { %vm7106_vm1 = vmmov %vm7101_vm7 }
 0x56a   :  { %v3293_v16 = vld [vmem:[#allocation5 + $0x128] sm:$0xf]  ;;  %v3292_v17 = vld [vmem:[#allocation5 + $0x120] sm:$0xf]  ;;  %v3294_v32 = vld [vmem:[#allocation5 + $0x130] sm:$0xf] }
 0x56b   :  { %4141 = vmatprep.subr.msk.mxu0 %vm7093_vm6, %v3293_v16  ;;  %vm7108_vm6 = vmmov %vm7106_vm1 }
 0x56c   :  { %4142 = vmatpush1.msk.msra.mxu0 %vm7094_vm12, %v3292_v17  ;;  %vm3594_vm12 = vcmask 122880  }
 0x56d   :  { %4143 = vmatmul.mubr.msk.f32.vlgmr.msra.gmra.mrb[8].mxu0 %vm7095_vm11, %v3254_v34  ;;  %4719 = vmatprep.subr.bf16.mxu0 %v4718_v42  ;;  %vm3591_vm11 = vcmask 125952  }
 0x56e   :  { %4721 = vmatpush3.bf16.msra.mxu0 %v4718_v42  ;;  %3392 = vmatprep.mubr.f32.mxu0 %v6230_v9  ;;  %v3282_v9 = vld [vmem:[#allocation5 + $0xd0] sm:$0xff] }
 0x56f   :  { %4723 = vmatprep.subr.bf16.mxu0 %v4722_v54  ;;  %v4734_v31 = vpack.c.bf16 %v3285_v30, %v3282_v9  ;;  %v3305_v18 = vpop.permute.xlu1 %3304 }
 0x570   :  { %v3300_v58 = vpop.permute.xlu0 %3299 }
 0x571   :  { %4144 = vmatmul.mubr.msk.f32.gmra.mrb[10].mxu0 %vm7096_vm14, %v3255_v15  ;;  %vm3608_vm14 = vcmask 254080  }
 0x572   :  { %4725 = vmatpush3.bf16.msra.mxu0 %v4722_v54  ;;  %4232 = vmatprep.mubr.msk.f32.mxu0 %vm7097_vm2, %v3254_v34  ;;  %vm3622_vm2 = vcmask 385280  }
 0x573   :  { %4727 = vmatprep.subr.bf16.mxu0 %v4726_v53 }
 0x576   :  { %4729 = vmatpush3.bf16.msra.mxu0 %v4726_v53 }
 0x577   :  { %4731 = vmatprep.subr.bf16.mxu0 %v4730_v46 }
 0x57a   :  { %4733 = vmatpush3.bf16.msra.mxu0 %v4730_v46 }
 0x57b   :  { %4735 = vmatprep.subr.bf16.mxu0 %v4734_v31 }
 0x57e   :  { %4737 = vmatpush3.bf16.msra.mxu0 %v4734_v31 }
 0x57f   :  { %4739 = vmatprep.subr.bf16.mxu0 %v4738_v2 }
 0x582   :  { %4741 = vmatpush3.bf16.msra.mxu0 %v4738_v2 }
 0x583   :  { %4230 = vmatprep.subr.msk.mxu0 %vm7098_vm4, %v3294_v32  ;;  %vm3636_vm4 = vcmask 516480  }
 0x586   :  { %4231 = vmatpush3.msk.msra.mxu0 %vm7099_vm5, %v3294_v32  ;;  %vm3650_vm5 = vcmask 647680  }
 0x587   :  { %4233 = vmatmul.mubr.msk.f32.vlgmr.msra.gmra.mrb[12].mxu0 %vm7100_vm15, %v3255_v15  ;;  %4769 = vmatprep.subr.bf16.mxu0 %v7066_v28  ;;  %vm3664_vm15 = vcmask 778880  }
 0x588   :  { %4771 = vmatpush1.bf16.msra.mxu0 %v6593_v39  ;;  %v3499_v39 = vld [vmem:[%s6987_s6 + $0x40] sm:$0xff] }
 0x589   :  { %4772 = vmatprep.subr.bf16.mxu0 %v7066_v28 }
 0x58c   :  { %4774 = vmatpush1.bf16.msra.mxu0 %v6604_v4  ;;  %v3500_v4 = vld [vmem:[%s6987_s6 + $0x48] sm:$0xff]  ;;  %s5025_s6 = smov 32  }
 0x58d   :  { %4775 = vmatprep.subr.bf16.mxu0 %v7066_v28 }
 0x590   :  { %4777 = vmatpush1.bf16.msra.mxu0 %v6620_v21  ;;  %v4755_v21 = vpack.c.bf16 %v3500_v4, %v3499_v39  ;;  %v3989_v39 = vld [vmem:[%s6988_s7] sm:$0xff]  ;;  %v3991_v4 = vld [vmem:[%s6988_s7 + $0x10] sm:$0xff] }
 0x591   :  { %4778 = vmatprep.subr.bf16.mxu0 %v7066_v28  ;;  %v4800_v27 = vpack.c.bf16 %v3992_v52, %v3991_v4 }
 0x592   :  { %4756 = vmatpush1.bf16.msra.mxu1 %v4755_v21 }
 0x593   :  { %4757 = vmatprep.subr.bf16.mxu1 %v7066_v28 }
 0x594   :  { %4780 = vmatpush1.bf16.msra.mxu0 %v4752_v38  ;;  %v3990_v38 = vld [vmem:[%s6988_s7 + $0x8] sm:$0xff] }
 0x595   :  { %4781 = vmatprep.subr.bf16.mxu0 %v7066_v28 }
 0x596   :  { %4759 = vmatpush1.bf16.msra.mxu1 %v4758_v1 }
 0x597   :  { %4760 = vmatprep.subr.bf16.mxu1 %v7066_v28 }
 0x598   :  { %4783 = vmatpush1.bf16.msra.mxu0 %v4755_v21  ;;  %v4797_v21 = vpack.c.bf16 %v3990_v38, %v3989_v39 }
 0x599   :  { %4784 = vmatprep.subr.bf16.mxu0 %v7066_v28 }
 0x59a   :  { %4762 = vmatpush1.bf16.msra.mxu1 %v4761_v14 }
 0x59b   :  { %4763 = vmatprep.subr.bf16.mxu1 %v7066_v28 }
 0x59c   :  { %4786 = vmatpush1.bf16.msra.mxu0 %v4758_v1  ;;  %v3993_v1 = vld [vmem:[%s6988_s7 + $0x20] sm:$0xff] }
 0x59d   :  { %4787 = vmatprep.subr.bf16.mxu0 %v7066_v28  ;;  %v4803_v12 = vpack.c.bf16 %v3994_v3, %v3993_v1 }
 0x59e   :  { %4765 = vmatpush1.bf16.msra.mxu1 %v4764_v35 }
 0x59f   :  { %4766 = vmatprep.subr.bf16.mxu1 %v7066_v28 }
 0x5a0   :  { %4789 = vmatpush1.bf16.msra.mxu0 %v4761_v14 }
 0x5a1   :  { %4790 = vmatprep.subr.bf16.mxu0 %v7066_v28 }
 0x5a2   :  { %4768 = vmatpush1.bf16.msra.mxu1 %v4767_v56 }
 0x5a3   :  { %4796 = vmatprep.subr.bf16.mxu1 %v7066_v28 }
 0x5a4   :  { %4792 = vmatpush1.bf16.msra.mxu0 %v4764_v35 }
 0x5a5   :  { %4793 = vmatprep.subr.bf16.mxu0 %v7066_v28 }
 0x5a8   :  { %4795 = vmatpush1.bf16.msra.mxu0 %v4767_v56 }
 0x640   :  { %v3388_v63 = vpop.f32.mrb[8].mxu0 }
 0x641   :  { %v3389_v0 = vadd.f32 %v3388_v63, %v3300_v58  ;;  %v3390_v8 = vpop.f32.mrb[9].mxu0 }
 0x642   :  { %v3391_v11 = vadd.f32 %v3390_v8, %v3300_v58  ;;  %v3996_v8 = vld [vmem:[%s6988_s7 + $0x38] sm:$0xff] }
 0x643   :  { %4934 = vtanh.f32 %v3389_v0  ;;  %v3995_v0 = vld [vmem:[%s6988_s7 + $0x30] sm:$0xff] }
 0x644   :  { %4936 = vtanh.f32 %v3391_v11  ;;  %v3394_v19 = vpop.f32.mrb[10].mxu0 }
 0x645   :  { %v3395_v26 = vadd.f32 %v3394_v19, %v3305_v18  ;;  %v3396_v29 = vpop.f32.mrb[11].mxu0 }
 0x646   :  { %v3397_v7 = vadd.f32 %v3396_v29, %v3305_v18  ;;  %v3997_v29 = vld [vmem:[%s6988_s7 + $0x40] sm:$0xff] }
 0x647   :  { %4938 = vtanh.f32 %v3395_v26 }
 0x648   :  { %4940 = vtanh.f32 %v3397_v7  ;;  %v3998_v7 = vld [vmem:[%s6988_s7 + $0x48] sm:$0xff] }
 0x64d   :  { %v4935_v40 = vpop.eup %4934 }
 0x64e   :  { %v4937_v48 = vpop.eup %4936 }
 0x64f   :  { %3761 = vrot.lane.b32.xlu0 %v4937_v48, %s5006_s17  ;;  %4148 = vmatprep.mubr.msk.f32.mxu1 %vm7101_vm7, %v4937_v48  ;;  %vm3678_vm7 = vcmask 910080  }
 0x650   :  { %3580 = vmatmul.mubr.f32.vlgmr.msra.gmra.mrb[10].mxu1 %v4935_v40  ;;  %v4809_v40 = vpack.c.bf16 %v3998_v7, %v3997_v29 }
 0x651   :  { %v4939_v49 = vpop.eup %4938  ;;  %4798 = vmatpush1.bf16.msra.mxu1 %v4797_v21 }
 0x652   :  { %v4941_v59 = vpop.eup %4940  ;;  %3484 = vst [vmem:[#allocation6 + $0x18] sm:$0xf] %v4939_v49  ;;  %4799 = vmatprep.subr.bf16.mxu1 %v7066_v28 }
 0x653   :  { %3485 = vst [vmem:[#allocation6 + $0x20] sm:$0xf] %v4941_v59  ;;  %v3999_v59 = vld [vmem:[%s6988_s7 + $0x50] sm:$0xff] }
 0x655   :  { %4801 = vmatpush1.bf16.msra.mxu1 %v4800_v27 }
 0x656   :  { %4802 = vmatprep.subr.bf16.mxu1 %v7066_v28 }
 0x659   :  { %v3489_v60 = vld [vmem:[#allocation6 + $0x18] sm:$0xf]  ;;  %4804 = vmatpush1.bf16.msra.mxu1 %v4803_v12 }
 0x65a   :  { %v4234_v6 = vpop.f32.mrb[12].mxu0  ;;  %v3490_v10 = vld [vmem:[#allocation6 + $0x20] sm:$0xf]  ;;  %4805 = vmatprep.subr.bf16.mxu1 %v7066_v28 }
 0x65b   :  { %v3737_v20 = vld [vmem:[#allocation6 + $0x20] sm:$0xf]  ;;  %v3471_v22 = vadd.f32 %v4234_v6, %v3305_v18  ;;  %v3465_v37 = vpop.f32.mrb[13].mxu0  ;;  %4149 = vmatprep.mubr.msk.f32.mxu1 %vm7102_vm8, %v3490_v10  ;;  %vm3692_vm8 = vcmask 1041280   ;;  %v4806_v18 = vpack.c.bf16 %v3996_v8, %v3995_v0 }
 0x65c   :  { %3765 = vrot.lane.b32.xlu0 %v3737_v20, %s5006_s17  ;;  %v3466_v41 = vadd.f32 %v3465_v37, %v3300_v58  ;;  %3585 = vmatmul.mubr.f32.gmra.mrb[12].mxu1 %v3489_v60  ;;  %v4000_v60 = vld [vmem:[%s6988_s7 + $0x58] sm:$0xff] }
 0x65d   :  { %4942 = vtanh.f32 %v3471_v22  ;;  %4807 = vmatpush1.bf16.msra.mxu1 %v4806_v18  ;;  %v4812_v6 = vpack.c.bf16 %v4000_v60, %v3999_v59 }
 0x65e   :  { %4944 = vtanh.f32 %v3466_v41  ;;  %4808 = vmatprep.subr.bf16.mxu1 %v7066_v28  ;;  %v4001_v41 = vld [vmem:[%s6988_s7 + $0x60] sm:$0xff] }
 0x661   :  { %4810 = vmatpush1.bf16.msra.mxu1 %v4809_v40 }
 0x662   :  { %4811 = vmatprep.subr.bf16.mxu1 %v7066_v28 }
 0x665   :  { %4813 = vmatpush1.bf16.msra.mxu1 %v4812_v6 }
 0x666   :  { %4814 = vmatprep.subr.bf16.mxu1 %v7066_v28 }
 0x667   :  { %v4943_v57 = vpop.eup %4942 }
 0x668   :  { %v4945_v44 = vpop.eup %4944  ;;  %3486 = vst.msk [vmem:[#allocation6 + $0x28] sm:$0xf] %vm7103_vm10, %v4943_v57  ;;  %v4002_v57 = vld [vmem:[%s6988_s7 + $0x68] sm:$0xff]  ;;  %vm4030_vm10 = vcmask 523264  }
 0x669   :  { %3483 = vst.msk [vmem:[#allocation6 + $0x10] sm:$0xff] %vm3482_vm13, %v4945_v44  ;;  %vm7110_vm13 = vmmov %vm7106_vm1 }
 0x66f   :  { %v3738_v62 = vld [vmem:[#allocation6 + $0x28] sm:$0xf] }
 0x670   :  { %v3736_v61 = vld [vmem:[#allocation6 + $0x10] sm:$0xff] }
 0x671   :  { %3763 = vrot.lane.b32.xlu1 %v3736_v61, %s5006_s17  ;;  %v4815_v61 = vpack.c.bf16 %v4002_v57, %v4001_v41 }
 0x673   :  { %4816 = vmatpush1.bf16.msra.mxu1 %v4815_v61 }
 0x674   :  { %4817 = vmatprep.subr.bf16.mxu1 %v7066_v28 }
 0x675   :  { %3767 = vrot.lane.b32.xlu1 %v3738_v62, %s5006_s17 }
 0x6c1   :  { %v3762_v16 = vpop.permute.xlu0 %3761 }
 0x6ce   :  { %v3766_v42 = vpop.permute.xlu0 %3765 }
 0x6e3   :  { %v3764_v17 = vpop.permute.xlu1 %3763 }
 0x6e4   :  { %v3769_v34 = vsel %vm7104_vm0, %v3762_v16, %v3764_v17  ;;  %4160 = vmatprep.mubr.msk.f32.mxu0 %vm7105_vm9, %v3764_v17  ;;  %v4003_v16 = vld [vmem:[%s6988_s7 + $0x70] sm:$0xff]  ;;  %v4004_v17 = vld [vmem:[%s6988_s7 + $0x78] sm:$0xff]  ;;  %vm4103_vm0 = vcmask 74752  }
 0x6e5   :  { %3842 = vmatmul.mubr.f32.vlgmr.msra.gmra.mrb[14].mxu0 %v3769_v34  ;;  %v4818_v34 = vpack.c.bf16 %v4004_v17, %v4003_v16 }
 0x6e7   :  { %v3768_v24 = vpop.permute.xlu1 %3767  ;;  %4819 = vmatpush1.bf16.msra.mxu1 %v4818_v34 }
 0x6e8   :  { %4161 = vmatprep.mubr.msk.f32.mxu0 %vm7106_vm1, %v3768_v24  ;;  %v3770_v54 = vsel %vm7107_vm3, %v3766_v42, %v3768_v24  ;;  %4820 = vmatprep.subr.bf16.mxu1 %v7066_v28 }
 0x6e9   :  { %3847 = vmatmul.mubr.f32.gmra.mrb[16].mxu0 %v3770_v54  ;;  %v4005_v54 = vld [vmem:[%s6988_s7 + $0x80] sm:$0xff] }
 0x723   :  { %v3581_v55 = vpop.f32.mrb[10].mxu1 }
 0x724   :  { %3590 = vst.msk [vmem:[#allocation7] sm:$0xff] %vm7108_vm6, %v3581_v55  ;;  %v3583_v15 = vpop.f32.mrb[11].mxu1  ;;  %v4006_v55 = vld [vmem:[%s6988_s7 + $0x88] sm:$0xff] }
 0x725   :  { %v4821_v15 = vpack.c.bf16 %v4006_v55, %v4005_v54 }
 0x727   :  { %4822 = vmatpush1.bf16.msra.mxu1 %v4821_v15 }
 0x728   :  { %4823 = vmatprep.subr.bf16.mxu1 %v7066_v28 }
 0x72b   :  { %v4150_v51 = vld.sshfl [vmem:[#allocation7 + $0x1] sm:$0x1 pattern:$0x76325410]  ;;  %v3593_v53 = vld [vmem:[#allocation7] sm:$0x1] }
 0x72c   :  { %3605 = vrot.lane.b32.xlu0 %v4150_v51, %s4996_s25  ;;  %3595 = vst.msk [vmem:[#allocation8] sm:$0x1] %vm3594_vm12, %v3593_v53  ;;  %v4151_v13 = vld.sshfl [vmem:[#allocation7 + $0x2] sm:$0x1 pattern:$0x76325410] }
 0x72d   :  { %v4152_v30 = vld.sshfl [vmem:[#allocation7 + $0x3] sm:$0x1 pattern:$0x76325410]  ;;  %v4007_v53 = vld [vmem:[%s6988_s7 + $0x90] sm:$0xff] }
 0x72e   :  { %v4153_v9 = vld.sshfl [vmem:[#allocation7 + $0x4] sm:$0x1 pattern:$0x76325410] }
 0x72f   :  { %v3586_v25 = vpop.f32.mrb[12].mxu1  ;;  %v4154_v2 = vld.sshfl [vmem:[#allocation7 + $0x5] sm:$0x1 pattern:$0x76325410] }
 0x730   :  { %3619 = vrot.lane.b32.xlu0 %v4151_v13, %s5025_s6  ;;  %3592 = vst.msk [vmem:[#allocation7 + $0x8] sm:$0xf] %vm3591_vm11, %v3586_v25  ;;  %v3588_v46 = vpop.f32.mrb[13].mxu1  ;;  %v4008_v13 = vld [vmem:[%s6988_s7 + $0x98] sm:$0xff] }
 0x731   :  { %v4155_v36 = vld.sshfl [vmem:[#allocation7 + $0x6] sm:$0x1 pattern:$0x76325410]  ;;  %v4824_v25 = vpack.c.bf16 %v4008_v13, %v4007_v53  ;;  %v4009_v46 = vld [vmem:[%s6988_s7 + $0xa0] sm:$0xff] }
 0x732   :  { %v4156_v43 = vld.sshfl [vmem:[#allocation7 + $0x7] sm:$0x1 pattern:$0x76325410] }
 0x733   :  { %4825 = vmatpush1.bf16.msra.mxu1 %v4824_v25 }
 0x734   :  { %3633 = vrot.lane.b32.xlu0 %v4152_v30, %s5026_s4  ;;  %v4010_v30 = vld [vmem:[%s6988_s7 + $0xa8] sm:$0xff]  ;;  %4826 = vmatprep.subr.bf16.mxu1 %v7066_v28 }
 0x737   :  { %v4157_v31 = vld.sshfl [vmem:[#allocation7 + $0x9] sm:$0x1 pattern:$0x76325410]  ;;  %v3694_v5 = vld [vmem:[#allocation7 + $0x8] sm:$0x1] }
 0x738   :  { %3647 = vrot.lane.b32.xlu0 %v4153_v9, %s5027_s20  ;;  %3705 = vrot.lane.b32.xlu1 %v4157_v31, %s4996_s25  ;;  %3695 = vst.msk [vmem:[#allocation8 + $0x2] sm:$0x1] %vm3594_vm12, %v3694_v5  ;;  %v4158_v50 = vld.sshfl [vmem:[#allocation7 + $0xa] sm:$0x1 pattern:$0x76325410]  ;;  %v4827_v31 = vpack.c.bf16 %v4010_v30, %v4009_v46 }
 0x739   :  { %v4159_v32 = vld.sshfl [vmem:[#allocation7 + $0xb] sm:$0x1 pattern:$0x76325410] }
 0x73a   :  { %v4011_v5 = vld [vmem:[%s6988_s7 + $0xb0] sm:$0xff]  ;;  %4828 = vmatpush1.bf16.msra.mxu1 %v4827_v31 }
 0x73b   :  { %4829 = vmatprep.subr.bf16.mxu1 %v7066_v28 }
 0x73c   :  { %3661 = vrot.lane.b32.xlu0 %v4154_v2, %s5019_s16  ;;  %3718 = vrot.lane.b32.xlu1 %v4158_v50, %s5025_s6  ;;  %v4012_v50 = vld [vmem:[%s6988_s7 + $0xb8] sm:$0xff] }
 0x740   :  { %3675 = vrot.lane.b32.xlu0 %v4155_v36, %s7109_s0  ;;  %3731 = vrot.lane.b32.xlu1 %v4159_v32, %s5026_s4  ;;  %v4830_v32 = vpack.c.bf16 %v4012_v50, %v4011_v5 }
 0x742   :  { %4831 = vmatpush1.bf16.msra.mxu1 %v4830_v32 }
 0x744   :  { %3689 = vrot.lane.b32.xlu0 %v4156_v43, %s5006_s17 }
 0x79e   :  { %v3606_v14 = vpop.permute.xlu0 %3605 }
 0x79f   :  { %3609 = vst.msk [vmem:[#allocation8] sm:$0x1] %vm3608_vm14, %v3606_v14 }
 0x7a2   :  { %v3620_v23 = vpop.permute.xlu0 %3619 }
 0x7a3   :  { %3623 = vst.msk [vmem:[#allocation8] sm:$0x1] %vm3622_vm2, %v3620_v23  ;;  %v4172_v23 = vld [vmem:[%s6989_s8] ss:$0 sm:$0xff] }
 0x7a6   :  { %v3634_v33 = vpop.permute.xlu0 %3633 }
 0x7a7   :  { %3637 = vst.msk [vmem:[#allocation8] sm:$0x1] %vm3636_vm4, %v3634_v33 }
 0x7aa   :  { %v3648_v35 = vpop.permute.xlu0 %3647  ;;  %v3706_v45 = vpop.permute.xlu1 %3705 }
 0x7ab   :  { %3651 = vst.msk [vmem:[#allocation8] sm:$0x1] %vm3650_vm5, %v3648_v35 }
 0x7ac   :  { %3708 = vst.msk [vmem:[#allocation8 + $0x2] sm:$0x1] %vm3608_vm14, %v3706_v45 }
 0x7ae   :  { %v3662_v47 = vpop.permute.xlu0 %3661  ;;  %v3719_v56 = vpop.permute.xlu1 %3718 }
 0x7af   :  { %3665 = vst.msk [vmem:[#allocation8] sm:$0x1] %vm3664_vm15, %v3662_v47 }
 0x7b0   :  { %3721 = vst.msk [vmem:[#allocation8 + $0x2] sm:$0x1] %vm3622_vm2, %v3719_v56 }
 0x7b2   :  { %v3676_v58 = vpop.permute.xlu0 %3675  ;;  %v3732_v63 = vpop.permute.xlu1 %3731 }
 0x7b3   :  { %3679 = vst.msk [vmem:[#allocation8] sm:$0x1] %vm3678_vm7, %v3676_v58 }
 0x7b4   :  { %3734 = vst.msk [vmem:[#allocation8 + $0x2] sm:$0x1] %vm3636_vm4, %v3732_v63 }
 0x7b6   :  { %v3690_v11 = vpop.permute.xlu0 %3689 }
 0x7b7   :  { %3693 = vst.msk [vmem:[#allocation8] sm:$0x1] %vm3692_vm8, %v3690_v11 }
 0x7b8   :  { %v3843_v19 = vpop.f32.mrb[14].mxu0 }
 0x7b9   :  { %3852 = vst.msk [vmem:[#allocation7] sm:$0xff] %vm7110_vm13, %v3843_v19  ;;  %v3845_v26 = vpop.f32.mrb[15].mxu0 }
 0x7bc   :  { %v3848_v48 = vpop.f32.mrb[16].mxu0 }
 0x7bd   :  { %3853 = vst.msk [vmem:[#allocation7 + $0x8] sm:$0xf] %vm3591_vm11, %v3848_v48  ;;  %v3850_v49 = vpop.f32.mrb[17].mxu0 }
 0x7c0   :  { %v4166_v10 = vld.sshfl [vmem:[#allocation7 + $0x5] sm:$0x1 pattern:$0x76325410]  ;;  %v3854_v20 = vld [vmem:[#allocation7] sm:$0x1] }
 0x7c1   :  { %3917 = vrot.lane.b32.xlu0 %v4166_v10, %s5019_s16  ;;  %v4162_v22 = vld.sshfl [vmem:[#allocation7 + $0x1] sm:$0x1 pattern:$0x76325410]  ;;  %3855 = vst.msk [vmem:[#allocation8 + $0x1] sm:$0x1] %vm3594_vm12, %v3854_v20 }
 0x7c2   :  { %3865 = vrot.lane.b32.xlu1 %v4162_v22, %s4996_s25  ;;  %v4167_v37 = vld.sshfl [vmem:[#allocation7 + $0x6] sm:$0x1 pattern:$0x76325410] }
 0x7c3   :  { %v4163_v44 = vld.sshfl [vmem:[#allocation7 + $0x2] sm:$0x1 pattern:$0x76325410] }
 0x7c4   :  { %v3947_v62 = vld [vmem:[#allocation7 + $0x8] sm:$0x1]  ;;  %v4168_v42 = vld.sshfl [vmem:[#allocation7 + $0x7] sm:$0x1 pattern:$0x76325410] }
 0x7c5   :  { %3930 = vrot.lane.b32.xlu0 %v4167_v37, %s7109_s0  ;;  %3948 = vst.msk [vmem:[#allocation8 + $0x3] sm:$0x1] %vm3594_vm12, %v3947_v62  ;;  %v4164_v24 = vld.sshfl [vmem:[#allocation7 + $0x3] sm:$0x1 pattern:$0x76325410] }
 0x7c6   :  { %3878 = vrot.lane.b32.xlu1 %v4163_v44, %s5025_s6  ;;  %v4165_v51 = vld.sshfl [vmem:[#allocation7 + $0x4] sm:$0x1 pattern:$0x76325410] }
 0x7c7   :  { %v4169_v9 = vld.sshfl [vmem:[#allocation7 + $0x9] sm:$0x1 pattern:$0x76325410] }
 0x7c8   :  { %v4170_v2 = vld.sshfl [vmem:[#allocation7 + $0xa] sm:$0x1 pattern:$0x76325410] }
 0x7c9   :  { %3943 = vrot.lane.b32.xlu0 %v4168_v42, %s5006_s17  ;;  %v4171_v36 = vld.sshfl [vmem:[#allocation7 + $0xb] sm:$0x1 pattern:$0x76325410] }
 0x7ca   :  { %3891 = vrot.lane.b32.xlu1 %v4164_v24, %s5026_s4 }
 0x7ce   :  { %3904 = vrot.lane.b32.xlu1 %v4165_v51, %s5027_s20 }
 0x7d2   :  { %3958 = vrot.lane.b32.xlu1 %v4169_v9, %s4996_s25 }
 0x7d6   :  { %3971 = vrot.lane.b32.xlu1 %v4170_v2, %s5025_s6  ;;  %s5028_s6 = smov [#allocation9]  }
 0x7da   :  { %3984 = vrot.lane.b32.xlu1 %v4171_v36, %s5026_s4  ;;  %s4111_s4 = sshll.u32 %s5028_s6, 4  ;;  %s4112_s4 = int_to_ptr.vmem [resolvable:$true] %s4111_s4 }
 0x7db   :  { %s4953_s12 = scalar_lea.vmem %s4112_s4, 32  ;;  %p4958_p1 = scmp.lt.s32.totalorder %s4112_s4, %s4112_s4 }
 0x7dc   :  { %p4954_p0 = scmp.ne.s32.totalorder %s4112_s4, %s4953_s12  ;;  %p4959_p2 = scmp.lt.s32.totalorder %s4953_s12, %s4953_s12 }
 0x7de   :  { %p4960_p3 = por %p4959_p2, %p4958_p1 }
 0x7e0   :  { %p4961_p4 = pnand %p4960_p3, %p4954_p0 }
 0x833   :  { %v3918_v39 = vpop.permute.xlu0 %3917 }
 0x834   :  { %v3866_v43 = vpop.permute.xlu1 %3865 }
 0x835   :  { %3868 = vst.msk [vmem:[#allocation8 + $0x1] sm:$0x1] %vm3608_vm14, %v3866_v43 }
 0x837   :  { %v3931_v21 = vpop.permute.xlu0 %3930 }
 0x838   :  { %v3879_v38 = vpop.permute.xlu1 %3878 }
 0x839   :  { %3881 = vst.msk [vmem:[#allocation8 + $0x1] sm:$0x1] %vm3622_vm2, %v3879_v38 }
 0x83b   :  { %v3944_v28 = vpop.permute.xlu0 %3943 }
 0x83c   :  { %v3892_v4 = vpop.permute.xlu1 %3891 }
 0x83d   :  { %3894 = vst.msk [vmem:[#allocation8 + $0x1] sm:$0x1] %vm3636_vm4, %v3892_v4 }
 0x840   :  { %v3905_v52 = vpop.permute.xlu1 %3904 }
 0x841   :  { %3907 = vst.msk [vmem:[#allocation8 + $0x1] sm:$0x1] %vm3650_vm5, %v3905_v52 }
 0x842   :  { %3920 = vst.msk [vmem:[#allocation8 + $0x1] sm:$0x1] %vm3664_vm15, %v3918_v39 }
 0x843   :  { %3933 = vst.msk [vmem:[#allocation8 + $0x1] sm:$0x1] %vm3678_vm7, %v3931_v21 }
 0x844   :  { %3946 = vst.msk [vmem:[#allocation8 + $0x1] sm:$0x1] %vm3692_vm8, %v3944_v28  ;;  %v3959_v27 = vpop.permute.xlu1 %3958 }
 0x845   :  { %3961 = vst.msk [vmem:[#allocation8 + $0x3] sm:$0x1] %vm3608_vm14, %v3959_v27 }
 0x848   :  { %v3972_v1 = vpop.permute.xlu1 %3971 }
 0x849   :  { %3974 = vst.msk [vmem:[#allocation8 + $0x3] sm:$0x1] %vm3622_vm2, %v3972_v1 }
 0x84c   :  { %v3985_v3 = vpop.permute.xlu1 %3984 }
 0x84d   :  { %3987 = vst.msk [vmem:[#allocation8 + $0x3] sm:$0x1] %vm3636_vm4, %v3985_v3 }
 0x854   :  { %v4173_v12 = vld.sshfl [vmem:[#allocation8] sm:$0x33 pattern:$0x76325410] }
 0x855   :  { %v4028_v14 = vcombine.high %v4173_v12, %v4173_v12 }
 0x857   :  { %4174 = vmatprep.mubr.msk.f32.mxu1 %vm4030_vm10, %v4028_v14 }
 0x858   :  { %4098 = vmatmul.mubr.f32.vlgmr.msra.gmra.mrb[14].mxu1 %v4173_v12 }
 0x92b   :  { %v4099_v33 = vpop.f32.mrb[14].mxu1 }
 0x92c   :  { %v4100_v35 = vadd.f32 %v4172_v23, %v4099_v33  ;;  %v4101_v45 = vpop.f32.mrb[15].mxu1 }
 0x92e   :  { %4104 = vst.msk [vmem:[#allocation9] sm:$0x3] %vm4103_vm0, %v4100_v35 }
 0x92f   :  { %4964 = shalt.err (!%p4961_p4)
}
 0x930   :  { %s4965_s27 = scalar_lea.hbm %s6990_s9, 32 }
 0x931   :  { %p4966_p5 = scmp.ne.s32.totalorder %s6990_s9, %s4965_s27  ;;  %p4969_p6 = scmp.lt.u32.totalorder %s4965_s27, %s6990_s9 }
 0x933   :  { %p4971_p7 = pnand %p4969_p6, %p4966_p5 }
 0x935   :  { %4974 = shalt.err (!%p4971_p7)
}
 0x936   :  { %4114 = dma.vmem_to_hbm [thread:$0]  %s4112_s4, 32, %s6990_s9, [#allocation10]  }
 0x937   :  { %4975 = dma.done.wait [#allocation10], 32  }
 0x938   :  { %4976 = vsyncadd [#allocation10], 4294967264 }
 0x939   :  { %4118 = vsyncpa [#allocation10], 1 }

</bundles_post_ra>
